<compile_context>
chip_gen: v5e
topology: v5e:2x2
jax: 0.10.0
libtpu: 0.0.40
codegen_flags: <defaults>
</compile_context>

<pallas_src>
import jax
import jax.numpy as jnp
import numpy as np
from jax.experimental import pallas as pl
from jax.experimental.pallas import tpu as pltpu


# ----------------------------- model config ---------------------------------
T = 8          # seq_len
B = 4          # batch
X_DIM = 16     # x_dim (== y_dim)
Z_DIM = 8      # z_dim
DF = 32        # dense_x[-1] == dense_z[-1] == dense_hx_z[-1] == dense_hz_x[-1] == dense_h_z[-1]
H = 32         # dim_RNN (num_RNN = 1)

# --------------------- slab layouts (128-lane-aligned blocks) ----------------
# weight slab: (DF, W_SLAB) f32, one HBM->VMEM DMA
W_SLAB = 1536
WC_H, WC_FX, WC_FZ, WC_FXW, WC_FZW, WC_INF, WC_G, WC_HZ, WC_PRI = (
    0, 256, 512, 768, 896, 1024, 1152, 1280, 1408)
# bias slab: (1, B_SLAB) f32
B_SLAB = 1152
BC_FXB, BC_FZB, BC_GE, BC_DEC, BC_INF, BC_G, BC_HZ, BC_PRI = (
    0, 128, 256, 512, 640, 768, 896, 1024)
# data slab: (T*bp, DATA_W) f32 : [x(16) | eps(8) | pad]
DATA_W = 128
# output slab: (T*bp, OUT_W) f32 : [y(16)|zm(8)|zv(8)|z(8)|h(32)|zmp(8)|zvp(8)|pad(40)]
OUT_W = 128
OC_Y, OC_ZM, OC_ZV, OC_Z, OC_H, OC_ZMP, OC_ZVP = 0, 16, 24, 32, 40, 72, 80


# --------------------------- parameter helpers -------------------------------
def _linear(key, fan_in, fan_out):
    """PyTorch-style Linear init, weights pre-transposed to (in, out)."""
    k1, k2 = jax.random.split(key)
    bound = 1.0 / np.sqrt(fan_in)
    w = jax.random.uniform(k1, (fan_in, fan_out), jnp.float32, -bound, bound)
    b = jax.random.uniform(k2, (1, fan_out), jnp.float32, -bound, bound)
    return w, b


def init_params(key):
    keys = jax.random.split(key, 12)
    p = {}
    p["fx_w"], p["fx_b"] = _linear(keys[0], X_DIM, DF)          # feature_extractor_x
    p["fz_w"], p["fz_b"] = _linear(keys[1], Z_DIM, DF)          # feature_extractor_z
    p["hxz_w"], p["hxz_b"] = _linear(keys[2], DF + H, DF)       # mlp_hx_z
    p["im_w"], p["im_b"] = _linear(keys[3], DF, Z_DIM)          # inf_mean
    p["iv_w"], p["iv_b"] = _linear(keys[4], DF, Z_DIM)          # inf_logvar
    p["hzx_w"], p["hzx_b"] = _linear(keys[5], DF + H, DF)       # mlp_hz_x
    p["g_w"], p["g_b"] = _linear(keys[6], DF, X_DIM)            # gen_out
    p["hz_w"], p["hz_b"] = _linear(keys[7], H, DF)              # mlp_h_z
    p["pm_w"], p["pm_b"] = _linear(keys[8], DF, Z_DIM)          # prior_mean
    p["pv_w"], p["pv_b"] = _linear(keys[9], DF, Z_DIM)          # prior_logvar
    # LSTM(2*DF, H), 1 layer, pre-transposed: W_ih^T (2DF,4H), W_hh^T (H,4H).
    # PyTorch gate column order: [i, f, g, o].
    k1, k2, k3, k4 = jax.random.split(keys[10], 4)
    bound = 1.0 / np.sqrt(H)
    p["wih"] = jax.random.uniform(k1, (2 * DF, 4 * H), jnp.float32, -bound, bound)
    p["whh"] = jax.random.uniform(k2, (H, 4 * H), jnp.float32, -bound, bound)
    p["bih"] = jax.random.uniform(k3, (1, 4 * H), jnp.float32, -bound, bound)
    p["bhh"] = jax.random.uniform(k4, (1, 4 * H), jnp.float32, -bound, bound)
    return p


# --------------------------- host-side slab packing --------------------------
# LSTM gate permutation [i, f, g, o] -> [i, f, o, g]; g columns scaled by 2 so
# the kernel can recover tanh(g) = 2*sigmoid(2*g) - 1 from ONE sigmoid pass.
_GATE_PERM = np.concatenate(
    [np.arange(0, H), np.arange(H, 2 * H), np.arange(3 * H, 4 * H), np.arange(2 * H, 3 * H)])
_GATE_SCALE = np.ones((1, 4 * H), np.float32)
_GATE_SCALE[:, 3 * H:] = 2.0


def _pack_params(p):
    H4 = 4 * H
    wih = p["wih"][:, _GATE_PERM] * _GATE_SCALE
    whh = p["whh"][:, _GATE_PERM] * _GATE_SCALE
    b_lstm = (p["bih"] + p["bhh"])[:, _GATE_PERM] * _GATE_SCALE            # (1, 4H)

    # fused N-dim matmuls:
    #   h_t    @ [whh | hxz_w[DF:] | hzx_w[DF:]]   (N = 4H + 2DF)
    #   feat_x @ [wih[:DF] | hxz_w[:DF]]           (N = 4H + DF)  (hoisted out of loop)
    #   feat_z @ [wih[DF:] | hzx_w[:DF]]           (N = 4H + DF)
    w_h = jnp.concatenate([whh, p["hxz_w"][DF:], p["hzx_w"][DF:]], axis=1)   # (32, 192)
    w_fx = jnp.concatenate([wih[:DF], p["hxz_w"][:DF]], axis=1)              # (32, 160)
    w_fz = jnp.concatenate([wih[DF:], p["hzx_w"][:DF]], axis=1)              # (32, 160)
    w_inf = jnp.concatenate([p["im_w"], p["iv_w"], 0.5 * p["iv_w"]], axis=1)  # (32, 24)
    w_pri = jnp.concatenate([p["pm_w"], p["pv_w"]], axis=1)                   # (32, 16)

    wslab = jnp.zeros((DF, W_SLAB), jnp.float32)
    for mat, col in ((w_h, WC_H), (w_fx, WC_FX), (w_fz, WC_FZ),
                     (p["fx_w"], WC_FXW), (p["fz_w"], WC_FZW),
                     (w_inf, WC_INF), (p["g_w"], WC_G),
                     (p["hz_w"], WC_HZ), (w_pri, WC_PRI)):
        r, c = mat.shape
        wslab = wslab.at[0:r, col:col + c].set(mat)

    b_ge = jnp.concatenate([b_lstm, p["hxz_b"]], axis=1)                     # (1, 160)
    b_inf = jnp.concatenate([p["im_b"], p["iv_b"], 0.5 * p["iv_b"]], axis=1)  # (1, 24)
    b_pri = jnp.concatenate([p["pm_b"], p["pv_b"]], axis=1)                   # (1, 16)
    bslab = jnp.zeros((1, B_SLAB), jnp.float32)
    for vec, col in ((p["fx_b"], BC_FXB), (p["fz_b"], BC_FZB), (b_ge, BC_GE),
                     (p["hzx_b"], BC_DEC), (b_inf, BC_INF), (p["g_b"], BC_G),
                     (p["hz_b"], BC_HZ), (b_pri, BC_PRI)):
        c = vec.shape[1]
        bslab = bslab.at[:, col:col + c].set(vec)

    return wslab, bslab


# ------------------------------ fused kernel ----------------------------------
def vrnn_kernel(data_ref, w_ref, b_ref, out_ref, fxp_scr, h_scr, dec_scr):
    rows = data_ref.shape[0]          # T * bp
    bp = rows // T
    H4 = 4 * H
    f32 = jnp.float32

    # deterministic pad columns / pad rows in the output slab
    out_ref[...] = jnp.zeros(out_ref.shape, f32)

    # ---- stage 1 (pre-loop): feature_extractor_x + its gate/enc projection
    #      for ALL timesteps, with the LSTM and enc biases folded in ----------
    x_all = data_ref[:, 0:X_DIM]                                          # (rows, 16)
    feat_x = jnp.tanh(
        jnp.dot(x_all, w_ref[0:X_DIM, WC_FXW:WC_FXW + DF],
                preferred_element_type=f32)
        + b_ref[:, BC_FXB:BC_FXB + DF])                                   # (rows, DF)
    fxp_scr[...] = (
        jnp.dot(feat_x, w_ref[:, WC_FX:WC_FX + H4 + DF],
                preferred_element_type=f32)
        + b_ref[:, BC_GE:BC_GE + H4 + DF])                                # (rows, 160)

    # tiny loop-invariants only (keep vreg pressure low); other weights are
    # read from their VMEM refs inside the loop (loads are cheap).
    w_h = w_ref[:, WC_H:WC_H + H4 + 2 * DF]                               # (32, 192)
    fz_b = jnp.broadcast_to(b_ref[:, BC_FZB:BC_FZB + DF], (bp, DF))
    b_inf = jnp.broadcast_to(b_ref[:, BC_INF:BC_INF + 3 * Z_DIM], (bp, 3 * Z_DIM))

    h_t = jnp.zeros((bp, H), f32)
    c_t = jnp.zeros((bp, H), f32)

    # ---- stage 2: fully-unrolled recurrence (T is tiny); static slices ------
    for t in range(T):
        r0 = t * bp
        fxp_g = fxp_scr[r0:r0 + bp, 0:H4]            # gates(x) + lstm bias
        fxp_e = fxp_scr[r0:r0 + bp, H4:H4 + DF]      # enc(x)   + enc bias
        eps_t = data_ref[r0:r0 + bp, X_DIM:X_DIM + Z_DIM]

        # one fused matmul: h_t @ [whh | hxz_h | hzx_h]   (N = 192)
        # (v5e note: could be split 128+64 so the gate tile pops first; kept
        #  fused here since v6e/v7x do it in one 256-wide pass.)
        h_proj = jnp.dot(h_t, w_h, preferred_element_type=f32)

        # inference -> z   (heads fused: [mean | logvar | 0.5*logvar])
        enc = jnp.tanh(fxp_e + h_proj[:, H4:H4 + DF])
        inf = (jnp.dot(enc, w_ref[:, WC_INF:WC_INF + 3 * Z_DIM],
                       preferred_element_type=f32) + b_inf)
        z_t = inf[:, 0:Z_DIM] + eps_t * jnp.exp(inf[:, 2 * Z_DIM:3 * Z_DIM])

        # feature_extractor_z + its gate/dec projection
        feat_z = jnp.tanh(
            jnp.dot(z_t, w_ref[0:Z_DIM, WC_FZW:WC_FZW + DF],
                    preferred_element_type=f32) + fz_b)
        fz_proj = jnp.dot(feat_z, w_ref[:, WC_FZ:WC_FZ + H4 + DF],
                          preferred_element_type=f32)                    # (bp, 160)

        # stash per-step results (h is the PRE-update hidden state)
        out_ref[r0:r0 + bp, OC_ZM:OC_ZM + 2 * Z_DIM] = inf[:, 0:2 * Z_DIM]
        out_ref[r0:r0 + bp, OC_Z:OC_Z + Z_DIM] = z_t
        h_scr[r0:r0 + bp, :] = h_t
        # decoder tail deferred: store pre-activation only
        dec_scr[r0:r0 + bp, :] = fz_proj[:, H4:H4 + DF] + h_proj[:, H4 + DF:H4 + 2 * DF]

        # LSTM recurrence: all 4 gates through ONE sigmoid pass (g pre-scaled x2)
        gates = fxp_g + fz_proj[:, 0:H4] + h_proj[:, 0:H4]
        sig = jax.nn.sigmoid(gates)                                       # (bp, 128)
        g_g = 2.0 * sig[:, 3 * H:4 * H] - 1.0                             # == tanh(g_pre)
        c_t = sig[:, H:2 * H] * c_t + sig[:, 0:H] * g_g
        h_t = sig[:, 2 * H:3 * H] * jnp.tanh(c_t)

    # ---- stage 3 (post-loop): batched decoder tail + prior over all steps ---
    dec = jnp.tanh(dec_scr[...] + b_ref[:, BC_DEC:BC_DEC + DF])           # (rows, DF)
    y_all = (jnp.dot(dec, w_ref[:, WC_G:WC_G + X_DIM], preferred_element_type=f32)
             + b_ref[:, BC_G:BC_G + X_DIM])
    out_ref[:, OC_Y:OC_Y + X_DIM] = y_all

    h_all = h_scr[...]
    out_ref[:, OC_H:OC_H + H] = h_all
    prior = jnp.tanh(
        jnp.dot(h_all, w_ref[:, WC_HZ:WC_HZ + DF], preferred_element_type=f32)
        + b_ref[:, BC_HZ:BC_HZ + DF])
    pri = (jnp.dot(prior, w_ref[:, WC_PRI:WC_PRI + 2 * Z_DIM],
                   preferred_element_type=f32)
           + b_ref[:, BC_PRI:BC_PRI + 2 * Z_DIM])
    out_ref[:, OC_ZMP:OC_ZMP + 2 * Z_DIM] = pri


# ------------------------------ wrapper ---------------------------------------
@jax.jit
def vrnn_forward(x, eps, params):
    """Returns (y, z_mean, z_logvar, z, h, z_mean_p, z_logvar_p)."""
    seq_len, batch, x_dim = x.shape
    z_dim = eps.shape[-1]

    # pad batch to a multiple of 8 (sublane-dense vregs; no cross-row mixing)
    bp = ((batch + 7) // 8) * 8
    pad = bp - batch
    if pad:
        x = jnp.pad(x, ((0, 0), (0, pad), (0, 0)))
        eps = jnp.pad(eps, ((0, 0), (0, pad), (0, 0)))

    # input slab: [x | eps | zero-pad] -> (T*bp, 128), one DMA
    data = jnp.concatenate(
        [x.reshape(seq_len * bp, x_dim), eps.reshape(seq_len * bp, z_dim)], axis=1)
    data = jnp.pad(data, ((0, 0), (0, DATA_W - x_dim - z_dim)))

    wslab, bslab = _pack_params(params)

    vmem = pltpu.MemorySpace.VMEM
    out = pl.pallas_call(
        vrnn_kernel,
        out_shape=jax.ShapeDtypeStruct((seq_len * bp, OUT_W), jnp.float32),
        in_specs=[pl.BlockSpec(memory_space=vmem),
                  pl.BlockSpec(memory_space=vmem),
                  pl.BlockSpec(memory_space=vmem)],
        out_specs=pl.BlockSpec(memory_space=vmem),
        scratch_shapes=[
            pltpu.VMEM((seq_len * bp, 4 * H + DF), jnp.float32),  # fx projections
            pltpu.VMEM((seq_len * bp, H), jnp.float32),           # stored h_t
            pltpu.VMEM((seq_len * bp, DF), jnp.float32),          # dec pre-activation
        ],
    )(data, wslab, bslab)

    # TODO(synk): for throughput workloads, batch many sequences (B -> 128+)
    # and add a parallel grid axis to use the second TensorCore on v7x.

    out = out.reshape(seq_len, bp, OUT_W)[:, :batch, :]
    y = out[..., OC_Y:OC_Y + x_dim]
    zm = out[..., OC_ZM:OC_ZM + z_dim]
    zv = out[..., OC_ZV:OC_ZV + z_dim]
    z = out[..., OC_Z:OC_Z + z_dim]
    h = out[..., OC_H:OC_H + H]
    zmp = out[..., OC_ZMP:OC_ZMP + z_dim]
    zvp = out[..., OC_ZVP:OC_ZVP + z_dim]
    return y, zm, zv, z, h, zmp, zvp


# --------------------------- pure-JAX/numpy reference -------------------------
def vrnn_reference(x, eps, params):
    p = {k: np.asarray(v) for k, v in params.items()}
    x = np.asarray(x)
    eps = np.asarray(eps)
    seq_len, batch, _ = x.shape

    feat_x_all = np.tanh(x @ p["fx_w"] + p["fx_b"])
    h_t = np.zeros((batch, H), np.float32)
    c_t = np.zeros((batch, H), np.float32)
    y = np.zeros((seq_len, batch, X_DIM), np.float32)
    z_mean = np.zeros((seq_len, batch, Z_DIM), np.float32)
    z_logvar = np.zeros((seq_len, batch, Z_DIM), np.float32)
    z_all = np.zeros((seq_len, batch, Z_DIM), np.float32)
    h_store = np.zeros((seq_len, batch, H), np.float32)

    def sigmoid(a):
        return 1.0 / (1.0 + np.exp(-a))

    for t in range(seq_len):
        fx = feat_x_all[t]
        enc = np.tanh(np.concatenate([fx, h_t], -1) @ p["hxz_w"] + p["hxz_b"])
        mean_zt = enc @ p["im_w"] + p["im_b"]
        logvar_zt = enc @ p["iv_w"] + p["iv_b"]
        z_t = mean_zt + eps[t] * np.exp(0.5 * logvar_zt)
        fz = np.tanh(z_t @ p["fz_w"] + p["fz_b"])
        dec = np.tanh(np.concatenate([fz, h_t], -1) @ p["hzx_w"] + p["hzx_b"])
        y[t] = dec @ p["g_w"] + p["g_b"]
        z_mean[t] = mean_zt
        z_logvar[t] = logvar_zt
        z_all[t] = z_t
        h_store[t] = h_t
        gates = (np.concatenate([fx, fz], -1) @ p["wih"] + p["bih"]
                 + h_t @ p["whh"] + p["bhh"])
        i_g = sigmoid(gates[:, 0:H])
        f_g = sigmoid(gates[:, H:2 * H])
        g_g = np.tanh(gates[:, 2 * H:3 * H])
        o_g = sigmoid(gates[:, 3 * H:4 * H])
        c_t = f_g * c_t + i_g * g_g
        h_t = o_g * np.tanh(c_t)

    prior = np.tanh(h_store @ p["hz_w"] + p["hz_b"])
    mean_p = prior @ p["pm_w"] + p["pm_b"]
    logvar_p = prior @ p["pv_w"] + p["pv_b"]
    return y, z_mean, z_logvar, z_all, h_store, mean_p, logvar_p


# ---------------------------------- main --------------------------------------
if __name__ == "__main__":
    key = jax.random.PRNGKey(0)
    k_param, k_x, k_eps = jax.random.split(key, 3)

    params = init_params(k_param)
    x = jax.random.normal(k_x, (T, B, X_DIM), jnp.float32)
    # reparameterization noise (torch.randn_like equivalent), fixed for determinism
    eps = jax.random.normal(k_eps, (T, B, Z_DIM), jnp.float32)

    outs = vrnn_forward(x, eps, params)
    outs = jax.block_until_ready(outs)
    y, z_mean, z_logvar, z, h, z_mean_p, z_logvar_p = outs

    refs = vrnn_reference(x, eps, params)
    y_r, zm_r, zv_r, z_r, h_r, mp_r, lvp_r = refs
    assert np.allclose(np.asarray(y), y_r, atol=1e-4, rtol=1e-4)
    assert np.allclose(np.asarray(z_mean), zm_r, atol=1e-4, rtol=1e-4)
    assert np.allclose(np.asarray(z_logvar), zv_r, atol=1e-4, rtol=1e-4)
    assert np.allclose(np.asarray(z), z_r, atol=1e-4, rtol=1e-4)
    assert np.allclose(np.asarray(h), h_r, atol=1e-4, rtol=1e-4)
    assert np.allclose(np.asarray(z_mean_p), mp_r, atol=1e-4, rtol=1e-4)
    assert np.allclose(np.asarray(z_logvar_p), lvp_r, atol=1e-4, rtol=1e-4)

    print("KERNEL_OK")
</pallas_src>

<mosaic_0001>
module attributes {stable_mosaic.version = 11 : i64} {
  func.func @vrnn_kernel(%arg0: memref<64x128xf32, #tpu.memory_space<vmem>>, %arg1: memref<32x1536xf32, #tpu.memory_space<vmem>>, %arg2: memref<1x1152xf32, #tpu.memory_space<vmem>>, %arg3: memref<64x128xf32, #tpu.memory_space<vmem>>, %arg4: memref<64x160xf32, #tpu.memory_space<vmem>>, %arg5: memref<64x32xf32, #tpu.memory_space<vmem>>, %arg6: memref<64x32xf32, #tpu.memory_space<vmem>>) attributes {dimension_semantics = [], scalar_prefetch = 0 : i64, scratch_operands = 3 : i64, tpu.core_type = #tpu.core_type<tc>} {
    %cst = arith.constant 0.000000e+00 : f32
    %0 = vector.broadcast %cst : f32 to vector<64x128xf32>
    %c0 = arith.constant 0 : index
    %c0_0 = arith.constant 0 : index
    %1 = vector.load %arg3[%c0, %c0_0] : memref<64x128xf32, #tpu.memory_space<vmem>>, vector<64x128xf32>
    tpu.vector_store %arg3[%c0, %c0_0], %0 {strides = array<i32>} : memref<64x128xf32, #tpu.memory_space<vmem>>, vector<64x128xf32>,
    %c0_1 = arith.constant 0 : index
    %c0_2 = arith.constant 0 : index
    %2 = vector.load %arg0[%c0_1, %c0_2] : memref<64x128xf32, #tpu.memory_space<vmem>>, vector<64x16xf32>
    %c0_3 = arith.constant 0 : index
    %c768 = arith.constant 768 : index
    %3 = vector.load %arg1[%c0_3, %c768] : memref<32x1536xf32, #tpu.memory_space<vmem>>, vector<16x32xf32>
    %cst_4 = arith.constant dense<0.000000e+00> : vector<64x32xf32>
    %4 = tpu.matmul %2, %3, %cst_4 {dimension_numbers = #tpu.dot_dimension_numbers<[1], [0], [0], [1], [0, 0, 1, 1], [], []>} : vector<64x16xf32>, vector<16x32xf32>, vector<64x32xf32> -> vector<64x32xf32>
    %c0_5 = arith.constant 0 : index
    %c0_6 = arith.constant 0 : index
    %5 = vector.load %arg2[%c0_5, %c0_6] : memref<1x1152xf32, #tpu.memory_space<vmem>>, vector<1x32xf32>
    %6 = vector.broadcast %5 : vector<1x32xf32> to vector<64x32xf32>
    %7 = arith.addf %4, %6 : vector<64x32xf32>
    %8 = math.tanh %7 : vector<64x32xf32>
    %c0_7 = arith.constant 0 : index
    %c256 = arith.constant 256 : index
    %9 = vector.load %arg1[%c0_7, %c256] : memref<32x1536xf32, #tpu.memory_space<vmem>>, vector<32x160xf32>
    %cst_8 = arith.constant dense<0.000000e+00> : vector<64x160xf32>
    %10 = tpu.matmul %8, %9, %cst_8 {dimension_numbers = #tpu.dot_dimension_numbers<[1], [0], [0], [1], [0, 0, 1, 1], [], []>} : vector<64x32xf32>, vector<32x160xf32>, vector<64x160xf32> -> vector<64x160xf32>
    %c0_9 = arith.constant 0 : index
    %c256_10 = arith.constant 256 : index
    %11 = vector.load %arg2[%c0_9, %c256_10] : memref<1x1152xf32, #tpu.memory_space<vmem>>, vector<1x160xf32>
    %12 = vector.broadcast %11 : vector<1x160xf32> to vector<64x160xf32>
    %13 = arith.addf %10, %12 : vector<64x160xf32>
    %c0_11 = arith.constant 0 : index
    %c0_12 = arith.constant 0 : index
    %14 = vector.load %arg4[%c0_11, %c0_12] : memref<64x160xf32, #tpu.memory_space<vmem>>, vector<64x160xf32>
    tpu.vector_store %arg4[%c0_11, %c0_12], %13 {strides = array<i32>} : memref<64x160xf32, #tpu.memory_space<vmem>>, vector<64x160xf32>,
    %c0_13 = arith.constant 0 : index
    %c0_14 = arith.constant 0 : index
    %15 = vector.load %arg1[%c0_13, %c0_14] : memref<32x1536xf32, #tpu.memory_space<vmem>>, vector<32x192xf32>
    %c0_15 = arith.constant 0 : index
    %c128 = arith.constant 128 : index
    %16 = vector.load %arg2[%c0_15, %c128] : memref<1x1152xf32, #tpu.memory_space<vmem>>, vector<1x32xf32>
    %17 = vector.shape_cast %16 : vector<1x32xf32> to vector<1x32xf32>
    %18 = vector.broadcast %17 : vector<1x32xf32> to vector<8x32xf32>
    %c0_16 = arith.constant 0 : index
    %c640 = arith.constant 640 : index
    %19 = vector.load %arg2[%c0_16, %c640] : memref<1x1152xf32, #tpu.memory_space<vmem>>, vector<1x24xf32>
    %20 = vector.shape_cast %19 : vector<1x24xf32> to vector<1x24xf32>
    %21 = vector.broadcast %20 : vector<1x24xf32> to vector<8x24xf32>
    %cst_17 = arith.constant 0.000000e+00 : f32
    %22 = vector.broadcast %cst_17 : f32 to vector<8x32xf32>
    %cst_18 = arith.constant 0.000000e+00 : f32
    %23 = vector.broadcast %cst_18 : f32 to vector<8x32xf32>
    %c0_19 = arith.constant 0 : index
    %c0_20 = arith.constant 0 : index
    %24 = vector.load %arg4[%c0_19, %c0_20] : memref<64x160xf32, #tpu.memory_space<vmem>>, vector<8x128xf32>
    %c0_21 = arith.constant 0 : index
    %c128_22 = arith.constant 128 : index
    %25 = vector.load %arg4[%c0_21, %c128_22] : memref<64x160xf32, #tpu.memory_space<vmem>>, vector<8x32xf32>
    %c0_23 = arith.constant 0 : index
    %c16 = arith.constant 16 : index
    %26 = vector.load %arg0[%c0_23, %c16] : memref<64x128xf32, #tpu.memory_space<vmem>>, vector<8x8xf32>
    %cst_24 = arith.constant dense<0.000000e+00> : vector<8x192xf32>
    %27 = tpu.matmul %22, %15, %cst_24 {dimension_numbers = #tpu.dot_dimension_numbers<[1], [0], [0], [1], [0, 0, 1, 1], [], []>} : vector<8x32xf32>, vector<32x192xf32>, vector<8x192xf32> -> vector<8x192xf32>
    %28 = vector.extract_strided_slice %27 {offsets = [0, 128], sizes = [8, 32], strides = [1, 1]} : vector<8x192xf32> to vector<8x32xf32>
    %29 = arith.addf %25, %28 : vector<8x32xf32>
    %30 = math.tanh %29 : vector<8x32xf32>
    %c0_25 = arith.constant 0 : index
    %c1024 = arith.constant 1024 : index
    %31 = vector.load %arg1[%c0_25, %c1024] : memref<32x1536xf32, #tpu.memory_space<vmem>>, vector<32x24xf32>
    %cst_26 = arith.constant dense<0.000000e+00> : vector<8x24xf32>
    %32 = tpu.matmul %30, %31, %cst_26 {dimension_numbers = #tpu.dot_dimension_numbers<[1], [0], [0], [1], [0, 0, 1, 1], [], []>} : vector<8x32xf32>, vector<32x24xf32>, vector<8x24xf32> -> vector<8x24xf32>
    %33 = arith.addf %32, %21 : vector<8x24xf32>
    %34 = vector.extract_strided_slice %33 {offsets = [0, 0], sizes = [8, 8], strides = [1, 1]} : vector<8x24xf32> to vector<8x8xf32>
    %35 = vector.extract_strided_slice %33 {offsets = [0, 16], sizes = [8, 8], strides = [1, 1]} : vector<8x24xf32> to vector<8x8xf32>
    %36 = math.exp %35 : vector<8x8xf32>
    %37 = arith.mulf %26, %36 : vector<8x8xf32>
    %38 = arith.addf %34, %37 : vector<8x8xf32>
    %c0_27 = arith.constant 0 : index
    %c896 = arith.constant 896 : index
    %39 = vector.load %arg1[%c0_27, %c896] : memref<32x1536xf32, #tpu.memory_space<vmem>>, vector<8x32xf32>
    %cst_28 = arith.constant dense<0.000000e+00> : vector<8x32xf32>
    %40 = tpu.matmul %38, %39, %cst_28 {dimension_numbers = #tpu.dot_dimension_numbers<[1], [0], [0], [1], [0, 0, 1, 1], [], []>} : vector<8x8xf32>, vector<8x32xf32>, vector<8x32xf32> -> vector<8x32xf32>
    %41 = arith.addf %40, %18 : vector<8x32xf32>
    %42 = math.tanh %41 : vector<8x32xf32>
    %c0_29 = arith.constant 0 : index
    %c512 = arith.constant 512 : index
    %43 = vector.load %arg1[%c0_29, %c512] : memref<32x1536xf32, #tpu.memory_space<vmem>>, vector<32x160xf32>
    %cst_30 = arith.constant dense<0.000000e+00> : vector<8x160xf32>
    %44 = tpu.matmul %42, %43, %cst_30 {dimension_numbers = #tpu.dot_dimension_numbers<[1], [0], [0], [1], [0, 0, 1, 1], [], []>} : vector<8x32xf32>, vector<32x160xf32>, vector<8x160xf32> -> vector<8x160xf32>
    %45 = vector.extract_strided_slice %33 {offsets = [0, 0], sizes = [8, 16], strides = [1, 1]} : vector<8x24xf32> to vector<8x16xf32>
    %c0_31 = arith.constant 0 : index
    %c16_32 = arith.constant 16 : index
    %46 = vector.load %arg3[%c0_31, %c16_32] : memref<64x128xf32, #tpu.memory_space<vmem>>, vector<8x16xf32>
    tpu.vector_store %arg3[%c0_31, %c16_32], %45 {strides = array<i32>} : memref<64x128xf32, #tpu.memory_space<vmem>>, vector<8x16xf32>,
    %c0_33 = arith.constant 0 : index
    %c32 = arith.constant 32 : index
    %47 = vector.load %arg3[%c0_33, %c32] : memref<64x128xf32, #tpu.memory_space<vmem>>, vector<8x8xf32>
    tpu.vector_store %arg3[%c0_33, %c32], %38 {strides = array<i32>} : memref<64x128xf32, #tpu.memory_space<vmem>>, vector<8x8xf32>,
    %c0_34 = arith.constant 0 : index
    %c0_35 = arith.constant 0 : index
    %48 = vector.load %arg5[%c0_34, %c0_35] : memref<64x32xf32, #tpu.memory_space<vmem>>, vector<8x32xf32>
    tpu.vector_store %arg5[%c0_34, %c0_35], %22 {strides = array<i32>} : memref<64x32xf32, #tpu.memory_space<vmem>>, vector<8x32xf32>,
    %49 = vector.extract_strided_slice %44 {offsets = [0, 128], sizes = [8, 32], strides = [1, 1]} : vector<8x160xf32> to vector<8x32xf32>
    %50 = vector.extract_strided_slice %27 {offsets = [0, 160], sizes = [8, 32], strides = [1, 1]} : vector<8x192xf32> to vector<8x32xf32>
    %51 = arith.addf %49, %50 : vector<8x32xf32>
    %c0_36 = arith.constant 0 : index
    %c0_37 = arith.constant 0 : index
    %52 = vector.load %arg6[%c0_36, %c0_37] : memref<64x32xf32, #tpu.memory_space<vmem>>, vector<8x32xf32>
    tpu.vector_store %arg6[%c0_36, %c0_37], %51 {strides = array<i32>} : memref<64x32xf32, #tpu.memory_space<vmem>>, vector<8x32xf32>,
    %53 = vector.extract_strided_slice %44 {offsets = [0, 0], sizes = [8, 128], strides = [1, 1]} : vector<8x160xf32> to vector<8x128xf32>
    %54 = arith.addf %24, %53 : vector<8x128xf32>
    %55 = vector.extract_strided_slice %27 {offsets = [0, 0], sizes = [8, 128], strides = [1, 1]} : vector<8x192xf32> to vector<8x128xf32>
    %56 = arith.addf %54, %55 : vector<8x128xf32>
    %57 = arith.negf %56 : vector<8x128xf32>
    %58 = math.exp %57 : vector<8x128xf32>
    %cst_38 = arith.constant 1.000000e+00 : f32
    %59 = vector.broadcast %cst_38 : f32 to vector<8x128xf32>
    %60 = arith.addf %59, %58 : vector<8x128xf32>
    %61 = arith.divf %59, %60 : vector<8x128xf32>
    %62 = vector.extract_strided_slice %61 {offsets = [0, 96], sizes = [8, 32], strides = [1, 1]} : vector<8x128xf32> to vector<8x32xf32>
    %cst_39 = arith.constant 2.000000e+00 : f32
    %63 = vector.broadcast %cst_39 : f32 to vector<8x32xf32>
    %64 = arith.mulf %63, %62 : vector<8x32xf32>
    %cst_40 = arith.constant 1.000000e+00 : f32
    %65 = vector.broadcast %cst_40 : f32 to vector<8x32xf32>
    %66 = arith.subf %64, %65 : vector<8x32xf32>
    %67 = vector.extract_strided_slice %61 {offsets = [0, 32], sizes = [8, 32], strides = [1, 1]} : vector<8x128xf32> to vector<8x32xf32>
    %68 = arith.mulf %67, %23 : vector<8x32xf32>
    %69 = vector.extract_strided_slice %61 {offsets = [0, 0], sizes = [8, 32], strides = [1, 1]} : vector<8x128xf32> to vector<8x32xf32>
    %70 = arith.mulf %69, %66 : vector<8x32xf32>
    %71 = arith.addf %68, %70 : vector<8x32xf32>
    %72 = vector.extract_strided_slice %61 {offsets = [0, 64], sizes = [8, 32], strides = [1, 1]} : vector<8x128xf32> to vector<8x32xf32>
    %73 = math.tanh %71 : vector<8x32xf32>
    %74 = arith.mulf %72, %73 : vector<8x32xf32>
    %c8 = arith.constant 8 : index
    %c0_41 = arith.constant 0 : index
    %75 = vector.load %arg4[%c8, %c0_41] : memref<64x160xf32, #tpu.memory_space<vmem>>, vector<8x128xf32>
    %c8_42 = arith.constant 8 : index
    %c128_43 = arith.constant 128 : index
    %76 = vector.load %arg4[%c8_42, %c128_43] : memref<64x160xf32, #tpu.memory_space<vmem>>, vector<8x32xf32>
    %c8_44 = arith.constant 8 : index
    %c16_45 = arith.constant 16 : index
    %77 = vector.load %arg0[%c8_44, %c16_45] : memref<64x128xf32, #tpu.memory_space<vmem>>, vector<8x8xf32>
    %cst_46 = arith.constant dense<0.000000e+00> : vector<8x192xf32>
    %78 = tpu.matmul %74, %15, %cst_46 {dimension_numbers = #tpu.dot_dimension_numbers<[1], [0], [0], [1], [0, 0, 1, 1], [], []>} : vector<8x32xf32>, vector<32x192xf32>, vector<8x192xf32> -> vector<8x192xf32>
    %79 = vector.extract_strided_slice %78 {offsets = [0, 128], sizes = [8, 32], strides = [1, 1]} : vector<8x192xf32> to vector<8x32xf32>
    %80 = arith.addf %76, %79 : vector<8x32xf32>
    %81 = math.tanh %80 : vector<8x32xf32>
    %c0_47 = arith.constant 0 : index
    %c1024_48 = arith.constant 1024 : index
    %82 = vector.load %arg1[%c0_47, %c1024_48] : memref<32x1536xf32, #tpu.memory_space<vmem>>, vector<32x24xf32>
    %cst_49 = arith.constant dense<0.000000e+00> : vector<8x24xf32>
    %83 = tpu.matmul %81, %82, %cst_49 {dimension_numbers = #tpu.dot_dimension_numbers<[1], [0], [0], [1], [0, 0, 1, 1], [], []>} : vector<8x32xf32>, vector<32x24xf32>, vector<8x24xf32> -> vector<8x24xf32>
    %84 = arith.addf %83, %21 : vector<8x24xf32>
    %85 = vector.extract_strided_slice %84 {offsets = [0, 0], sizes = [8, 8], strides = [1, 1]} : vector<8x24xf32> to vector<8x8xf32>
    %86 = vector.extract_strided_slice %84 {offsets = [0, 16], sizes = [8, 8], strides = [1, 1]} : vector<8x24xf32> to vector<8x8xf32>
    %87 = math.exp %86 : vector<8x8xf32>
    %88 = arith.mulf %77, %87 : vector<8x8xf32>
    %89 = arith.addf %85, %88 : vector<8x8xf32>
    %c0_50 = arith.constant 0 : index
    %c896_51 = arith.constant 896 : index
    %90 = vector.load %arg1[%c0_50, %c896_51] : memref<32x1536xf32, #tpu.memory_space<vmem>>, vector<8x32xf32>
    %cst_52 = arith.constant dense<0.000000e+00> : vector<8x32xf32>
    %91 = tpu.matmul %89, %90, %cst_52 {dimension_numbers = #tpu.dot_dimension_numbers<[1], [0], [0], [1], [0, 0, 1, 1], [], []>} : vector<8x8xf32>, vector<8x32xf32>, vector<8x32xf32> -> vector<8x32xf32>
    %92 = arith.addf %91, %18 : vector<8x32xf32>
    %93 = math.tanh %92 : vector<8x32xf32>
    %c0_53 = arith.constant 0 : index
    %c512_54 = arith.constant 512 : index
    %94 = vector.load %arg1[%c0_53, %c512_54] : memref<32x1536xf32, #tpu.memory_space<vmem>>, vector<32x160xf32>
    %cst_55 = arith.constant dense<0.000000e+00> : vector<8x160xf32>
    %95 = tpu.matmul %93, %94, %cst_55 {dimension_numbers = #tpu.dot_dimension_numbers<[1], [0], [0], [1], [0, 0, 1, 1], [], []>} : vector<8x32xf32>, vector<32x160xf32>, vector<8x160xf32> -> vector<8x160xf32>
    %96 = vector.extract_strided_slice %84 {offsets = [0, 0], sizes = [8, 16], strides = [1, 1]} : vector<8x24xf32> to vector<8x16xf32>
    %c8_56 = arith.constant 8 : index
    %c16_57 = arith.constant 16 : index
    %97 = vector.load %arg3[%c8_56, %c16_57] : memref<64x128xf32, #tpu.memory_space<vmem>>, vector<8x16xf32>
    tpu.vector_store %arg3[%c8_56, %c16_57], %96 {strides = array<i32>} : memref<64x128xf32, #tpu.memory_space<vmem>>, vector<8x16xf32>,
    %c8_58 = arith.constant 8 : index
    %c32_59 = arith.constant 32 : index
    %98 = vector.load %arg3[%c8_58, %c32_59] : memref<64x128xf32, #tpu.memory_space<vmem>>, vector<8x8xf32>
    tpu.vector_store %arg3[%c8_58, %c32_59], %89 {strides = array<i32>} : memref<64x128xf32, #tpu.memory_space<vmem>>, vector<8x8xf32>,
    %c8_60 = arith.constant 8 : index
    %c0_61 = arith.constant 0 : index
    %99 = vector.load %arg5[%c8_60, %c0_61] : memref<64x32xf32, #tpu.memory_space<vmem>>, vector<8x32xf32>
    tpu.vector_store %arg5[%c8_60, %c0_61], %74 {strides = array<i32>} : memref<64x32xf32, #tpu.memory_space<vmem>>, vector<8x32xf32>,
    %100 = vector.extract_strided_slice %95 {offsets = [0, 128], sizes = [8, 32], strides = [1, 1]} : vector<8x160xf32> to vector<8x32xf32>
    %101 = vector.extract_strided_slice %78 {offsets = [0, 160], sizes = [8, 32], strides = [1, 1]} : vector<8x192xf32> to vector<8x32xf32>
    %102 = arith.addf %100, %101 : vector<8x32xf32>
    %c8_62 = arith.constant 8 : index
    %c0_63 = arith.constant 0 : index
    %103 = vector.load %arg6[%c8_62, %c0_63] : memref<64x32xf32, #tpu.memory_space<vmem>>, vector<8x32xf32>
    tpu.vector_store %arg6[%c8_62, %c0_63], %102 {strides = array<i32>} : memref<64x32xf32, #tpu.memory_space<vmem>>, vector<8x32xf32>,
    %104 = vector.extract_strided_slice %95 {offsets = [0, 0], sizes = [8, 128], strides = [1, 1]} : vector<8x160xf32> to vector<8x128xf32>
    %105 = arith.addf %75, %104 : vector<8x128xf32>
    %106 = vector.extract_strided_slice %78 {offsets = [0, 0], sizes = [8, 128], strides = [1, 1]} : vector<8x192xf32> to vector<8x128xf32>
    %107 = arith.addf %105, %106 : vector<8x128xf32>
    %108 = arith.negf %107 : vector<8x128xf32>
    %109 = math.exp %108 : vector<8x128xf32>
    %cst_64 = arith.constant 1.000000e+00 : f32
    %110 = vector.broadcast %cst_64 : f32 to vector<8x128xf32>
    %111 = arith.addf %110, %109 : vector<8x128xf32>
    %112 = arith.divf %110, %111 : vector<8x128xf32>
    %113 = vector.extract_strided_slice %112 {offsets = [0, 96], sizes = [8, 32], strides = [1, 1]} : vector<8x128xf32> to vector<8x32xf32>
    %cst_65 = arith.constant 2.000000e+00 : f32
    %114 = vector.broadcast %cst_65 : f32 to vector<8x32xf32>
    %115 = arith.mulf %114, %113 : vector<8x32xf32>
    %cst_66 = arith.constant 1.000000e+00 : f32
    %116 = vector.broadcast %cst_66 : f32 to vector<8x32xf32>
    %117 = arith.subf %115, %116 : vector<8x32xf32>
    %118 = vector.extract_strided_slice %112 {offsets = [0, 32], sizes = [8, 32], strides = [1, 1]} : vector<8x128xf32> to vector<8x32xf32>
    %119 = arith.mulf %118, %71 : vector<8x32xf32>
    %120 = vector.extract_strided_slice %112 {offsets = [0, 0], sizes = [8, 32], strides = [1, 1]} : vector<8x128xf32> to vector<8x32xf32>
    %121 = arith.mulf %120, %117 : vector<8x32xf32>
    %122 = arith.addf %119, %121 : vector<8x32xf32>
    %123 = vector.extract_strided_slice %112 {offsets = [0, 64], sizes = [8, 32], strides = [1, 1]} : vector<8x128xf32> to vector<8x32xf32>
    %124 = math.tanh %122 : vector<8x32xf32>
    %125 = arith.mulf %123, %124 : vector<8x32xf32>
    %c16_67 = arith.constant 16 : index
    %c0_68 = arith.constant 0 : index
    %126 = vector.load %arg4[%c16_67, %c0_68] : memref<64x160xf32, #tpu.memory_space<vmem>>, vector<8x128xf32>
    %c16_69 = arith.constant 16 : index
    %c128_70 = arith.constant 128 : index
    %127 = vector.load %arg4[%c16_69, %c128_70] : memref<64x160xf32, #tpu.memory_space<vmem>>, vector<8x32xf32>
    %c16_71 = arith.constant 16 : index
    %c16_72 = arith.constant 16 : index
    %128 = vector.load %arg0[%c16_71, %c16_72] : memref<64x128xf32, #tpu.memory_space<vmem>>, vector<8x8xf32>
    %cst_73 = arith.constant dense<0.000000e+00> : vector<8x192xf32>
    %129 = tpu.matmul %125, %15, %cst_73 {dimension_numbers = #tpu.dot_dimension_numbers<[1], [0], [0], [1], [0, 0, 1, 1], [], []>} : vector<8x32xf32>, vector<32x192xf32>, vector<8x192xf32> -> vector<8x192xf32>
    %130 = vector.extract_strided_slice %129 {offsets = [0, 128], sizes = [8, 32], strides = [1, 1]} : vector<8x192xf32> to vector<8x32xf32>
    %131 = arith.addf %127, %130 : vector<8x32xf32>
    %132 = math.tanh %131 : vector<8x32xf32>
    %c0_74 = arith.constant 0 : index
    %c1024_75 = arith.constant 1024 : index
    %133 = vector.load %arg1[%c0_74, %c1024_75] : memref<32x1536xf32, #tpu.memory_space<vmem>>, vector<32x24xf32>
    %cst_76 = arith.constant dense<0.000000e+00> : vector<8x24xf32>
    %134 = tpu.matmul %132, %133, %cst_76 {dimension_numbers = #tpu.dot_dimension_numbers<[1], [0], [0], [1], [0, 0, 1, 1], [], []>} : vector<8x32xf32>, vector<32x24xf32>, vector<8x24xf32> -> vector<8x24xf32>
    %135 = arith.addf %134, %21 : vector<8x24xf32>
    %136 = vector.extract_strided_slice %135 {offsets = [0, 0], sizes = [8, 8], strides = [1, 1]} : vector<8x24xf32> to vector<8x8xf32>
    %137 = vector.extract_strided_slice %135 {offsets = [0, 16], sizes = [8, 8], strides = [1, 1]} : vector<8x24xf32> to vector<8x8xf32>
    %138 = math.exp %137 : vector<8x8xf32>
    %139 = arith.mulf %128, %138 : vector<8x8xf32>
    %140 = arith.addf %136, %139 : vector<8x8xf32>
    %c0_77 = arith.constant 0 : index
    %c896_78 = arith.constant 896 : index
    %141 = vector.load %arg1[%c0_77, %c896_78] : memref<32x1536xf32, #tpu.memory_space<vmem>>, vector<8x32xf32>
    %cst_79 = arith.constant dense<0.000000e+00> : vector<8x32xf32>
    %142 = tpu.matmul %140, %141, %cst_79 {dimension_numbers = #tpu.dot_dimension_numbers<[1], [0], [0], [1], [0, 0, 1, 1], [], []>} : vector<8x8xf32>, vector<8x32xf32>, vector<8x32xf32> -> vector<8x32xf32>
    %143 = arith.addf %142, %18 : vector<8x32xf32>
    %144 = math.tanh %143 : vector<8x32xf32>
    %c0_80 = arith.constant 0 : index
    %c512_81 = arith.constant 512 : index
    %145 = vector.load %arg1[%c0_80, %c512_81] : memref<32x1536xf32, #tpu.memory_space<vmem>>, vector<32x160xf32>
    %cst_82 = arith.constant dense<0.000000e+00> : vector<8x160xf32>
    %146 = tpu.matmul %144, %145, %cst_82 {dimension_numbers = #tpu.dot_dimension_numbers<[1], [0], [0], [1], [0, 0, 1, 1], [], []>} : vector<8x32xf32>, vector<32x160xf32>, vector<8x160xf32> -> vector<8x160xf32>
    %147 = vector.extract_strided_slice %135 {offsets = [0, 0], sizes = [8, 16], strides = [1, 1]} : vector<8x24xf32> to vector<8x16xf32>
    %c16_83 = arith.constant 16 : index
    %c16_84 = arith.constant 16 : index
    %148 = vector.load %arg3[%c16_83, %c16_84] : memref<64x128xf32, #tpu.memory_space<vmem>>, vector<8x16xf32>
    tpu.vector_store %arg3[%c16_83, %c16_84], %147 {strides = array<i32>} : memref<64x128xf32, #tpu.memory_space<vmem>>, vector<8x16xf32>,
    %c16_85 = arith.constant 16 : index
    %c32_86 = arith.constant 32 : index
    %149 = vector.load %arg3[%c16_85, %c32_86] : memref<64x128xf32, #tpu.memory_space<vmem>>, vector<8x8xf32>
    tpu.vector_store %arg3[%c16_85, %c32_86], %140 {strides = array<i32>} : memref<64x128xf32, #tpu.memory_space<vmem>>, vector<8x8xf32>,
    %c16_87 = arith.constant 16 : index
    %c0_88 = arith.constant 0 : index
    %150 = vector.load %arg5[%c16_87, %c0_88] : memref<64x32xf32, #tpu.memory_space<vmem>>, vector<8x32xf32>
    tpu.vector_store %arg5[%c16_87, %c0_88], %125 {strides = array<i32>} : memref<64x32xf32, #tpu.memory_space<vmem>>, vector<8x32xf32>,
    %151 = vector.extract_strided_slice %146 {offsets = [0, 128], sizes = [8, 32], strides = [1, 1]} : vector<8x160xf32> to vector<8x32xf32>
    %152 = vector.extract_strided_slice %129 {offsets = [0, 160], sizes = [8, 32], strides = [1, 1]} : vector<8x192xf32> to vector<8x32xf32>
    %153 = arith.addf %151, %152 : vector<8x32xf32>
    %c16_89 = arith.constant 16 : index
    %c0_90 = arith.constant 0 : index
    %154 = vector.load %arg6[%c16_89, %c0_90] : memref<64x32xf32, #tpu.memory_space<vmem>>, vector<8x32xf32>
    tpu.vector_store %arg6[%c16_89, %c0_90], %153 {strides = array<i32>} : memref<64x32xf32, #tpu.memory_space<vmem>>, vector<8x32xf32>,
    %155 = vector.extract_strided_slice %146 {offsets = [0, 0], sizes = [8, 128], strides = [1, 1]} : vector<8x160xf32> to vector<8x128xf32>
    %156 = arith.addf %126, %155 : vector<8x128xf32>
    %157 = vector.extract_strided_slice %129 {offsets = [0, 0], sizes = [8, 128], strides = [1, 1]} : vector<8x192xf32> to vector<8x128xf32>
    %158 = arith.addf %156, %157 : vector<8x128xf32>
    %159 = arith.negf %158 : vector<8x128xf32>
    %160 = math.exp %159 : vector<8x128xf32>
    %cst_91 = arith.constant 1.000000e+00 : f32
    %161 = vector.broadcast %cst_91 : f32 to vector<8x128xf32>
    %162 = arith.addf %161, %160 : vector<8x128xf32>
    %163 = arith.divf %161, %162 : vector<8x128xf32>
    %164 = vector.extract_strided_slice %163 {offsets = [0, 96], sizes = [8, 32], strides = [1, 1]} : vector<8x128xf32> to vector<8x32xf32>
    %cst_92 = arith.constant 2.000000e+00 : f32
    %165 = vector.broadcast %cst_92 : f32 to vector<8x32xf32>
    %166 = arith.mulf %165, %164 : vector<8x32xf32>
    %cst_93 = arith.constant 1.000000e+00 : f32
    %167 = vector.broadcast %cst_93 : f32 to vector<8x32xf32>
    %168 = arith.subf %166, %167 : vector<8x32xf32>
    %169 = vector.extract_strided_slice %163 {offsets = [0, 32], sizes = [8, 32], strides = [1, 1]} : vector<8x128xf32> to vector<8x32xf32>
    %170 = arith.mulf %169, %122 : vector<8x32xf32>
    %171 = vector.extract_strided_slice %163 {offsets = [0, 0], sizes = [8, 32], strides = [1, 1]} : vector<8x128xf32> to vector<8x32xf32>
    %172 = arith.mulf %171, %168 : vector<8x32xf32>
    %173 = arith.addf %170, %172 : vector<8x32xf32>
    %174 = vector.extract_strided_slice %163 {offsets = [0, 64], sizes = [8, 32], strides = [1, 1]} : vector<8x128xf32> to vector<8x32xf32>
    %175 = math.tanh %173 : vector<8x32xf32>
    %176 = arith.mulf %174, %175 : vector<8x32xf32>
    %c24 = arith.constant 24 : index
    %c0_94 = arith.constant 0 : index
    %177 = vector.load %arg4[%c24, %c0_94] : memref<64x160xf32, #tpu.memory_space<vmem>>, vector<8x128xf32>
    %c24_95 = arith.constant 24 : index
    %c128_96 = arith.constant 128 : index
    %178 = vector.load %arg4[%c24_95, %c128_96] : memref<64x160xf32, #tpu.memory_space<vmem>>, vector<8x32xf32>
    %c24_97 = arith.constant 24 : index
    %c16_98 = arith.constant 16 : index
    %179 = vector.load %arg0[%c24_97, %c16_98] : memref<64x128xf32, #tpu.memory_space<vmem>>, vector<8x8xf32>
    %cst_99 = arith.constant dense<0.000000e+00> : vector<8x192xf32>
    %180 = tpu.matmul %176, %15, %cst_99 {dimension_numbers = #tpu.dot_dimension_numbers<[1], [0], [0], [1], [0, 0, 1, 1], [], []>} : vector<8x32xf32>, vector<32x192xf32>, vector<8x192xf32> -> vector<8x192xf32>
    %181 = vector.extract_strided_slice %180 {offsets = [0, 128], sizes = [8, 32], strides = [1, 1]} : vector<8x192xf32> to vector<8x32xf32>
    %182 = arith.addf %178, %181 : vector<8x32xf32>
    %183 = math.tanh %182 : vector<8x32xf32>
    %c0_100 = arith.constant 0 : index
    %c1024_101 = arith.constant 1024 : index
    %184 = vector.load %arg1[%c0_100, %c1024_101] : memref<32x1536xf32, #tpu.memory_space<vmem>>, vector<32x24xf32>
    %cst_102 = arith.constant dense<0.000000e+00> : vector<8x24xf32>
    %185 = tpu.matmul %183, %184, %cst_102 {dimension_numbers = #tpu.dot_dimension_numbers<[1], [0], [0], [1], [0, 0, 1, 1], [], []>} : vector<8x32xf32>, vector<32x24xf32>, vector<8x24xf32> -> vector<8x24xf32>
    %186 = arith.addf %185, %21 : vector<8x24xf32>
    %187 = vector.extract_strided_slice %186 {offsets = [0, 0], sizes = [8, 8], strides = [1, 1]} : vector<8x24xf32> to vector<8x8xf32>
    %188 = vector.extract_strided_slice %186 {offsets = [0, 16], sizes = [8, 8], strides = [1, 1]} : vector<8x24xf32> to vector<8x8xf32>
    %189 = math.exp %188 : vector<8x8xf32>
    %190 = arith.mulf %179, %189 : vector<8x8xf32>
    %191 = arith.addf %187, %190 : vector<8x8xf32>
    %c0_103 = arith.constant 0 : index
    %c896_104 = arith.constant 896 : index
    %192 = vector.load %arg1[%c0_103, %c896_104] : memref<32x1536xf32, #tpu.memory_space<vmem>>, vector<8x32xf32>
    %cst_105 = arith.constant dense<0.000000e+00> : vector<8x32xf32>
    %193 = tpu.matmul %191, %192, %cst_105 {dimension_numbers = #tpu.dot_dimension_numbers<[1], [0], [0], [1], [0, 0, 1, 1], [], []>} : vector<8x8xf32>, vector<8x32xf32>, vector<8x32xf32> -> vector<8x32xf32>
    %194 = arith.addf %193, %18 : vector<8x32xf32>
    %195 = math.tanh %194 : vector<8x32xf32>
    %c0_106 = arith.constant 0 : index
    %c512_107 = arith.constant 512 : index
    %196 = vector.load %arg1[%c0_106, %c512_107] : memref<32x1536xf32, #tpu.memory_space<vmem>>, vector<32x160xf32>
    %cst_108 = arith.constant dense<0.000000e+00> : vector<8x160xf32>
    %197 = tpu.matmul %195, %196, %cst_108 {dimension_numbers = #tpu.dot_dimension_numbers<[1], [0], [0], [1], [0, 0, 1, 1], [], []>} : vector<8x32xf32>, vector<32x160xf32>, vector<8x160xf32> -> vector<8x160xf32>
    %198 = vector.extract_strided_slice %186 {offsets = [0, 0], sizes = [8, 16], strides = [1, 1]} : vector<8x24xf32> to vector<8x16xf32>
    %c24_109 = arith.constant 24 : index
    %c16_110 = arith.constant 16 : index
    %199 = vector.load %arg3[%c24_109, %c16_110] : memref<64x128xf32, #tpu.memory_space<vmem>>, vector<8x16xf32>
    tpu.vector_store %arg3[%c24_109, %c16_110], %198 {strides = array<i32>} : memref<64x128xf32, #tpu.memory_space<vmem>>, vector<8x16xf32>,
    %c24_111 = arith.constant 24 : index
    %c32_112 = arith.constant 32 : index
    %200 = vector.load %arg3[%c24_111, %c32_112] : memref<64x128xf32, #tpu.memory_space<vmem>>, vector<8x8xf32>
    tpu.vector_store %arg3[%c24_111, %c32_112], %191 {strides = array<i32>} : memref<64x128xf32, #tpu.memory_space<vmem>>, vector<8x8xf32>,
    %c24_113 = arith.constant 24 : index
    %c0_114 = arith.constant 0 : index
    %201 = vector.load %arg5[%c24_113, %c0_114] : memref<64x32xf32, #tpu.memory_space<vmem>>, vector<8x32xf32>
    tpu.vector_store %arg5[%c24_113, %c0_114], %176 {strides = array<i32>} : memref<64x32xf32, #tpu.memory_space<vmem>>, vector<8x32xf32>,
    %202 = vector.extract_strided_slice %197 {offsets = [0, 128], sizes = [8, 32], strides = [1, 1]} : vector<8x160xf32> to vector<8x32xf32>
    %203 = vector.extract_strided_slice %180 {offsets = [0, 160], sizes = [8, 32], strides = [1, 1]} : vector<8x192xf32> to vector<8x32xf32>
    %204 = arith.addf %202, %203 : vector<8x32xf32>
    %c24_115 = arith.constant 24 : index
    %c0_116 = arith.constant 0 : index
    %205 = vector.load %arg6[%c24_115, %c0_116] : memref<64x32xf32, #tpu.memory_space<vmem>>, vector<8x32xf32>
    tpu.vector_store %arg6[%c24_115, %c0_116], %204 {strides = array<i32>} : memref<64x32xf32, #tpu.memory_space<vmem>>, vector<8x32xf32>,
    %206 = vector.extract_strided_slice %197 {offsets = [0, 0], sizes = [8, 128], strides = [1, 1]} : vector<8x160xf32> to vector<8x128xf32>
    %207 = arith.addf %177, %206 : vector<8x128xf32>
    %208 = vector.extract_strided_slice %180 {offsets = [0, 0], sizes = [8, 128], strides = [1, 1]} : vector<8x192xf32> to vector<8x128xf32>
    %209 = arith.addf %207, %208 : vector<8x128xf32>
    %210 = arith.negf %209 : vector<8x128xf32>
    %211 = math.exp %210 : vector<8x128xf32>
    %cst_117 = arith.constant 1.000000e+00 : f32
    %212 = vector.broadcast %cst_117 : f32 to vector<8x128xf32>
    %213 = arith.addf %212, %211 : vector<8x128xf32>
    %214 = arith.divf %212, %213 : vector<8x128xf32>
    %215 = vector.extract_strided_slice %214 {offsets = [0, 96], sizes = [8, 32], strides = [1, 1]} : vector<8x128xf32> to vector<8x32xf32>
    %cst_118 = arith.constant 2.000000e+00 : f32
    %216 = vector.broadcast %cst_118 : f32 to vector<8x32xf32>
    %217 = arith.mulf %216, %215 : vector<8x32xf32>
    %cst_119 = arith.constant 1.000000e+00 : f32
    %218 = vector.broadcast %cst_119 : f32 to vector<8x32xf32>
    %219 = arith.subf %217, %218 : vector<8x32xf32>
    %220 = vector.extract_strided_slice %214 {offsets = [0, 32], sizes = [8, 32], strides = [1, 1]} : vector<8x128xf32> to vector<8x32xf32>
    %221 = arith.mulf %220, %173 : vector<8x32xf32>
    %222 = vector.extract_strided_slice %214 {offsets = [0, 0], sizes = [8, 32], strides = [1, 1]} : vector<8x128xf32> to vector<8x32xf32>
    %223 = arith.mulf %222, %219 : vector<8x32xf32>
    %224 = arith.addf %221, %223 : vector<8x32xf32>
    %225 = vector.extract_strided_slice %214 {offsets = [0, 64], sizes = [8, 32], strides = [1, 1]} : vector<8x128xf32> to vector<8x32xf32>
    %226 = math.tanh %224 : vector<8x32xf32>
    %227 = arith.mulf %225, %226 : vector<8x32xf32>
    %c32_120 = arith.constant 32 : index
    %c0_121 = arith.constant 0 : index
    %228 = vector.load %arg4[%c32_120, %c0_121] : memref<64x160xf32, #tpu.memory_space<vmem>>, vector<8x128xf32>
    %c32_122 = arith.constant 32 : index
    %c128_123 = arith.constant 128 : index
    %229 = vector.load %arg4[%c32_122, %c128_123] : memref<64x160xf32, #tpu.memory_space<vmem>>, vector<8x32xf32>
    %c32_124 = arith.constant 32 : index
    %c16_125 = arith.constant 16 : index
    %230 = vector.load %arg0[%c32_124, %c16_125] : memref<64x128xf32, #tpu.memory_space<vmem>>, vector<8x8xf32>
    %cst_126 = arith.constant dense<0.000000e+00> : vector<8x192xf32>
    %231 = tpu.matmul %227, %15, %cst_126 {dimension_numbers = #tpu.dot_dimension_numbers<[1], [0], [0], [1], [0, 0, 1, 1], [], []>} : vector<8x32xf32>, vector<32x192xf32>, vector<8x192xf32> -> vector<8x192xf32>
    %232 = vector.extract_strided_slice %231 {offsets = [0, 128], sizes = [8, 32], strides = [1, 1]} : vector<8x192xf32> to vector<8x32xf32>
    %233 = arith.addf %229, %232 : vector<8x32xf32>
    %234 = math.tanh %233 : vector<8x32xf32>
    %c0_127 = arith.constant 0 : index
    %c1024_128 = arith.constant 1024 : index
    %235 = vector.load %arg1[%c0_127, %c1024_128] : memref<32x1536xf32, #tpu.memory_space<vmem>>, vector<32x24xf32>
    %cst_129 = arith.constant dense<0.000000e+00> : vector<8x24xf32>
    %236 = tpu.matmul %234, %235, %cst_129 {dimension_numbers = #tpu.dot_dimension_numbers<[1], [0], [0], [1], [0, 0, 1, 1], [], []>} : vector<8x32xf32>, vector<32x24xf32>, vector<8x24xf32> -> vector<8x24xf32>
    %237 = arith.addf %236, %21 : vector<8x24xf32>
    %238 = vector.extract_strided_slice %237 {offsets = [0, 0], sizes = [8, 8], strides = [1, 1]} : vector<8x24xf32> to vector<8x8xf32>
    %239 = vector.extract_strided_slice %237 {offsets = [0, 16], sizes = [8, 8], strides = [1, 1]} : vector<8x24xf32> to vector<8x8xf32>
    %240 = math.exp %239 : vector<8x8xf32>
    %241 = arith.mulf %230, %240 : vector<8x8xf32>
    %242 = arith.addf %238, %241 : vector<8x8xf32>
    %c0_130 = arith.constant 0 : index
    %c896_131 = arith.constant 896 : index
    %243 = vector.load %arg1[%c0_130, %c896_131] : memref<32x1536xf32, #tpu.memory_space<vmem>>, vector<8x32xf32>
    %cst_132 = arith.constant dense<0.000000e+00> : vector<8x32xf32>
    %244 = tpu.matmul %242, %243, %cst_132 {dimension_numbers = #tpu.dot_dimension_numbers<[1], [0], [0], [1], [0, 0, 1, 1], [], []>} : vector<8x8xf32>, vector<8x32xf32>, vector<8x32xf32> -> vector<8x32xf32>
    %245 = arith.addf %244, %18 : vector<8x32xf32>
    %246 = math.tanh %245 : vector<8x32xf32>
    %c0_133 = arith.constant 0 : index
    %c512_134 = arith.constant 512 : index
    %247 = vector.load %arg1[%c0_133, %c512_134] : memref<32x1536xf32, #tpu.memory_space<vmem>>, vector<32x160xf32>
    %cst_135 = arith.constant dense<0.000000e+00> : vector<8x160xf32>
    %248 = tpu.matmul %246, %247, %cst_135 {dimension_numbers = #tpu.dot_dimension_numbers<[1], [0], [0], [1], [0, 0, 1, 1], [], []>} : vector<8x32xf32>, vector<32x160xf32>, vector<8x160xf32> -> vector<8x160xf32>
    %249 = vector.extract_strided_slice %237 {offsets = [0, 0], sizes = [8, 16], strides = [1, 1]} : vector<8x24xf32> to vector<8x16xf32>
    %c32_136 = arith.constant 32 : index
    %c16_137 = arith.constant 16 : index
    %250 = vector.load %arg3[%c32_136, %c16_137] : memref<64x128xf32, #tpu.memory_space<vmem>>, vector<8x16xf32>
    tpu.vector_store %arg3[%c32_136, %c16_137], %249 {strides = array<i32>} : memref<64x128xf32, #tpu.memory_space<vmem>>, vector<8x16xf32>,
    %c32_138 = arith.constant 32 : index
    %c32_139 = arith.constant 32 : index
    %251 = vector.load %arg3[%c32_138, %c32_139] : memref<64x128xf32, #tpu.memory_space<vmem>>, vector<8x8xf32>
    tpu.vector_store %arg3[%c32_138, %c32_139], %242 {strides = array<i32>} : memref<64x128xf32, #tpu.memory_space<vmem>>, vector<8x8xf32>,
    %c32_140 = arith.constant 32 : index
    %c0_141 = arith.constant 0 : index
    %252 = vector.load %arg5[%c32_140, %c0_141] : memref<64x32xf32, #tpu.memory_space<vmem>>, vector<8x32xf32>
    tpu.vector_store %arg5[%c32_140, %c0_141], %227 {strides = array<i32>} : memref<64x32xf32, #tpu.memory_space<vmem>>, vector<8x32xf32>,
    %253 = vector.extract_strided_slice %248 {offsets = [0, 128], sizes = [8, 32], strides = [1, 1]} : vector<8x160xf32> to vector<8x32xf32>
    %254 = vector.extract_strided_slice %231 {offsets = [0, 160], sizes = [8, 32], strides = [1, 1]} : vector<8x192xf32> to vector<8x32xf32>
    %255 = arith.addf %253, %254 : vector<8x32xf32>
    %c32_142 = arith.constant 32 : index
    %c0_143 = arith.constant 0 : index
    %256 = vector.load %arg6[%c32_142, %c0_143] : memref<64x32xf32, #tpu.memory_space<vmem>>, vector<8x32xf32>
    tpu.vector_store %arg6[%c32_142, %c0_143], %255 {strides = array<i32>} : memref<64x32xf32, #tpu.memory_space<vmem>>, vector<8x32xf32>,
    %257 = vector.extract_strided_slice %248 {offsets = [0, 0], sizes = [8, 128], strides = [1, 1]} : vector<8x160xf32> to vector<8x128xf32>
    %258 = arith.addf %228, %257 : vector<8x128xf32>
    %259 = vector.extract_strided_slice %231 {offsets = [0, 0], sizes = [8, 128], strides = [1, 1]} : vector<8x192xf32> to vector<8x128xf32>
    %260 = arith.addf %258, %259 : vector<8x128xf32>
    %261 = arith.negf %260 : vector<8x128xf32>
    %262 = math.exp %261 : vector<8x128xf32>
    %cst_144 = arith.constant 1.000000e+00 : f32
    %263 = vector.broadcast %cst_144 : f32 to vector<8x128xf32>
    %264 = arith.addf %263, %262 : vector<8x128xf32>
    %265 = arith.divf %263, %264 : vector<8x128xf32>
    %266 = vector.extract_strided_slice %265 {offsets = [0, 96], sizes = [8, 32], strides = [1, 1]} : vector<8x128xf32> to vector<8x32xf32>
    %cst_145 = arith.constant 2.000000e+00 : f32
    %267 = vector.broadcast %cst_145 : f32 to vector<8x32xf32>
    %268 = arith.mulf %267, %266 : vector<8x32xf32>
    %cst_146 = arith.constant 1.000000e+00 : f32
    %269 = vector.broadcast %cst_146 : f32 to vector<8x32xf32>
    %270 = arith.subf %268, %269 : vector<8x32xf32>
    %271 = vector.extract_strided_slice %265 {offsets = [0, 32], sizes = [8, 32], strides = [1, 1]} : vector<8x128xf32> to vector<8x32xf32>
    %272 = arith.mulf %271, %224 : vector<8x32xf32>
    %273 = vector.extract_strided_slice %265 {offsets = [0, 0], sizes = [8, 32], strides = [1, 1]} : vector<8x128xf32> to vector<8x32xf32>
    %274 = arith.mulf %273, %270 : vector<8x32xf32>
    %275 = arith.addf %272, %274 : vector<8x32xf32>
    %276 = vector.extract_strided_slice %265 {offsets = [0, 64], sizes = [8, 32], strides = [1, 1]} : vector<8x128xf32> to vector<8x32xf32>
    %277 = math.tanh %275 : vector<8x32xf32>
    %278 = arith.mulf %276, %277 : vector<8x32xf32>
    %c40 = arith.constant 40 : index
    %c0_147 = arith.constant 0 : index
    %279 = vector.load %arg4[%c40, %c0_147] : memref<64x160xf32, #tpu.memory_space<vmem>>, vector<8x128xf32>
    %c40_148 = arith.constant 40 : index
    %c128_149 = arith.constant 128 : index
    %280 = vector.load %arg4[%c40_148, %c128_149] : memref<64x160xf32, #tpu.memory_space<vmem>>, vector<8x32xf32>
    %c40_150 = arith.constant 40 : index
    %c16_151 = arith.constant 16 : index
    %281 = vector.load %arg0[%c40_150, %c16_151] : memref<64x128xf32, #tpu.memory_space<vmem>>, vector<8x8xf32>
    %cst_152 = arith.constant dense<0.000000e+00> : vector<8x192xf32>
    %282 = tpu.matmul %278, %15, %cst_152 {dimension_numbers = #tpu.dot_dimension_numbers<[1], [0], [0], [1], [0, 0, 1, 1], [], []>} : vector<8x32xf32>, vector<32x192xf32>, vector<8x192xf32> -> vector<8x192xf32>
    %283 = vector.extract_strided_slice %282 {offsets = [0, 128], sizes = [8, 32], strides = [1, 1]} : vector<8x192xf32> to vector<8x32xf32>
    %284 = arith.addf %280, %283 : vector<8x32xf32>
    %285 = math.tanh %284 : vector<8x32xf32>
    %c0_153 = arith.constant 0 : index
    %c1024_154 = arith.constant 1024 : index
    %286 = vector.load %arg1[%c0_153, %c1024_154] : memref<32x1536xf32, #tpu.memory_space<vmem>>, vector<32x24xf32>
    %cst_155 = arith.constant dense<0.000000e+00> : vector<8x24xf32>
    %287 = tpu.matmul %285, %286, %cst_155 {dimension_numbers = #tpu.dot_dimension_numbers<[1], [0], [0], [1], [0, 0, 1, 1], [], []>} : vector<8x32xf32>, vector<32x24xf32>, vector<8x24xf32> -> vector<8x24xf32>
    %288 = arith.addf %287, %21 : vector<8x24xf32>
    %289 = vector.extract_strided_slice %288 {offsets = [0, 0], sizes = [8, 8], strides = [1, 1]} : vector<8x24xf32> to vector<8x8xf32>
    %290 = vector.extract_strided_slice %288 {offsets = [0, 16], sizes = [8, 8], strides = [1, 1]} : vector<8x24xf32> to vector<8x8xf32>
    %291 = math.exp %290 : vector<8x8xf32>
    %292 = arith.mulf %281, %291 : vector<8x8xf32>
    %293 = arith.addf %289, %292 : vector<8x8xf32>
    %c0_156 = arith.constant 0 : index
    %c896_157 = arith.constant 896 : index
    %294 = vector.load %arg1[%c0_156, %c896_157] : memref<32x1536xf32, #tpu.memory_space<vmem>>, vector<8x32xf32>
    %cst_158 = arith.constant dense<0.000000e+00> : vector<8x32xf32>
    %295 = tpu.matmul %293, %294, %cst_158 {dimension_numbers = #tpu.dot_dimension_numbers<[1], [0], [0], [1], [0, 0, 1, 1], [], []>} : vector<8x8xf32>, vector<8x32xf32>, vector<8x32xf32> -> vector<8x32xf32>
    %296 = arith.addf %295, %18 : vector<8x32xf32>
    %297 = math.tanh %296 : vector<8x32xf32>
    %c0_159 = arith.constant 0 : index
    %c512_160 = arith.constant 512 : index
    %298 = vector.load %arg1[%c0_159, %c512_160] : memref<32x1536xf32, #tpu.memory_space<vmem>>, vector<32x160xf32>
    %cst_161 = arith.constant dense<0.000000e+00> : vector<8x160xf32>
    %299 = tpu.matmul %297, %298, %cst_161 {dimension_numbers = #tpu.dot_dimension_numbers<[1], [0], [0], [1], [0, 0, 1, 1], [], []>} : vector<8x32xf32>, vector<32x160xf32>, vector<8x160xf32> -> vector<8x160xf32>
    %300 = vector.extract_strided_slice %288 {offsets = [0, 0], sizes = [8, 16], strides = [1, 1]} : vector<8x24xf32> to vector<8x16xf32>
    %c40_162 = arith.constant 40 : index
    %c16_163 = arith.constant 16 : index
    %301 = vector.load %arg3[%c40_162, %c16_163] : memref<64x128xf32, #tpu.memory_space<vmem>>, vector<8x16xf32>
    tpu.vector_store %arg3[%c40_162, %c16_163], %300 {strides = array<i32>} : memref<64x128xf32, #tpu.memory_space<vmem>>, vector<8x16xf32>,
    %c40_164 = arith.constant 40 : index
    %c32_165 = arith.constant 32 : index
    %302 = vector.load %arg3[%c40_164, %c32_165] : memref<64x128xf32, #tpu.memory_space<vmem>>, vector<8x8xf32>
    tpu.vector_store %arg3[%c40_164, %c32_165], %293 {strides = array<i32>} : memref<64x128xf32, #tpu.memory_space<vmem>>, vector<8x8xf32>,
    %c40_166 = arith.constant 40 : index
    %c0_167 = arith.constant 0 : index
    %303 = vector.load %arg5[%c40_166, %c0_167] : memref<64x32xf32, #tpu.memory_space<vmem>>, vector<8x32xf32>
    tpu.vector_store %arg5[%c40_166, %c0_167], %278 {strides = array<i32>} : memref<64x32xf32, #tpu.memory_space<vmem>>, vector<8x32xf32>,
    %304 = vector.extract_strided_slice %299 {offsets = [0, 128], sizes = [8, 32], strides = [1, 1]} : vector<8x160xf32> to vector<8x32xf32>
    %305 = vector.extract_strided_slice %282 {offsets = [0, 160], sizes = [8, 32], strides = [1, 1]} : vector<8x192xf32> to vector<8x32xf32>
    %306 = arith.addf %304, %305 : vector<8x32xf32>
    %c40_168 = arith.constant 40 : index
    %c0_169 = arith.constant 0 : index
    %307 = vector.load %arg6[%c40_168, %c0_169] : memref<64x32xf32, #tpu.memory_space<vmem>>, vector<8x32xf32>
    tpu.vector_store %arg6[%c40_168, %c0_169], %306 {strides = array<i32>} : memref<64x32xf32, #tpu.memory_space<vmem>>, vector<8x32xf32>,
    %308 = vector.extract_strided_slice %299 {offsets = [0, 0], sizes = [8, 128], strides = [1, 1]} : vector<8x160xf32> to vector<8x128xf32>
    %309 = arith.addf %279, %308 : vector<8x128xf32>
    %310 = vector.extract_strided_slice %282 {offsets = [0, 0], sizes = [8, 128], strides = [1, 1]} : vector<8x192xf32> to vector<8x128xf32>
    %311 = arith.addf %309, %310 : vector<8x128xf32>
    %312 = arith.negf %311 : vector<8x128xf32>
    %313 = math.exp %312 : vector<8x128xf32>
    %cst_170 = arith.constant 1.000000e+00 : f32
    %314 = vector.broadcast %cst_170 : f32 to vector<8x128xf32>
    %315 = arith.addf %314, %313 : vector<8x128xf32>
    %316 = arith.divf %314, %315 : vector<8x128xf32>
    %317 = vector.extract_strided_slice %316 {offsets = [0, 96], sizes = [8, 32], strides = [1, 1]} : vector<8x128xf32> to vector<8x32xf32>
    %cst_171 = arith.constant 2.000000e+00 : f32
    %318 = vector.broadcast %cst_171 : f32 to vector<8x32xf32>
    %319 = arith.mulf %318, %317 : vector<8x32xf32>
    %cst_172 = arith.constant 1.000000e+00 : f32
    %320 = vector.broadcast %cst_172 : f32 to vector<8x32xf32>
    %321 = arith.subf %319, %320 : vector<8x32xf32>
    %322 = vector.extract_strided_slice %316 {offsets = [0, 32], sizes = [8, 32], strides = [1, 1]} : vector<8x128xf32> to vector<8x32xf32>
    %323 = arith.mulf %322, %275 : vector<8x32xf32>
    %324 = vector.extract_strided_slice %316 {offsets = [0, 0], sizes = [8, 32], strides = [1, 1]} : vector<8x128xf32> to vector<8x32xf32>
    %325 = arith.mulf %324, %321 : vector<8x32xf32>
    %326 = arith.addf %323, %325 : vector<8x32xf32>
    %327 = vector.extract_strided_slice %316 {offsets = [0, 64], sizes = [8, 32], strides = [1, 1]} : vector<8x128xf32> to vector<8x32xf32>
    %328 = math.tanh %326 : vector<8x32xf32>
    %329 = arith.mulf %327, %328 : vector<8x32xf32>
    %c48 = arith.constant 48 : index
    %c0_173 = arith.constant 0 : index
    %330 = vector.load %arg4[%c48, %c0_173] : memref<64x160xf32, #tpu.memory_space<vmem>>, vector<8x128xf32>
    %c48_174 = arith.constant 48 : index
    %c128_175 = arith.constant 128 : index
    %331 = vector.load %arg4[%c48_174, %c128_175] : memref<64x160xf32, #tpu.memory_space<vmem>>, vector<8x32xf32>
    %c48_176 = arith.constant 48 : index
    %c16_177 = arith.constant 16 : index
    %332 = vector.load %arg0[%c48_176, %c16_177] : memref<64x128xf32, #tpu.memory_space<vmem>>, vector<8x8xf32>
    %cst_178 = arith.constant dense<0.000000e+00> : vector<8x192xf32>
    %333 = tpu.matmul %329, %15, %cst_178 {dimension_numbers = #tpu.dot_dimension_numbers<[1], [0], [0], [1], [0, 0, 1, 1], [], []>} : vector<8x32xf32>, vector<32x192xf32>, vector<8x192xf32> -> vector<8x192xf32>
    %334 = vector.extract_strided_slice %333 {offsets = [0, 128], sizes = [8, 32], strides = [1, 1]} : vector<8x192xf32> to vector<8x32xf32>
    %335 = arith.addf %331, %334 : vector<8x32xf32>
    %336 = math.tanh %335 : vector<8x32xf32>
    %c0_179 = arith.constant 0 : index
    %c1024_180 = arith.constant 1024 : index
    %337 = vector.load %arg1[%c0_179, %c1024_180] : memref<32x1536xf32, #tpu.memory_space<vmem>>, vector<32x24xf32>
    %cst_181 = arith.constant dense<0.000000e+00> : vector<8x24xf32>
    %338 = tpu.matmul %336, %337, %cst_181 {dimension_numbers = #tpu.dot_dimension_numbers<[1], [0], [0], [1], [0, 0, 1, 1], [], []>} : vector<8x32xf32>, vector<32x24xf32>, vector<8x24xf32> -> vector<8x24xf32>
    %339 = arith.addf %338, %21 : vector<8x24xf32>
    %340 = vector.extract_strided_slice %339 {offsets = [0, 0], sizes = [8, 8], strides = [1, 1]} : vector<8x24xf32> to vector<8x8xf32>
    %341 = vector.extract_strided_slice %339 {offsets = [0, 16], sizes = [8, 8], strides = [1, 1]} : vector<8x24xf32> to vector<8x8xf32>
    %342 = math.exp %341 : vector<8x8xf32>
    %343 = arith.mulf %332, %342 : vector<8x8xf32>
    %344 = arith.addf %340, %343 : vector<8x8xf32>
    %c0_182 = arith.constant 0 : index
    %c896_183 = arith.constant 896 : index
    %345 = vector.load %arg1[%c0_182, %c896_183] : memref<32x1536xf32, #tpu.memory_space<vmem>>, vector<8x32xf32>
    %cst_184 = arith.constant dense<0.000000e+00> : vector<8x32xf32>
    %346 = tpu.matmul %344, %345, %cst_184 {dimension_numbers = #tpu.dot_dimension_numbers<[1], [0], [0], [1], [0, 0, 1, 1], [], []>} : vector<8x8xf32>, vector<8x32xf32>, vector<8x32xf32> -> vector<8x32xf32>
    %347 = arith.addf %346, %18 : vector<8x32xf32>
    %348 = math.tanh %347 : vector<8x32xf32>
    %c0_185 = arith.constant 0 : index
    %c512_186 = arith.constant 512 : index
    %349 = vector.load %arg1[%c0_185, %c512_186] : memref<32x1536xf32, #tpu.memory_space<vmem>>, vector<32x160xf32>
    %cst_187 = arith.constant dense<0.000000e+00> : vector<8x160xf32>
    %350 = tpu.matmul %348, %349, %cst_187 {dimension_numbers = #tpu.dot_dimension_numbers<[1], [0], [0], [1], [0, 0, 1, 1], [], []>} : vector<8x32xf32>, vector<32x160xf32>, vector<8x160xf32> -> vector<8x160xf32>
    %351 = vector.extract_strided_slice %339 {offsets = [0, 0], sizes = [8, 16], strides = [1, 1]} : vector<8x24xf32> to vector<8x16xf32>
    %c48_188 = arith.constant 48 : index
    %c16_189 = arith.constant 16 : index
    %352 = vector.load %arg3[%c48_188, %c16_189] : memref<64x128xf32, #tpu.memory_space<vmem>>, vector<8x16xf32>
    tpu.vector_store %arg3[%c48_188, %c16_189], %351 {strides = array<i32>} : memref<64x128xf32, #tpu.memory_space<vmem>>, vector<8x16xf32>,
    %c48_190 = arith.constant 48 : index
    %c32_191 = arith.constant 32 : index
    %353 = vector.load %arg3[%c48_190, %c32_191] : memref<64x128xf32, #tpu.memory_space<vmem>>, vector<8x8xf32>
    tpu.vector_store %arg3[%c48_190, %c32_191], %344 {strides = array<i32>} : memref<64x128xf32, #tpu.memory_space<vmem>>, vector<8x8xf32>,
    %c48_192 = arith.constant 48 : index
    %c0_193 = arith.constant 0 : index
    %354 = vector.load %arg5[%c48_192, %c0_193] : memref<64x32xf32, #tpu.memory_space<vmem>>, vector<8x32xf32>
    tpu.vector_store %arg5[%c48_192, %c0_193], %329 {strides = array<i32>} : memref<64x32xf32, #tpu.memory_space<vmem>>, vector<8x32xf32>,
    %355 = vector.extract_strided_slice %350 {offsets = [0, 128], sizes = [8, 32], strides = [1, 1]} : vector<8x160xf32> to vector<8x32xf32>
    %356 = vector.extract_strided_slice %333 {offsets = [0, 160], sizes = [8, 32], strides = [1, 1]} : vector<8x192xf32> to vector<8x32xf32>
    %357 = arith.addf %355, %356 : vector<8x32xf32>
    %c48_194 = arith.constant 48 : index
    %c0_195 = arith.constant 0 : index
    %358 = vector.load %arg6[%c48_194, %c0_195] : memref<64x32xf32, #tpu.memory_space<vmem>>, vector<8x32xf32>
    tpu.vector_store %arg6[%c48_194, %c0_195], %357 {strides = array<i32>} : memref<64x32xf32, #tpu.memory_space<vmem>>, vector<8x32xf32>,
    %359 = vector.extract_strided_slice %350 {offsets = [0, 0], sizes = [8, 128], strides = [1, 1]} : vector<8x160xf32> to vector<8x128xf32>
    %360 = arith.addf %330, %359 : vector<8x128xf32>
    %361 = vector.extract_strided_slice %333 {offsets = [0, 0], sizes = [8, 128], strides = [1, 1]} : vector<8x192xf32> to vector<8x128xf32>
    %362 = arith.addf %360, %361 : vector<8x128xf32>
    %363 = arith.negf %362 : vector<8x128xf32>
    %364 = math.exp %363 : vector<8x128xf32>
    %cst_196 = arith.constant 1.000000e+00 : f32
    %365 = vector.broadcast %cst_196 : f32 to vector<8x128xf32>
    %366 = arith.addf %365, %364 : vector<8x128xf32>
    %367 = arith.divf %365, %366 : vector<8x128xf32>
    %368 = vector.extract_strided_slice %367 {offsets = [0, 96], sizes = [8, 32], strides = [1, 1]} : vector<8x128xf32> to vector<8x32xf32>
    %cst_197 = arith.constant 2.000000e+00 : f32
    %369 = vector.broadcast %cst_197 : f32 to vector<8x32xf32>
    %370 = arith.mulf %369, %368 : vector<8x32xf32>
    %cst_198 = arith.constant 1.000000e+00 : f32
    %371 = vector.broadcast %cst_198 : f32 to vector<8x32xf32>
    %372 = arith.subf %370, %371 : vector<8x32xf32>
    %373 = vector.extract_strided_slice %367 {offsets = [0, 32], sizes = [8, 32], strides = [1, 1]} : vector<8x128xf32> to vector<8x32xf32>
    %374 = arith.mulf %373, %326 : vector<8x32xf32>
    %375 = vector.extract_strided_slice %367 {offsets = [0, 0], sizes = [8, 32], strides = [1, 1]} : vector<8x128xf32> to vector<8x32xf32>
    %376 = arith.mulf %375, %372 : vector<8x32xf32>
    %377 = arith.addf %374, %376 : vector<8x32xf32>
    %378 = vector.extract_strided_slice %367 {offsets = [0, 64], sizes = [8, 32], strides = [1, 1]} : vector<8x128xf32> to vector<8x32xf32>
    %379 = math.tanh %377 : vector<8x32xf32>
    %380 = arith.mulf %378, %379 : vector<8x32xf32>
    %c56 = arith.constant 56 : index
    %c128_199 = arith.constant 128 : index
    %381 = vector.load %arg4[%c56, %c128_199] : memref<64x160xf32, #tpu.memory_space<vmem>>, vector<8x32xf32>
    %c56_200 = arith.constant 56 : index
    %c16_201 = arith.constant 16 : index
    %382 = vector.load %arg0[%c56_200, %c16_201] : memref<64x128xf32, #tpu.memory_space<vmem>>, vector<8x8xf32>
    %cst_202 = arith.constant dense<0.000000e+00> : vector<8x192xf32>
    %383 = tpu.matmul %380, %15, %cst_202 {dimension_numbers = #tpu.dot_dimension_numbers<[1], [0], [0], [1], [0, 0, 1, 1], [], []>} : vector<8x32xf32>, vector<32x192xf32>, vector<8x192xf32> -> vector<8x192xf32>
    %384 = vector.extract_strided_slice %383 {offsets = [0, 128], sizes = [8, 32], strides = [1, 1]} : vector<8x192xf32> to vector<8x32xf32>
    %385 = arith.addf %381, %384 : vector<8x32xf32>
    %386 = math.tanh %385 : vector<8x32xf32>
    %c0_203 = arith.constant 0 : index
    %c1024_204 = arith.constant 1024 : index
    %387 = vector.load %arg1[%c0_203, %c1024_204] : memref<32x1536xf32, #tpu.memory_space<vmem>>, vector<32x24xf32>
    %cst_205 = arith.constant dense<0.000000e+00> : vector<8x24xf32>
    %388 = tpu.matmul %386, %387, %cst_205 {dimension_numbers = #tpu.dot_dimension_numbers<[1], [0], [0], [1], [0, 0, 1, 1], [], []>} : vector<8x32xf32>, vector<32x24xf32>, vector<8x24xf32> -> vector<8x24xf32>
    %389 = arith.addf %388, %21 : vector<8x24xf32>
    %390 = vector.extract_strided_slice %389 {offsets = [0, 0], sizes = [8, 8], strides = [1, 1]} : vector<8x24xf32> to vector<8x8xf32>
    %391 = vector.extract_strided_slice %389 {offsets = [0, 16], sizes = [8, 8], strides = [1, 1]} : vector<8x24xf32> to vector<8x8xf32>
    %392 = math.exp %391 : vector<8x8xf32>
    %393 = arith.mulf %382, %392 : vector<8x8xf32>
    %394 = arith.addf %390, %393 : vector<8x8xf32>
    %c0_206 = arith.constant 0 : index
    %c896_207 = arith.constant 896 : index
    %395 = vector.load %arg1[%c0_206, %c896_207] : memref<32x1536xf32, #tpu.memory_space<vmem>>, vector<8x32xf32>
    %cst_208 = arith.constant dense<0.000000e+00> : vector<8x32xf32>
    %396 = tpu.matmul %394, %395, %cst_208 {dimension_numbers = #tpu.dot_dimension_numbers<[1], [0], [0], [1], [0, 0, 1, 1], [], []>} : vector<8x8xf32>, vector<8x32xf32>, vector<8x32xf32> -> vector<8x32xf32>
    %397 = arith.addf %396, %18 : vector<8x32xf32>
    %398 = math.tanh %397 : vector<8x32xf32>
    %c0_209 = arith.constant 0 : index
    %c512_210 = arith.constant 512 : index
    %399 = vector.load %arg1[%c0_209, %c512_210] : memref<32x1536xf32, #tpu.memory_space<vmem>>, vector<32x160xf32>
    %cst_211 = arith.constant dense<0.000000e+00> : vector<8x160xf32>
    %400 = tpu.matmul %398, %399, %cst_211 {dimension_numbers = #tpu.dot_dimension_numbers<[1], [0], [0], [1], [0, 0, 1, 1], [], []>} : vector<8x32xf32>, vector<32x160xf32>, vector<8x160xf32> -> vector<8x160xf32>
    %401 = vector.extract_strided_slice %389 {offsets = [0, 0], sizes = [8, 16], strides = [1, 1]} : vector<8x24xf32> to vector<8x16xf32>
    %c56_212 = arith.constant 56 : index
    %c16_213 = arith.constant 16 : index
    %402 = vector.load %arg3[%c56_212, %c16_213] : memref<64x128xf32, #tpu.memory_space<vmem>>, vector<8x16xf32>
    tpu.vector_store %arg3[%c56_212, %c16_213], %401 {strides = array<i32>} : memref<64x128xf32, #tpu.memory_space<vmem>>, vector<8x16xf32>,
    %c56_214 = arith.constant 56 : index
    %c32_215 = arith.constant 32 : index
    %403 = vector.load %arg3[%c56_214, %c32_215] : memref<64x128xf32, #tpu.memory_space<vmem>>, vector<8x8xf32>
    tpu.vector_store %arg3[%c56_214, %c32_215], %394 {strides = array<i32>} : memref<64x128xf32, #tpu.memory_space<vmem>>, vector<8x8xf32>,
    %c56_216 = arith.constant 56 : index
    %c0_217 = arith.constant 0 : index
    %404 = vector.load %arg5[%c56_216, %c0_217] : memref<64x32xf32, #tpu.memory_space<vmem>>, vector<8x32xf32>
    tpu.vector_store %arg5[%c56_216, %c0_217], %380 {strides = array<i32>} : memref<64x32xf32, #tpu.memory_space<vmem>>, vector<8x32xf32>,
    %405 = vector.extract_strided_slice %400 {offsets = [0, 128], sizes = [8, 32], strides = [1, 1]} : vector<8x160xf32> to vector<8x32xf32>
    %406 = vector.extract_strided_slice %383 {offsets = [0, 160], sizes = [8, 32], strides = [1, 1]} : vector<8x192xf32> to vector<8x32xf32>
    %407 = arith.addf %405, %406 : vector<8x32xf32>
    %c56_218 = arith.constant 56 : index
    %c0_219 = arith.constant 0 : index
    %408 = vector.load %arg6[%c56_218, %c0_219] : memref<64x32xf32, #tpu.memory_space<vmem>>, vector<8x32xf32>
    tpu.vector_store %arg6[%c56_218, %c0_219], %407 {strides = array<i32>} : memref<64x32xf32, #tpu.memory_space<vmem>>, vector<8x32xf32>,
    %c0_220 = arith.constant 0 : index
    %c0_221 = arith.constant 0 : index
    %409 = vector.load %arg6[%c0_220, %c0_221] : memref<64x32xf32, #tpu.memory_space<vmem>>, vector<64x32xf32>
    %c0_222 = arith.constant 0 : index
    %c512_223 = arith.constant 512 : index
    %410 = vector.load %arg2[%c0_222, %c512_223] : memref<1x1152xf32, #tpu.memory_space<vmem>>, vector<1x32xf32>
    %411 = vector.broadcast %410 : vector<1x32xf32> to vector<64x32xf32>
    %412 = arith.addf %409, %411 : vector<64x32xf32>
    %413 = math.tanh %412 : vector<64x32xf32>
    %c0_224 = arith.constant 0 : index
    %c1152 = arith.constant 1152 : index
    %414 = vector.load %arg1[%c0_224, %c1152] : memref<32x1536xf32, #tpu.memory_space<vmem>>, vector<32x16xf32>
    %cst_225 = arith.constant dense<0.000000e+00> : vector<64x16xf32>
    %415 = tpu.matmul %413, %414, %cst_225 {dimension_numbers = #tpu.dot_dimension_numbers<[1], [0], [0], [1], [0, 0, 1, 1], [], []>} : vector<64x32xf32>, vector<32x16xf32>, vector<64x16xf32> -> vector<64x16xf32>
    %c0_226 = arith.constant 0 : index
    %c768_227 = arith.constant 768 : index
    %416 = vector.load %arg2[%c0_226, %c768_227] : memref<1x1152xf32, #tpu.memory_space<vmem>>, vector<1x16xf32>
    %417 = vector.broadcast %416 : vector<1x16xf32> to vector<64x16xf32>
    %418 = arith.addf %415, %417 : vector<64x16xf32>
    %c0_228 = arith.constant 0 : index
    %c0_229 = arith.constant 0 : index
    %419 = vector.load %arg3[%c0_228, %c0_229] : memref<64x128xf32, #tpu.memory_space<vmem>>, vector<64x16xf32>
    tpu.vector_store %arg3[%c0_228, %c0_229], %418 {strides = array<i32>} : memref<64x128xf32, #tpu.memory_space<vmem>>, vector<64x16xf32>,
    %c0_230 = arith.constant 0 : index
    %c0_231 = arith.constant 0 : index
    %420 = vector.load %arg5[%c0_230, %c0_231] : memref<64x32xf32, #tpu.memory_space<vmem>>, vector<64x32xf32>
    %c0_232 = arith.constant 0 : index
    %c40_233 = arith.constant 40 : index
    %421 = vector.load %arg3[%c0_232, %c40_233] : memref<64x128xf32, #tpu.memory_space<vmem>>, vector<64x32xf32>
    tpu.vector_store %arg3[%c0_232, %c40_233], %420 {strides = array<i32>} : memref<64x128xf32, #tpu.memory_space<vmem>>, vector<64x32xf32>,
    %c0_234 = arith.constant 0 : index
    %c1280 = arith.constant 1280 : index
    %422 = vector.load %arg1[%c0_234, %c1280] : memref<32x1536xf32, #tpu.memory_space<vmem>>, vector<32x32xf32>
    %cst_235 = arith.constant dense<0.000000e+00> : vector<64x32xf32>
    %423 = tpu.matmul %420, %422, %cst_235 {dimension_numbers = #tpu.dot_dimension_numbers<[1], [0], [0], [1], [0, 0, 1, 1], [], []>} : vector<64x32xf32>, vector<32x32xf32>, vector<64x32xf32> -> vector<64x32xf32>
    %c0_236 = arith.constant 0 : index
    %c896_237 = arith.constant 896 : index
    %424 = vector.load %arg2[%c0_236, %c896_237] : memref<1x1152xf32, #tpu.memory_space<vmem>>, vector<1x32xf32>
    %425 = vector.broadcast %424 : vector<1x32xf32> to vector<64x32xf32>
    %426 = arith.addf %423, %425 : vector<64x32xf32>
    %427 = math.tanh %426 : vector<64x32xf32>
    %c0_238 = arith.constant 0 : index
    %c1408 = arith.constant 1408 : index
    %428 = vector.load %arg1[%c0_238, %c1408] : memref<32x1536xf32, #tpu.memory_space<vmem>>, vector<32x16xf32>
    %cst_239 = arith.constant dense<0.000000e+00> : vector<64x16xf32>
    %429 = tpu.matmul %427, %428, %cst_239 {dimension_numbers = #tpu.dot_dimension_numbers<[1], [0], [0], [1], [0, 0, 1, 1], [], []>} : vector<64x32xf32>, vector<32x16xf32>, vector<64x16xf32> -> vector<64x16xf32>
    %c0_240 = arith.constant 0 : index
    %c1024_241 = arith.constant 1024 : index
    %430 = vector.load %arg2[%c0_240, %c1024_241] : memref<1x1152xf32, #tpu.memory_space<vmem>>, vector<1x16xf32>
    %431 = vector.broadcast %430 : vector<1x16xf32> to vector<64x16xf32>
    %432 = arith.addf %429, %431 : vector<64x16xf32>
    %c0_242 = arith.constant 0 : index
    %c72 = arith.constant 72 : index
    %433 = vector.load %arg3[%c0_242, %c72] : memref<64x128xf32, #tpu.memory_space<vmem>>, vector<64x16xf32>
    tpu.vector_store %arg3[%c0_242, %c72], %432 {strides = array<i32>} : memref<64x128xf32, #tpu.memory_space<vmem>>, vector<64x16xf32>,
    return
  }
}

</mosaic_0001>

<bundles_post_ra>
// kernel: vrnn_forward.1
= control target key start
LH: loop header
LB: loop body
LE: loop exit
PB: predicated region body
PF: predicated region fallthrough
CT: control target
= control target key end

     0   :  { %vm36_vm0 = vcmask 130048   ;;  %vm124_vm1 = vcmask 261120   ;;  %v2542_v39 = vmov 0.0   ;;  %s2543_s26 = smov 112   ;;  %vm347_vm2 = vcmask 64512   ;;  %s2544_s18 = smov 32   ;;  %s3621_s1 = inlined_call_operand.vmem [shape: f32[32,1536], index: 1, kind: input, shape index: {}]   ;;  %s3622_s0 = inlined_call_operand.vmem [shape: f32[64,128], index: 0, kind: input, shape index: {}]   ;;  %s3623_s2 = inlined_call_operand.vmem [shape: f32[1,1152], index: 2, kind: input, shape index: {}]   ;;  %s3624_s3 = inlined_call_operand.vmem [shape: f32[64,128], index: 3, kind: output, shape index: {}]  }
   0x1   :  { %v31_v0 = vld [vmem:[%s3621_s1 + $0x90] sm:$0xff]  ;;  %v2579_v2 = vld [vmem:[%s3622_s0] sm:$0xff]  ;;  %v2586_v3 = vld [vmem:[%s3622_s0 + $0x8] sm:$0xff]  ;;  %434 = vst.msk [vmem:[#allocation3] sm:$0xff] %vm124_vm1, %v2542_v39  ;;  %s2545_s19 = smov 64   ;;  %s2546_s14 = smov 96  }
   0x2   :  { %v30_v1 = vld [vmem:[%s3621_s1 + $0x30] sm:$0xff]  ;;  %75 = vmatpush.msra.mxu0 %v31_v0  ;;  %2377 = vmatpush.msra.mxu1 %v31_v0  ;;  %v29_v8 = vld [vmem:[%s3622_s0 + $0x38] sm:$0xff]  ;;  %v26_v10 = vld [vmem:[%s3622_s0 + $0x20] sm:$0xff]  ;;  %16 = vst [vmem:[%s3624_s3 + $0x10] sm:$0xff] %v2542_v39  ;;  %s2547_s7 = smov 16   ;;  %s2548_s8 = smov 40  }
   0x3   :  { %v28_v4 = vld [vmem:[%s3622_s0 + $0x30] sm:$0xff]  ;;  %v2614_v9 = vld [vmem:[%s3622_s0 + $0x18] sm:$0xff]  ;;  %v27_v11 = vld [vmem:[%s3622_s0 + $0x28] sm:$0xff]  ;;  %14 = vst [vmem:[%s3624_s3] sm:$0xff] %v2542_v39  ;;  %s2549_s28 = smov 72  }
   0x4   :  { %76 = vmatpush.msra.mxu0 %v30_v1  ;;  %2378 = vmatpush.msra.mxu1 %v30_v1  ;;  %v116_v5 = vld [vmem:[%s3621_s1 + $0x130] sm:$0xff]  ;;  %v117_v14 = vld [vmem:[%s3621_s1 + $0x138] sm:$0xff]  ;;  %v2391_v18 = vld [vmem:[%s3623_s2] ss:$0 sm:$0xff]  ;;  %15 = vst [vmem:[%s3624_s3 + $0x8] sm:$0xff] %v2542_v39 }
   0x5   :  { %2271 = vmatmul.msk.f32.vlgmr.msra.gmra.mxu0 %vm36_vm0, %v2579_v2  ;;  %2277 = vmatmul.msk.f32.vlgmr.msra.gmra.mxu1 %vm36_vm0, %v28_v4  ;;  %v114_v6 = vld [vmem:[%s3621_s1 + $0xd0] sm:$0xff]  ;;  %v115_v15 = vld [vmem:[%s3621_s1 + $0xd8] sm:$0xff]  ;;  %v2659_v37 = vld [vmem:[%s3621_s1 + $0x120] sm:$0xff]  ;;  %17 = vst [vmem:[%s3624_s3 + $0x18] sm:$0xff] %v2542_v39 }
   0x6   :  { %161 = vmatpush.msrb.mxu1 %v116_v5  ;;  %v2603_v7 = vld [vmem:[%s3622_s0 + $0x10] sm:$0xff]  ;;  %2379 = vmatpush.msra.mxu2 %v117_v14  ;;  %v113_v16 = vld [vmem:[%s3621_s1 + $0x78] sm:$0xff]  ;;  %v2664_v38 = vld [vmem:[%s3621_s1 + $0xc0] sm:$0xff]  ;;  %18 = vst [vmem:[%s3624_s3 + $0x20] sm:$0xff] %v2542_v39 }
   0x7   :  { %v112_v12 = vld [vmem:[%s3621_s1 + $0x70] sm:$0xff]  ;;  %v111_v17 = vld [vmem:[%s3621_s1 + $0x18] sm:$0xff]  ;;  %v2672_v40 = vld [vmem:[%s3621_s1 + $0x60] sm:$0xff]  ;;  %19 = vst [vmem:[%s3624_s3 + $0x28] sm:$0xff] %v2542_v39 }
   0x8   :  { %162 = vmatpush.msrb.mxu1 %v114_v6  ;;  %v110_v13 = vld [vmem:[%s3621_s1 + $0x10] sm:$0xff]  ;;  %2380 = vmatpush.msra.mxu2 %v115_v15  ;;  %v2678_v42 = vld [vmem:[%s3621_s1] sm:$0xff]  ;;  %v2691_v48 = vld [vmem:[%s3621_s1 + $0x128] sm:$0xff]  ;;  %20 = vst [vmem:[%s3624_s3 + $0x30] sm:$0xff] %v2542_v39 }
   0x9   :  { %v2697_v49 = vld [vmem:[%s3621_s1 + $0xc8] sm:$0xff]  ;;  %v118_v52 = vld [vmem:[%s3623_s2 + $0x2] sm:$0x3]  ;;  %21 = vst [vmem:[%s3624_s3 + $0x38] sm:$0xff] %v2542_v39 }
   0xa   :  { %163 = vmatpush.msrb.mxu1 %v112_v12  ;;  %2381 = vmatpush.msra.mxu2 %v113_v16  ;;  %v2703_v50 = vld [vmem:[%s3621_s1 + $0x68] sm:$0xff]  ;;  %v120_v53 = vperm.slane %v118_v52, 0  ;;  %v121_v58 = vperm.slane %v118_v52, 1 }
   0xb   :  { %v2709_v51 = vld [vmem:[%s3621_s1 + $0x8] sm:$0xff] }
   0xc   :  { %164 = vmatpush.msrb.mxu1 %v110_v13  ;;  %2382 = vmatpush.msra.mxu2 %v111_v17 }
   0xd   :  { %2272 = vmatmul.msk.f32.gmra.mxu0 %vm36_vm0, %v2586_v3  ;;  %2278 = vmatmul.msk.f32.gmra.mxu1 %vm36_vm0, %v29_v8 }
   0xe   :  { %202 = vmatpush.msra.mxu1 %v117_v14 }
  0x10   :  { %203 = vmatpush.msra.mxu1 %v115_v15 }
  0x12   :  { %204 = vmatpush.msra.mxu1 %v113_v16 }
  0x14   :  { %205 = vmatpush.msra.mxu1 %v111_v17 }
  0x15   :  { %2273 = vmatmul.msk.f32.gmra.mxu0 %vm36_vm0, %v2603_v7 }
  0x1d   :  { %2274 = vmatmul.msk.f32.gmra.mxu0 %vm36_vm0, %v2614_v9 }
  0x25   :  { %2275 = vmatmul.msk.f32.gmra.mxu0 %vm36_vm0, %v26_v10 }
  0x2d   :  { %2276 = vmatmul.msk.f32.gmra.mxu0 %vm36_vm0, %v27_v11 }
  0x82   :  { %v78_v19 = vpop.f32.mrf.mxu0  ;;  %v96_v34 = vpop.f32.mrf.mxu1 }
  0x83   :  { %v79_v20 = vadd.f32 %v2391_v18, %v78_v19  ;;  %v97_v41 = vadd.f32 %v2391_v18, %v96_v34  ;;  %v2736_v19 = vld [vmem:[%s3621_s1 + $0x160] sm:$0xff] }
  0x84   :  { %330 = vmatpush.msra.mxu3 %v2736_v19  ;;  %550 = vmatpush.msrb.mxu0 %v2736_v19 }
  0x85   :  { %2398 = vtanh.f32 %v79_v20  ;;  %v2742_v20 = vld [vmem:[%s3621_s1 + $0x100] sm:$0xff]  ;;  %768 = vmatpush.msrb.mxu2 %v2736_v19 }
  0x86   :  { %331 = vmatpush.msra.mxu3 %v2742_v20  ;;  %551 = vmatpush.msrb.mxu0 %v2742_v20 }
  0x87   :  { %769 = vmatpush.msrb.mxu2 %v2742_v20 }
  0x8a   :  { %v81_v21 = vpop.f32.mrf.mxu0  ;;  %v99_v44 = vpop.f32.mrf.mxu1 }
  0x8b   :  { %v2399_v22 = vpop.eup %2398  ;;  %v82_v23 = vadd.f32 %v2391_v18, %v81_v21  ;;  %v100_v45 = vadd.f32 %v2391_v18, %v99_v44  ;;  %v2748_v21 = vld [vmem:[%s3621_s1 + $0xa0] sm:$0xff] }
  0x8c   :  { %2279 = vmatmul.msk.f32.vlgmr.msrb.gmra.mxu1 %vm124_vm1, %v2399_v22  ;;  %332 = vmatpush.msra.mxu3 %v2748_v21 }
  0x8d   :  { %2400 = vtanh.f32 %v82_v23  ;;  %281 = vmatpush.msrb.mxu1 %v2659_v37  ;;  %v2756_v23 = vld [vmem:[%s3621_s1 + $0x40] sm:$0xff]  ;;  %552 = vmatpush.msrb.mxu0 %v2748_v21 }
  0x8e   :  { %770 = vmatpush.msrb.mxu2 %v2748_v21  ;;  %333 = vmatpush.msra.mxu3 %v2756_v23 }
  0x8f   :  { %282 = vmatpush.msrb.mxu1 %v2664_v38  ;;  %553 = vmatpush.msrb.mxu0 %v2756_v23 }
  0x90   :  { %771 = vmatpush.msrb.mxu2 %v2756_v23 }
  0x91   :  { %283 = vmatpush.msrb.mxu1 %v2672_v40  ;;  %719 = vmatpush.msra.mxu0 %v2659_v37 }
  0x92   :  { %v84_v24 = vpop.f32.mrf.mxu0 }
  0x93   :  { %v2401_v25 = vpop.eup %2400  ;;  %v85_v26 = vadd.f32 %v2391_v18, %v84_v24  ;;  %284 = vmatpush.msrb.mxu1 %v2678_v42  ;;  %720 = vmatpush.msra.mxu0 %v2664_v38 }
  0x94   :  { %2280 = vmatmul.msk.f32.gmra.mxu1 %vm124_vm1, %v2401_v25  ;;  %2288 = vmatmul.msk.f32.vlgmr.msra.gmra.mxu2 %vm124_vm1, %v2401_v25 }
  0x95   :  { %2402 = vtanh.f32 %v85_v26  ;;  %937 = vmatpush.msra.mxu2 %v2659_v37  ;;  %721 = vmatpush.msra.mxu0 %v2672_v40 }
  0x97   :  { %938 = vmatpush.msra.mxu2 %v2664_v38  ;;  %722 = vmatpush.msra.mxu0 %v2678_v42 }
  0x99   :  { %939 = vmatpush.msra.mxu2 %v2672_v40 }
  0x9a   :  { %v87_v27 = vpop.f32.mrf.mxu0 }
  0x9b   :  { %v2403_v28 = vpop.eup %2402  ;;  %v88_v29 = vadd.f32 %v2391_v18, %v87_v27  ;;  %940 = vmatpush.msra.mxu2 %v2678_v42 }
  0x9c   :  { %2281 = vmatmul.msk.f32.gmra.mxu1 %vm124_vm1, %v2403_v28  ;;  %2289 = vmatmul.msk.f32.gmra.mxu2 %vm124_vm1, %v2403_v28 }
  0x9d   :  { %2404 = vtanh.f32 %v88_v29 }
  0xa2   :  { %v90_v30 = vpop.f32.mrf.mxu0 }
  0xa3   :  { %v2405_v31 = vpop.eup %2404  ;;  %v91_v32 = vadd.f32 %v2391_v18, %v90_v30 }
  0xa4   :  { %2282 = vmatmul.msk.f32.gmra.mxu1 %vm124_vm1, %v2405_v31  ;;  %2290 = vmatmul.msk.f32.gmra.mxu2 %vm124_vm1, %v2405_v31 }
  0xa5   :  { %2406 = vtanh.f32 %v91_v32 }
  0xaa   :  { %v93_v33 = vpop.f32.mrf.mxu0 }
  0xab   :  { %v2407_v35 = vpop.eup %2406  ;;  %v94_v36 = vadd.f32 %v2391_v18, %v93_v33 }
  0xac   :  { %2283 = vmatmul.msk.f32.gmra.mxu1 %vm124_vm1, %v2407_v35  ;;  %2291 = vmatmul.msk.f32.gmra.mxu2 %vm124_vm1, %v2407_v35  ;;  %v2783_v35 = vld [vmem:[%s3621_s1 + $0x38] sm:$0xff] }
  0xad   :  { %2408 = vtanh.f32 %v94_v36  ;;  %366 = vmatpush.msrb.mxu3 %v2783_v35  ;;  %v2790_v36 = vld [vmem:[%s3623_s2 + $0x5] ss:$0 sm:$0xff] }
  0xae   :  { %2410 = vtanh.f32 %v97_v41 }
  0xaf   :  { %2412 = vtanh.f32 %v100_v45 }
  0xb3   :  { %v2409_v43 = vpop.eup %2408 }
  0xb4   :  { %2284 = vmatmul.msk.f32.gmra.mxu1 %vm124_vm1, %v2409_v43  ;;  %2292 = vmatmul.msk.f32.gmra.mxu2 %vm124_vm1, %v2409_v43  ;;  %v2411_v46 = vpop.eup %2410 }
  0xb5   :  { %v2413_v47 = vpop.eup %2412 }
  0xbc   :  { %2285 = vmatmul.msk.f32.gmra.mxu1 %vm124_vm1, %v2411_v46  ;;  %2293 = vmatmul.msk.f32.gmra.mxu2 %vm124_vm1, %v2411_v46 }
  0xc4   :  { %2286 = vmatmul.msk.f32.gmra.mxu1 %vm124_vm1, %v2413_v47  ;;  %2294 = vmatmul.msk.f32.gmra.mxu2 %vm124_vm1, %v2413_v47 }
  0xcc   :  { %2287 = vmatmul.msk.f32.vlgmr.msra.gmra.mxu1 %vm124_vm1, %v2399_v22 }
  0xcd   :  { %301 = vmatpush.msra.mxu1 %v2691_v48 }
  0xcf   :  { %302 = vmatpush.msra.mxu1 %v2697_v49 }
  0xd1   :  { %303 = vmatpush.msra.mxu1 %v2703_v50 }
  0xd3   :  { %304 = vmatpush.msra.mxu1 %v2709_v51 }
  0xd4   :  { %285 = vmatmul.f32.vlgmr.msrb.gmra.mxu1 %v2542_v39 }
  0xd5   :  { %585 = vmatpush.msrb.mxu1 %v2783_v35 }
  0xdc   :  { %305 = vmatmul.f32.vlgmr.msra.gmra.mxu1 %v2542_v39 }
 0x109   :  { %v166_v54 = vpop.f32.mrf.mxu1 }
 0x10a   :  { %v2718_v55 = vadd.f32 %v166_v54, %v120_v53  ;;  %v2818_v54 = vld [vmem:[%s3621_s1 + $0x80] sm:$0xff] }
 0x111   :  { %v169_v56 = vpop.f32.mrf.mxu1 }
 0x112   :  { %v2720_v57 = vadd.f32 %v169_v56, %v120_v53  ;;  %v2825_v56 = vld [vmem:[%s3621_s1 + $0x20] sm:$0xff] }
 0x117   :  { %v210_v59 = vpop.f32.mrf.mxu2 }
 0x118   :  { %v211_v60 = vadd.f32 %v210_v59, %v121_v58  ;;  %v2839_v59 = vld [vmem:[%s3621_s1 + $0xe8] sm:$0xff] }
 0x119   :  { %v172_v61 = vpop.f32.mrf.mxu1 }
 0x11a   :  { %234 = vst.msk [vmem:[#allocation2 + $0x18] sm:$0xff] %vm124_vm1, %v211_v60  ;;  %v2723_v62 = vadd.f32 %v172_v61, %v120_v53  ;;  %v2845_v60 = vld [vmem:[%s3621_s1 + $0x88] sm:$0xff] }
 0x11b   :  { %v2851_v61 = vld [vmem:[%s3621_s1 + $0x28] sm:$0xff] }
 0x11f   :  { %v213_v63 = vpop.f32.mrf.mxu2 }
 0x120   :  { %v214_v0 = vadd.f32 %v213_v63, %v121_v58  ;;  %v2858_v63 = vld [vmem:[%s3623_s2 + $0x1] ss:$0 sm:$0xff] }
 0x121   :  { %v175_v1 = vpop.f32.mrf.mxu1 }
 0x122   :  { %236 = vst.msk [vmem:[#allocation2 + $0x28] sm:$0xff] %vm124_vm1, %v214_v0  ;;  %v2726_v4 = vadd.f32 %v175_v1, %v120_v53 }
 0x127   :  { %v216_v5 = vpop.f32.mrf.mxu2 }
 0x128   :  { %v217_v6 = vadd.f32 %v216_v5, %v121_v58 }
 0x129   :  { %v178_v8 = vpop.f32.mrf.mxu1 }
 0x12a   :  { %238 = vst.msk [vmem:[#allocation2 + $0x38] sm:$0xff] %vm124_vm1, %v217_v6  ;;  %v2729_v10 = vadd.f32 %v178_v8, %v120_v53 }
 0x12f   :  { %v219_v11 = vpop.f32.mrf.mxu2 }
 0x130   :  { %v220_v12 = vadd.f32 %v219_v11, %v121_v58 }
 0x131   :  { %v181_v13 = vpop.f32.mrf.mxu1 }
 0x132   :  { %240 = vst.msk [vmem:[#allocation2 + $0x48] sm:$0xff] %vm124_vm1, %v220_v12  ;;  %v182_v14 = vadd.f32 %v181_v13, %v120_v53 }
 0x134   :  { %241 = vst [vmem:[#allocation2 + $0x50] sm:$0xff] %v182_v14 }
 0x137   :  { %v222_v15 = vpop.f32.mrf.mxu2 }
 0x138   :  { %v223_v16 = vadd.f32 %v222_v15, %v121_v58 }
 0x139   :  { %v184_v17 = vpop.f32.mrf.mxu1 }
 0x13a   :  { %242 = vst.msk [vmem:[#allocation2 + $0x58] sm:$0xff] %vm124_vm1, %v223_v16  ;;  %v185_v18 = vadd.f32 %v184_v17, %v120_v53  ;;  %v2806_v53 = vld [vmem:[%s3621_s1 + $0x140] sm:$0xff] }
 0x13b   :  { %614 = vmatpush.msra.mxu1 %v2806_v53 }
 0x13c   :  { %243 = vst [vmem:[#allocation2 + $0x60] sm:$0xff] %v185_v18 }
 0x13f   :  { %v225_v22 = vpop.f32.mrf.mxu2 }
 0x140   :  { %v226_v24 = vadd.f32 %v225_v22, %v121_v58 }
 0x141   :  { %v187_v25 = vpop.f32.mrf.mxu1 }
 0x142   :  { %244 = vst.msk [vmem:[#allocation2 + $0x68] sm:$0xff] %vm124_vm1, %v226_v24 }
 0x147   :  { %v228_v26 = vpop.f32.mrf.mxu2 }
 0x148   :  { %v229_v27 = vadd.f32 %v228_v26, %v121_v58 }
 0x149   :  { %v207_v28 = vpop.f32.mrf.mxu1 }
 0x14a   :  { %246 = vst.msk [vmem:[#allocation2 + $0x78] sm:$0xff] %vm124_vm1, %v229_v27  ;;  %v208_v29 = vadd.f32 %v207_v28, %v121_v58  ;;  %v2834_v58 = vld [vmem:[%s3621_s1 + $0x148] sm:$0xff] }
 0x14c   :  { %232 = vst.msk [vmem:[#allocation2 + $0x8] sm:$0xff] %vm124_vm1, %v208_v29 }
 0x151   :  { %v286_v30 = vpop.f32.mrf.mxu1 }
 0x153   :  { %v264_v31 = vld [vmem:[#allocation2 + $0x8] sm:$0xff] }
 0x159   :  { %v2776_v32 = vpop.f32.mrf.mxu1 }
 0x15a   :  { %v309_v33 = vadd.f32 %v2776_v32, %v264_v31 }
 0x15c   :  { %2414 = vtanh.f32 %v309_v33 }
 0x162   :  { %v2415_v34 = vpop.eup %2414 }
 0x163   :  { %2295 = vmatmul.msk.f32.vlgmr.msra.gmra.mxu3 %vm124_vm1, %v2415_v34 }
 0x164   :  { %395 = vmatpush.msra.mxu3 %v2806_v53 }
 0x1e6   :  { %v335_v41 = vpop.f32.mrf.mxu3 }
 0x1e7   :  { %v2793_v43 = vadd.f32 %v2790_v36, %v335_v41 }
 0x1e9   :  { %v338_v44 = vmul.f32 1.442695, %v2793_v43 }
 0x1eb   :  { %2416 = vpow2.f32 %v338_v44 }
 0x1f1   :  { %v2417_v45 = vpop.eup %2416 }
 0x1f2   :  { %v340_v46 = vmul.f32 %v2417_v45, %v2579_v2  ;;  %v2812_v2 = vld [vmem:[%s3621_s1 + $0xe0] sm:$0xff] }
 0x1f3   :  { %396 = vmatpush.msra.mxu3 %v2812_v2  ;;  %615 = vmatpush.msra.mxu1 %v2812_v2 }
 0x1f4   :  { %342 = vrot.lane.b32.xlu0 %v340_v46, %s2543_s26 }
 0x1f5   :  { %397 = vmatpush.msra.mxu3 %v2818_v54  ;;  %616 = vmatpush.msra.mxu1 %v2818_v54 }
 0x1f7   :  { %398 = vmatpush.msra.mxu3 %v2825_v56  ;;  %617 = vmatpush.msra.mxu1 %v2825_v56 }
 0x266   :  { %v343_v47 = vpop.permute.xlu0 %342 }
 0x267   :  { %v2799_v52 = vadd.f32 %v343_v47, %v2793_v43 }
 0x269   :  { %2296 = vmatmul.msk.f32.vlgmr.msrb.gmra.mxu3 %vm347_vm2, %v2799_v52 }
 0x26a   :  { %415 = vmatpush.msrb.mxu3 %v2834_v58 }
 0x26c   :  { %416 = vmatpush.msrb.mxu3 %v2839_v59 }
 0x26e   :  { %417 = vmatpush.msrb.mxu3 %v2845_v60 }
 0x270   :  { %418 = vmatpush.msrb.mxu3 %v2851_v61 }
 0x2ec   :  { %v368_v0 = vpop.f32.mrf.mxu3 }
 0x2ed   :  { %v369_v1 = vadd.f32 %v2858_v63, %v368_v0 }
 0x2ef   :  { %2418 = vtanh.f32 %v369_v1 }
 0x2f5   :  { %v2419_v5 = vpop.eup %2418 }
 0x2f6   :  { %2297 = vmatmul.msk.f32.vlgmr.msra.gmra.mxu3 %vm124_vm1, %v2419_v5 }
 0x2f7   :  { %501 = vmatpush.msra.mxu3 %v2659_v37 }
 0x2f9   :  { %502 = vmatpush.msra.mxu3 %v2664_v38 }
 0x2fb   :  { %503 = vmatpush.msra.mxu3 %v2672_v40 }
 0x2fd   :  { %504 = vmatpush.msra.mxu3 %v2678_v42 }
 0x2fe   :  { %2298 = vmatmul.msk.f32.vlgmr.msrb.gmra.mxu3 %vm124_vm1, %v2419_v5  ;;  %v482_v5 = vld [vmem:[#allocation2 + $0x18] sm:$0xff] }
 0x2ff   :  { %521 = vmatpush.msrb.mxu3 %v2691_v48 }
 0x301   :  { %522 = vmatpush.msrb.mxu3 %v2697_v49 }
 0x303   :  { %523 = vmatpush.msrb.mxu3 %v2703_v50 }
 0x305   :  { %524 = vmatpush.msrb.mxu3 %v2709_v51 }
 0x379   :  { %v400_v6 = vpop.f32.mrf.mxu3 }
 0x37a   :  { %v441_v8 = vadd.f32 %v400_v6, %v2718_v55 }
 0x37c   :  { %v442_v11 = vadd.f32 %v441_v8, %v286_v30 }
 0x37e   :  { %v2299_v12 = vmul.f32 -1.442695, %v442_v11 }
 0x380   :  { %2420 = vpow2.f32 %v2299_v12 }
 0x381   :  { %v2887_v0 = vpop.f32.mrf.mxu3 }
 0x386   :  { %v2421_v13 = vpop.eup %2420 }
 0x387   :  { %v446_v14 = vadd.f32 1.0, %v2421_v13 }
 0x389   :  { %2422 = vrcp.f32 %v446_v14  ;;  %v458_v18 = vand.u32 2147483648, %v446_v14  ;;  %v456_v24 = vand.u32 2147483647, %v446_v14  ;;  %vm452_vm4 = vweird.f32 %v446_v14 }
 0x38b   :  { %v459_v26 = vor.u32 1.1754944e-38, %v458_v18  ;;  %vm457_vm6 = vcmp.eq.f32.partialorder %v456_v24, 8.507059e+37 }
 0x38f   :  { %v2423_v15 = vpop.eup %2422 }
 0x390   :  { %v448_v16 = vmul.f32 %v2423_v15, %v446_v14  ;;  %vm453_vm3 = vweird.f32 %v2423_v15 }
 0x391   :  { %vm454_vm5 = vmor %vm452_vm4, %vm453_vm3 }
 0x392   :  { %v449_v17 = vsub.f32 1.0, %v448_v16 }
 0x394   :  { %v450_v22 = vmul.f32 %v2423_v15, %v449_v17 }
 0x396   :  { %v451_v25 = vadd.f32 %v2423_v15, %v450_v22 }
 0x398   :  { %v455_v27 = vsel %vm454_vm5, %v2423_v15, %v451_v25 }
 0x399   :  { %v460_v55 = vsel %vm457_vm6, %v459_v26, %v455_v27 }
 0x39a   :  { %v462_v28 = vmul.f32 2.0, %v460_v55  ;;  %v464_v33 = vmul.f32 0.0, %v460_v55 }
 0x39c   :  { %v2300_v29 = vadd.f32 -1.0, %v462_v28 }
 0x39e   :  { %466 = vrot.lane.b32.xlu0 %v2300_v29, %s2544_s18 }
 0x410   :  { %v467_v30 = vpop.permute.xlu0 %466 }
 0x411   :  { %v469_v31 = vmul.f32 %v467_v30, %v460_v55 }
 0x413   :  { %471 = vrot.lane.b32.xlu1 %v469_v31, %s2544_s18 }
 0x485   :  { %v472_v34 = vpop.permute.xlu1 %471 }
 0x486   :  { %v2874_v41 = vadd.f32 %v472_v34, %v464_v33 }
 0x488   :  { %2424 = vtanh.f32 %v2874_v41 }
 0x48e   :  { %v2425_v44 = vpop.eup %2424 }
 0x48f   :  { %477 = vrot.lane.b32.xlu1 %v2425_v44, %s2544_s18 }
 0x501   :  { %v478_v45 = vpop.permute.xlu1 %477 }
 0x502   :  { %v480_v46 = vmul.f32 %v478_v45, %v460_v55 }
 0x504   :  { %485 = vrot.lane.b32.xlu2 %v480_v46, %s2545_s19 }
 0x55e   :  { %v486_v47 = vpop.permute.xlu2 %485 }
 0x55f   :  { %652 = vst.msk [vmem:[#allocation3 + $0x8] sm:$0xff] %vm124_vm1, %v486_v47  ;;  %2301 = vmatmul.msk.f32.vlgmr.msra.gmra.mxu3 %vm124_vm1, %v486_v47 }
 0x560   :  { %634 = vmatpush.msra.mxu3 %v2834_v58 }
 0x562   :  { %635 = vmatpush.msra.mxu3 %v2839_v59 }
 0x564   :  { %636 = vmatpush.msra.mxu3 %v2845_v60 }
 0x566   :  { %637 = vmatpush.msra.mxu3 %v2851_v61 }
 0x567   :  { %2302 = vmatmul.msk.f32.vlgmr.msrb.gmra.mxu3 %vm124_vm1, %v486_v47 }
 0x568   :  { %803 = vmatpush.msrb.mxu3 %v2783_v35 }
 0x5e2   :  { %v506_v1 = vpop.f32.mrf.mxu3 }
 0x5ea   :  { %v2889_v6 = vpop.f32.mrf.mxu3 }
 0x5eb   :  { %v529_v8 = vadd.f32 %v2889_v6, %v482_v5 }
 0x5ed   :  { %2426 = vtanh.f32 %v529_v8 }
 0x5f3   :  { %v2427_v11 = vpop.eup %2426 }
 0x5f4   :  { %2303 = vmatmul.msk.f32.vlgmr.msrb.gmra.mxu0 %vm124_vm1, %v2427_v11 }
 0x5f5   :  { %832 = vmatpush.msrb.mxu0 %v2806_v53 }
 0x5f7   :  { %833 = vmatpush.msrb.mxu0 %v2812_v2 }
 0x5f9   :  { %834 = vmatpush.msrb.mxu0 %v2818_v54 }
 0x5fb   :  { %835 = vmatpush.msrb.mxu0 %v2825_v56 }
 0x671   :  { %v555_v12 = vpop.f32.mrf.mxu0 }
 0x672   :  { %v2898_v13 = vadd.f32 %v2790_v36, %v555_v12 }
 0x674   :  { %v558_v14 = vmul.f32 1.442695, %v2898_v13 }
 0x676   :  { %2428 = vpow2.f32 %v558_v14 }
 0x67c   :  { %v2429_v15 = vpop.eup %2428 }
 0x67d   :  { %v560_v16 = vmul.f32 %v2429_v15, %v2586_v3 }
 0x67f   :  { %562 = vrot.lane.b32.xlu2 %v560_v16, %s2543_s26 }
 0x6d9   :  { %v563_v17 = vpop.permute.xlu2 %562 }
 0x6da   :  { %v2904_v18 = vadd.f32 %v563_v17, %v2898_v13 }
 0x6dc   :  { %2304 = vmatmul.msk.f32.vlgmr.msrb.gmra.mxu1 %vm347_vm2, %v2904_v18 }
 0x6dd   :  { %739 = vmatpush.msrb.mxu1 %v2691_v48 }
 0x6df   :  { %740 = vmatpush.msrb.mxu1 %v2697_v49 }
 0x6e1   :  { %741 = vmatpush.msrb.mxu1 %v2703_v50 }
 0x6e3   :  { %742 = vmatpush.msrb.mxu1 %v2709_v51 }
 0x759   :  { %v587_v22 = vpop.f32.mrf.mxu1 }
 0x75a   :  { %v588_v3 = vadd.f32 %v2858_v63, %v587_v22 }
 0x75c   :  { %2430 = vtanh.f32 %v588_v3 }
 0x762   :  { %v2431_v24 = vpop.eup %2430 }
 0x763   :  { %2305 = vmatmul.msk.f32.vlgmr.msra.gmra.mxu1 %vm124_vm1, %v2431_v24  ;;  %2306 = vmatmul.msk.f32.vlgmr.msra.gmra.mxu3 %vm124_vm1, %v2431_v24 }
 0x764   :  { %852 = vmatpush.msra.mxu1 %v2834_v58  ;;  %957 = vmatpush.msra.mxu3 %v2691_v48 }
 0x766   :  { %853 = vmatpush.msra.mxu1 %v2839_v59  ;;  %958 = vmatpush.msra.mxu3 %v2697_v49 }
 0x768   :  { %854 = vmatpush.msra.mxu1 %v2845_v60  ;;  %959 = vmatpush.msra.mxu3 %v2703_v50 }
 0x76a   :  { %855 = vmatpush.msra.mxu1 %v2851_v61  ;;  %960 = vmatpush.msra.mxu3 %v2709_v51 }
 0x7e0   :  { %v619_v25 = vpop.f32.mrf.mxu1 }
 0x7e1   :  { %v659_v26 = vadd.f32 %v619_v25, %v2720_v57 }
 0x7e3   :  { %v660_v27 = vadd.f32 %v659_v26, %v506_v1 }
 0x7e5   :  { %v2307_v55 = vmul.f32 -1.442695, %v660_v27 }
 0x7e7   :  { %2432 = vpow2.f32 %v2307_v55 }
 0x7ed   :  { %v2433_v28 = vpop.eup %2432 }
 0x7ee   :  { %v664_v29 = vadd.f32 1.0, %v2433_v28 }
 0x7f0   :  { %2434 = vrcp.f32 %v664_v29  ;;  %v676_v34 = vand.u32 2147483648, %v664_v29  ;;  %v674_v45 = vand.u32 2147483647, %v664_v29  ;;  %vm670_vm8 = vweird.f32 %v664_v29 }
 0x7f2   :  { %v677_v47 = vor.u32 1.1754944e-38, %v676_v34  ;;  %vm675_vm10 = vcmp.eq.f32.partialorder %v674_v45, 8.507059e+37 }
 0x7f6   :  { %v2435_v30 = vpop.eup %2434 }
 0x7f7   :  { %v666_v31 = vmul.f32 %v2435_v30, %v664_v29  ;;  %vm671_vm7 = vweird.f32 %v2435_v30 }
 0x7f8   :  { %vm672_vm9 = vmor %vm670_vm8, %vm671_vm7 }
 0x7f9   :  { %v667_v33 = vsub.f32 1.0, %v666_v31 }
 0x7fb   :  { %v668_v44 = vmul.f32 %v2435_v30, %v667_v33 }
 0x7fd   :  { %v669_v46 = vadd.f32 %v2435_v30, %v668_v44  ;;  %v2963_v44 = vpop.f32.mrf.mxu3 }
 0x7ff   :  { %v673_v5 = vsel %vm672_vm9, %v2435_v30, %v669_v46 }
 0x800   :  { %v678_v57 = vsel %vm675_vm10, %v677_v47, %v673_v5 }
 0x801   :  { %v680_v1 = vmul.f32 2.0, %v678_v57  ;;  %v682_v14 = vmul.f32 %v678_v57, %v2874_v41  ;;  %v700_v41 = vld [vmem:[#allocation2 + $0x28] sm:$0xff] }
 0x803   :  { %v2308_v8 = vadd.f32 -1.0, %v680_v1 }
 0x805   :  { %684 = vrot.lane.b32.xlu0 %v2308_v8, %s2544_s18 }
 0x877   :  { %v685_v11 = vpop.permute.xlu0 %684 }
 0x878   :  { %v687_v12 = vmul.f32 %v685_v11, %v678_v57 }
 0x87a   :  { %689 = vrot.lane.b32.xlu1 %v687_v12, %s2544_s18 }
 0x8ec   :  { %v690_v15 = vpop.permute.xlu1 %689 }
 0x8ed   :  { %v2927_v16 = vadd.f32 %v690_v15, %v682_v14 }
 0x8ef   :  { %2436 = vtanh.f32 %v2927_v16 }
 0x8f5   :  { %v2437_v17 = vpop.eup %2436 }
 0x8f6   :  { %695 = vrot.lane.b32.xlu2 %v2437_v17, %s2544_s18 }
 0x950   :  { %v696_v22 = vpop.permute.xlu2 %695 }
 0x951   :  { %v698_v3 = vmul.f32 %v696_v22, %v678_v57 }
 0x953   :  { %703 = vrot.lane.b32.xlu0 %v698_v3, %s2545_s19 }
 0x9c5   :  { %v704_v24 = vpop.permute.xlu0 %703 }
 0x9c6   :  { %870 = vst.msk [vmem:[#allocation3 + $0x10] sm:$0xff] %vm124_vm1, %v704_v24  ;;  %2309 = vmatmul.msk.f32.vlgmr.msra.gmra.mxu0 %vm124_vm1, %v704_v24  ;;  %2310 = vmatmul.msk.f32.vlgmr.msrb.gmra.mxu1 %vm124_vm1, %v704_v24 }
 0x9c7   :  { %986 = vmatpush.msra.mxu0 %v2736_v19  ;;  %1021 = vmatpush.msrb.mxu1 %v2783_v35 }
 0x9c9   :  { %987 = vmatpush.msra.mxu0 %v2742_v20 }
 0x9cb   :  { %988 = vmatpush.msra.mxu0 %v2748_v21 }
 0x9cd   :  { %989 = vmatpush.msra.mxu0 %v2756_v23 }
 0xa43   :  { %v2940_v25 = vpop.f32.mrf.mxu1  ;;  %v724_v47 = vpop.f32.mrf.mxu0 }
 0xa44   :  { %v747_v26 = vadd.f32 %v2940_v25, %v700_v41 }
 0xa46   :  { %2438 = vtanh.f32 %v747_v26 }
 0xa4c   :  { %v2439_v27 = vpop.eup %2438 }
 0xa4d   :  { %2311 = vmatmul.msk.f32.vlgmr.msrb.gmra.mxu2 %vm124_vm1, %v2439_v27 }
 0xa4e   :  { %1050 = vmatpush.msrb.mxu2 %v2806_v53 }
 0xa50   :  { %1051 = vmatpush.msrb.mxu2 %v2812_v2 }
 0xa52   :  { %1052 = vmatpush.msrb.mxu2 %v2818_v54 }
 0xa54   :  { %1053 = vmatpush.msrb.mxu2 %v2825_v56 }
 0xad0   :  { %v773_v55 = vpop.f32.mrf.mxu2 }
 0xad1   :  { %v2949_v28 = vadd.f32 %v2790_v36, %v773_v55 }
 0xad3   :  { %v776_v29 = vmul.f32 1.442695, %v2949_v28 }
 0xad5   :  { %2440 = vpow2.f32 %v776_v29 }
 0xadb   :  { %v2441_v30 = vpop.eup %2440 }
 0xadc   :  { %v778_v31 = vmul.f32 %v2441_v30, %v2603_v7 }
 0xade   :  { %780 = vrot.lane.b32.xlu1 %v778_v31, %s2543_s26 }
 0xb50   :  { %v781_v33 = vpop.permute.xlu1 %780 }
 0xb51   :  { %v2955_v34 = vadd.f32 %v781_v33, %v2949_v28 }
 0xb53   :  { %2312 = vmatmul.msk.f32.vlgmr.msrb.gmra.mxu3 %vm347_vm2, %v2955_v34 }
 0xb54   :  { %1070 = vmatpush.msrb.mxu3 %v2834_v58 }
 0xb56   :  { %1071 = vmatpush.msrb.mxu3 %v2839_v59 }
 0xb58   :  { %1072 = vmatpush.msrb.mxu3 %v2845_v60 }
 0xb5a   :  { %1073 = vmatpush.msrb.mxu3 %v2851_v61 }
 0xbd6   :  { %v805_v7 = vpop.f32.mrf.mxu3 }
 0xbd7   :  { %v806_v45 = vadd.f32 %v2858_v63, %v805_v7 }
 0xbd9   :  { %2442 = vtanh.f32 %v806_v45 }
 0xbdf   :  { %v2443_v46 = vpop.eup %2442 }
 0xbe0   :  { %2313 = vmatmul.msk.f32.vlgmr.msrb.gmra.mxu0 %vm124_vm1, %v2443_v46  ;;  %2314 = vmatmul.msk.f32.vlgmr.msra.gmra.mxu1 %vm124_vm1, %v2443_v46 }
 0xbe1   :  { %1175 = vmatpush.msra.mxu1 %v2691_v48  ;;  %1155 = vmatpush.msrb.mxu0 %v2659_v37 }
 0xbe3   :  { %1176 = vmatpush.msra.mxu1 %v2697_v49  ;;  %1156 = vmatpush.msrb.mxu0 %v2664_v38 }
 0xbe5   :  { %1177 = vmatpush.msra.mxu1 %v2703_v50  ;;  %1157 = vmatpush.msrb.mxu0 %v2672_v40 }
 0xbe7   :  { %1178 = vmatpush.msra.mxu1 %v2709_v51  ;;  %1158 = vmatpush.msrb.mxu0 %v2678_v42 }
 0xc5d   :  { %v837_v5 = vpop.f32.mrf.mxu0 }
 0xc5e   :  { %v877_v57 = vadd.f32 %v837_v5, %v2723_v62 }
 0xc60   :  { %v878_v1 = vadd.f32 %v877_v57, %v724_v47 }
 0xc62   :  { %v2315_v8 = vmul.f32 -1.442695, %v878_v1 }
 0xc64   :  { %2444 = vpow2.f32 %v2315_v8 }
 0xc6a   :  { %v2445_v11 = vpop.eup %2444 }
 0xc6b   :  { %v882_v12 = vadd.f32 1.0, %v2445_v11 }
 0xc6d   :  { %2446 = vrcp.f32 %v882_v12  ;;  %v894_v22 = vand.u32 2147483648, %v882_v12  ;;  %v892_v24 = vand.u32 2147483647, %v882_v12  ;;  %vm888_vm12 = vweird.f32 %v882_v12 }
 0xc6f   :  { %v895_v26 = vor.u32 1.1754944e-38, %v894_v22  ;;  %vm893_vm14 = vcmp.eq.f32.partialorder %v892_v24, 8.507059e+37 }
 0xc73   :  { %v2447_v14 = vpop.eup %2446 }
 0xc74   :  { %v884_v15 = vmul.f32 %v2447_v14, %v882_v12  ;;  %vm889_vm11 = vweird.f32 %v2447_v14 }
 0xc75   :  { %vm890_vm13 = vmor %vm888_vm12, %vm889_vm11 }
 0xc76   :  { %v885_v17 = vsub.f32 1.0, %v884_v15 }
 0xc78   :  { %v886_v3 = vmul.f32 %v2447_v14, %v885_v17 }
 0xc7a   :  { %v887_v41 = vadd.f32 %v2447_v14, %v886_v3 }
 0xc7c   :  { %v891_v27 = vsel %vm890_vm13, %v2447_v14, %v887_v41  ;;  %v3016_v41 = vpop.f32.mrf.mxu1 }
 0xc7d   :  { %v896_v62 = vsel %vm893_vm14, %v895_v26, %v891_v27 }
 0xc7e   :  { %v898_v55 = vmul.f32 2.0, %v896_v62  ;;  %v900_v33 = vmul.f32 %v896_v62, %v2927_v16  ;;  %v918_v16 = vld [vmem:[#allocation2 + $0x38] sm:$0xff] }
 0xc80   :  { %v2316_v29 = vadd.f32 -1.0, %v898_v55 }
 0xc82   :  { %902 = vrot.lane.b32.xlu2 %v2316_v29, %s2544_s18 }
 0xcdc   :  { %v903_v30 = vpop.permute.xlu2 %902 }
 0xcdd   :  { %v905_v31 = vmul.f32 %v903_v30, %v896_v62 }
 0xcdf   :  { %907 = vrot.lane.b32.xlu0 %v905_v31, %s2544_s18 }
 0xd51   :  { %v908_v7 = vpop.permute.xlu0 %907 }
 0xd52   :  { %v2980_v45 = vadd.f32 %v908_v7, %v900_v33 }
 0xd54   :  { %2448 = vtanh.f32 %v2980_v45 }
 0xd5a   :  { %v2449_v46 = vpop.eup %2448 }
 0xd5b   :  { %913 = vrot.lane.b32.xlu1 %v2449_v46, %s2544_s18 }
 0xdcd   :  { %v914_v47 = vpop.permute.xlu1 %913 }
 0xdce   :  { %v916_v5 = vmul.f32 %v914_v47, %v896_v62 }
 0xdd0   :  { %921 = vrot.lane.b32.xlu2 %v916_v5, %s2545_s19 }
 0xe2a   :  { %v922_v57 = vpop.permute.xlu2 %921 }
 0xe2b   :  { %1088 = vst.msk [vmem:[#allocation3 + $0x18] sm:$0xff] %vm124_vm1, %v922_v57  ;;  %2317 = vmatmul.msk.f32.vlgmr.msra.gmra.mxu2 %vm124_vm1, %v922_v57  ;;  %2318 = vmatmul.msk.f32.vlgmr.msra.gmra.mxu3 %vm124_vm1, %v922_v57 }
 0xe2c   :  { %1204 = vmatpush.msra.mxu2 %v2736_v19  ;;  %1239 = vmatpush.msra.mxu3 %v2783_v35 }
 0xe2e   :  { %1205 = vmatpush.msra.mxu2 %v2742_v20 }
 0xe30   :  { %1206 = vmatpush.msra.mxu2 %v2748_v21 }
 0xe32   :  { %1207 = vmatpush.msra.mxu2 %v2756_v23  ;;  %v3268_v39 = vld [vmem:[#allocation3 + $0x18] sm:$0xff] }
 0xeae   :  { %v2993_v1 = vpop.f32.mrf.mxu3  ;;  %v942_v62 = vpop.f32.mrf.mxu2 }
 0xeaf   :  { %v965_v8 = vadd.f32 %v2993_v1, %v918_v16 }
 0xeb1   :  { %2450 = vtanh.f32 %v965_v8 }
 0xeb7   :  { %v2451_v11 = vpop.eup %2450 }
 0xeb8   :  { %2319 = vmatmul.msk.f32.vlgmr.msra.gmra.mxu0 %vm124_vm1, %v2451_v11 }
 0xeb9   :  { %1268 = vmatpush.msra.mxu0 %v2806_v53 }
 0xebb   :  { %1269 = vmatpush.msra.mxu0 %v2812_v2 }
 0xebd   :  { %1270 = vmatpush.msra.mxu0 %v2818_v54 }
 0xebf   :  { %1271 = vmatpush.msra.mxu0 %v2825_v56 }
 0xf35   :  { %v991_v12 = vpop.f32.mrf.mxu0 }
 0xf36   :  { %v3002_v14 = vadd.f32 %v2790_v36, %v991_v12 }
 0xf38   :  { %v994_v15 = vmul.f32 1.442695, %v3002_v14 }
 0xf3a   :  { %2452 = vpow2.f32 %v994_v15 }
 0xf40   :  { %v2453_v17 = vpop.eup %2452 }
 0xf41   :  { %v996_v22 = vmul.f32 %v2453_v17, %v2614_v9 }
 0xf43   :  { %998 = vrot.lane.b32.xlu0 %v996_v22, %s2543_s26 }
 0xfb5   :  { %v999_v3 = vpop.permute.xlu0 %998 }
 0xfb6   :  { %v3008_v24 = vadd.f32 %v999_v3, %v3002_v14 }
 0xfb8   :  { %2320 = vmatmul.msk.f32.vlgmr.msrb.gmra.mxu1 %vm347_vm2, %v3008_v24 }
 0xfb9   :  { %1288 = vmatpush.msrb.mxu1 %v2834_v58 }
 0xfbb   :  { %1289 = vmatpush.msrb.mxu1 %v2839_v59 }
 0xfbd   :  { %1290 = vmatpush.msrb.mxu1 %v2845_v60 }
 0xfbf   :  { %1291 = vmatpush.msrb.mxu1 %v2851_v61 }
0x1035   :  { %v1023_v9 = vpop.f32.mrf.mxu1 }
0x1036   :  { %v1024_v26 = vadd.f32 %v2858_v63, %v1023_v9 }
0x1038   :  { %2454 = vtanh.f32 %v1024_v26 }
0x103e   :  { %v2455_v27 = vpop.eup %2454 }
0x103f   :  { %2321 = vmatmul.msk.f32.vlgmr.msrb.gmra.mxu2 %vm124_vm1, %v2455_v27  ;;  %2322 = vmatmul.msk.f32.vlgmr.msrb.gmra.mxu3 %vm124_vm1, %v2455_v27 }
0x1040   :  { %1393 = vmatpush.msrb.mxu3 %v2691_v48  ;;  %1373 = vmatpush.msrb.mxu2 %v2659_v37 }
0x1042   :  { %1394 = vmatpush.msrb.mxu3 %v2697_v49  ;;  %1374 = vmatpush.msrb.mxu2 %v2664_v38 }
0x1044   :  { %1395 = vmatpush.msrb.mxu3 %v2703_v50  ;;  %1375 = vmatpush.msrb.mxu2 %v2672_v40 }
0x1046   :  { %1396 = vmatpush.msrb.mxu3 %v2709_v51  ;;  %1376 = vmatpush.msrb.mxu2 %v2678_v42 }
0x10c2   :  { %v1055_v55 = vpop.f32.mrf.mxu2 }
0x10c3   :  { %v1095_v29 = vadd.f32 %v1055_v55, %v2726_v4 }
0x10c5   :  { %v1096_v30 = vadd.f32 %v1095_v29, %v942_v62 }
0x10c7   :  { %v2323_v31 = vmul.f32 -1.442695, %v1096_v30 }
0x10c9   :  { %2456 = vpow2.f32 %v2323_v31 }
0x10cf   :  { %v2457_v33 = vpop.eup %2456 }
0x10d0   :  { %v1100_v7 = vadd.f32 1.0, %v2457_v33 }
0x10d2   :  { %2458 = vrcp.f32 %v1100_v7  ;;  %v1112_v57 = vand.u32 2147483648, %v1100_v7  ;;  %v1110_v8 = vand.u32 2147483647, %v1100_v7  ;;  %vm1106_vm3 = vweird.f32 %v1100_v7 }
0x10d4   :  { %v1113_v12 = vor.u32 1.1754944e-38, %v1112_v57  ;;  %vm1111_vm5 = vcmp.eq.f32.partialorder %v1110_v8, 8.507059e+37 }
0x10d8   :  { %v2459_v46 = vpop.eup %2458 }
0x10d9   :  { %v1102_v47 = vmul.f32 %v2459_v46, %v1100_v7  ;;  %vm1107_vm15 = vweird.f32 %v2459_v46 }
0x10da   :  { %vm1108_vm4 = vmor %vm1106_vm3, %vm1107_vm15 }
0x10db   :  { %v1103_v5 = vsub.f32 1.0, %v1102_v47 }
0x10dd   :  { %v1104_v16 = vmul.f32 %v2459_v46, %v1103_v5 }
0x10df   :  { %v1105_v11 = vadd.f32 %v2459_v46, %v1104_v16 }
0x10e1   :  { %v1109_v15 = vsel %vm1108_vm4, %v2459_v46, %v1105_v11 }
0x10e2   :  { %v1114_v4 = vsel %vm1111_vm5, %v1113_v12, %v1109_v15  ;;  %vm427_vm5 = vcmask 261248  }
0x10e3   :  { %v1116_v17 = vmul.f32 2.0, %v1114_v4  ;;  %v1118_v26 = vmul.f32 %v1114_v4, %v2980_v45  ;;  %v1136_v45 = vld [vmem:[#allocation2 + $0x48] sm:$0xff] }
0x10e5   :  { %v2324_v22 = vadd.f32 -1.0, %v1116_v17 }
0x10e7   :  { %1120 = vrot.lane.b32.xlu1 %v2324_v22, %s2544_s18 }
0x1159   :  { %v1121_v3 = vpop.permute.xlu1 %1120 }
0x115a   :  { %v1123_v9 = vmul.f32 %v1121_v3, %v1114_v4 }
0x115c   :  { %1125 = vrot.lane.b32.xlu2 %v1123_v9, %s2544_s18 }
0x11b6   :  { %v1126_v27 = vpop.permute.xlu2 %1125 }
0x11b7   :  { %v3033_v62 = vadd.f32 %v1126_v27, %v1118_v26 }
0x11b9   :  { %2460 = vtanh.f32 %v3033_v62 }
0x11bf   :  { %v2461_v55 = vpop.eup %2460 }
0x11c0   :  { %1131 = vrot.lane.b32.xlu0 %v2461_v55, %s2544_s18 }
0x1232   :  { %v1132_v29 = vpop.permute.xlu0 %1131 }
0x1233   :  { %v1134_v30 = vmul.f32 %v1132_v29, %v1114_v4 }
0x1235   :  { %1139 = vrot.lane.b32.xlu1 %v1134_v30, %s2545_s19 }
0x12a7   :  { %v1140_v31 = vpop.permute.xlu1 %1139 }
0x12a8   :  { %1306 = vst.msk [vmem:[#allocation3 + $0x20] sm:$0xff] %vm124_vm1, %v1140_v31  ;;  %2325 = vmatmul.msk.f32.vlgmr.msrb.gmra.mxu0 %vm124_vm1, %v1140_v31  ;;  %2326 = vmatmul.msk.f32.vlgmr.msra.gmra.mxu1 %vm124_vm1, %v1140_v31 }
0x12a9   :  { %1422 = vmatpush.msrb.mxu0 %v2736_v19  ;;  %1457 = vmatpush.msra.mxu1 %v2783_v35 }
0x12ab   :  { %1423 = vmatpush.msrb.mxu0 %v2742_v20 }
0x12ad   :  { %1424 = vmatpush.msrb.mxu0 %v2748_v21 }
0x12af   :  { %1425 = vmatpush.msrb.mxu0 %v2756_v23  ;;  %v1137_v23 = vld [vmem:[%s3622_s0 + $0x20] sm:$0xff] }
0x1325   :  { %v3046_v33 = vpop.f32.mrf.mxu1 }
0x1326   :  { %v1183_v7 = vadd.f32 %v3046_v33, %v1136_v45 }
0x1328   :  { %2462 = vtanh.f32 %v1183_v7 }
0x132e   :  { %v2463_v46 = vpop.eup %2462 }
0x132f   :  { %2327 = vmatmul.msk.f32.vlgmr.msra.gmra.mxu2 %vm124_vm1, %v2463_v46 }
0x1330   :  { %1486 = vmatpush.msra.mxu2 %v2806_v53 }
0x1332   :  { %1487 = vmatpush.msra.mxu2 %v2812_v2 }
0x1334   :  { %1488 = vmatpush.msra.mxu2 %v2818_v54  ;;  %v3071_v54 = vpop.f32.mrf.mxu3 }
0x1336   :  { %1489 = vmatpush.msra.mxu2 %v2825_v56 }
0x13b2   :  { %v1209_v19 = vpop.f32.mrf.mxu2 }
0x13b3   :  { %v3055_v20 = vadd.f32 %v2790_v36, %v1209_v19 }
0x13b5   :  { %v1212_v21 = vmul.f32 1.442695, %v3055_v20 }
0x13b7   :  { %2464 = vpow2.f32 %v1212_v21 }
0x13bd   :  { %v2465_v35 = vpop.eup %2464 }
0x13be   :  { %v1214_v47 = vmul.f32 %v2465_v35, %v1137_v23  ;;  %v1355_v23 = vld [vmem:[%s3622_s0 + $0x28] sm:$0xff] }
0x13c0   :  { %1216 = vrot.lane.b32.xlu2 %v1214_v47, %s2543_s26 }
0x141a   :  { %v1217_v53 = vpop.permute.xlu2 %1216 }
0x141b   :  { %v3063_v2 = vadd.f32 %v1217_v53, %v3055_v20 }
0x141d   :  { %2328 = vmatmul.msk.f32.vlgmr.msra.gmra.mxu3 %vm347_vm2, %v3063_v2 }
0x141e   :  { %1506 = vmatpush.msra.mxu3 %v2834_v58  ;;  %v1160_v58 = vpop.f32.mrf.mxu0 }
0x1420   :  { %1507 = vmatpush.msra.mxu3 %v2839_v59 }
0x1422   :  { %1508 = vmatpush.msra.mxu3 %v2845_v60 }
0x1424   :  { %1509 = vmatpush.msra.mxu3 %v2851_v61 }
0x14a0   :  { %v1241_v56 = vpop.f32.mrf.mxu3 }
0x14a1   :  { %v1242_v5 = vadd.f32 %v2858_v63, %v1241_v56 }
0x14a3   :  { %2466 = vtanh.f32 %v1242_v5 }
0x14a9   :  { %v2467_v57 = vpop.eup %2466 }
0x14aa   :  { %2329 = vmatmul.msk.f32.vlgmr.msra.gmra.mxu0 %vm124_vm1, %v2467_v57  ;;  %2330 = vmatmul.msk.f32.vlgmr.msrb.gmra.mxu1 %vm124_vm1, %v2467_v57 }
0x14ab   :  { %1611 = vmatpush.msrb.mxu1 %v2691_v48  ;;  %1591 = vmatpush.msra.mxu0 %v2659_v37 }
0x14ad   :  { %1612 = vmatpush.msrb.mxu1 %v2697_v49  ;;  %1592 = vmatpush.msra.mxu0 %v2664_v38 }
0x14af   :  { %1613 = vmatpush.msrb.mxu1 %v2703_v50  ;;  %1593 = vmatpush.msra.mxu0 %v2672_v40 }
0x14b1   :  { %1614 = vmatpush.msrb.mxu1 %v2709_v51  ;;  %1594 = vmatpush.msra.mxu0 %v2678_v42 }
0x1527   :  { %v1273_v59 = vpop.f32.mrf.mxu0 }
0x1528   :  { %v1313_v60 = vadd.f32 %v1273_v59, %v2729_v10 }
0x152a   :  { %v1314_v61 = vadd.f32 %v1313_v60, %v1160_v58  ;;  %v1353_v60 = vld [vmem:[#allocation2 + $0x50] sm:$0xff] }
0x152c   :  { %v2331_v48 = vmul.f32 -1.442695, %v1314_v61 }
0x152e   :  { %2468 = vpow2.f32 %v2331_v48 }
0x1534   :  { %v2469_v37 = vpop.eup %2468 }
0x1535   :  { %v1318_v16 = vadd.f32 1.0, %v2469_v37 }
0x1537   :  { %2470 = vrcp.f32 %v1318_v16  ;;  %v1330_v50 = vand.u32 2147483648, %v1318_v16  ;;  %v1328_v40 = vand.u32 2147483647, %v1318_v16  ;;  %vm1324_vm7 = vweird.f32 %v1318_v16 }
0x1539   :  { %v1331_v42 = vor.u32 1.1754944e-38, %v1330_v50  ;;  %vm1329_vm9 = vcmp.eq.f32.partialorder %v1328_v40, 8.507059e+37 }
0x153d   :  { %v2471_v49 = vpop.eup %2470 }
0x153e   :  { %v1320_v38 = vmul.f32 %v2471_v49, %v1318_v16  ;;  %vm1325_vm6 = vweird.f32 %v2471_v49 }
0x153f   :  { %vm1326_vm8 = vmor %vm1324_vm7, %vm1325_vm6  ;;  %vm432_vm6 = vcmask 326912   ;;  %vm2258_vm7 = vcmask 720448  }
0x1540   :  { %v1321_v8 = vsub.f32 1.0, %v1320_v38 }
0x1542   :  { %v1322_v11 = vmul.f32 %v2471_v49, %v1321_v8 }
0x1544   :  { %v1323_v51 = vadd.f32 %v2471_v49, %v1322_v11 }
0x1546   :  { %v1327_v12 = vsel %vm1326_vm8, %v2471_v49, %v1323_v51 }
0x1547   :  { %v1332_v10 = vsel %vm1329_vm9, %v1331_v42, %v1327_v12 }
0x1548   :  { %v1334_v15 = vmul.f32 2.0, %v1332_v10  ;;  %v1336_v3 = vmul.f32 %v1332_v10, %v3033_v62  ;;  %v1354_v62 = vld [vmem:[#allocation2 + $0x58] sm:$0xff] }
0x154a   :  { %v2332_v4 = vadd.f32 -1.0, %v1334_v15 }
0x154c   :  { %1338 = vrot.lane.b32.xlu0 %v2332_v4, %s2544_s18 }
0x15be   :  { %v1339_v17 = vpop.permute.xlu0 %1338 }
0x15bf   :  { %v1341_v22 = vmul.f32 %v1339_v17, %v1332_v10 }
0x15c1   :  { %1343 = vrot.lane.b32.xlu1 %v1341_v22, %s2544_s18 }
0x1633   :  { %v1344_v9 = vpop.permute.xlu1 %1343 }
0x1634   :  { %v3088_v26 = vadd.f32 %v1344_v9, %v1336_v3 }
0x1636   :  { %2472 = vtanh.f32 %v3088_v26 }
0x163c   :  { %v2473_v27 = vpop.eup %2472 }
0x163d   :  { %1349 = vrot.lane.b32.xlu2 %v2473_v27, %s2544_s18 }
0x1697   :  { %v1350_v55 = vpop.permute.xlu2 %1349 }
0x1698   :  { %v1352_v29 = vmul.f32 %v1350_v55, %v1332_v10 }
0x169a   :  { %1357 = vrot.lane.b32.xlu0 %v1352_v29, %s2545_s19 }
0x170c   :  { %v1358_v30 = vpop.permute.xlu0 %1357 }
0x170d   :  { %1524 = vst.msk [vmem:[#allocation3 + $0x28] sm:$0xff] %vm124_vm1, %v1358_v30  ;;  %2333 = vmatmul.msk.f32.vlgmr.msrb.gmra.mxu2 %vm124_vm1, %v1358_v30  ;;  %2334 = vmatmul.msk.f32.vlgmr.msrb.gmra.mxu3 %vm124_vm1, %v1358_v30 }
0x1790   :  { %v3096_v31 = vpop.f32.mrf.mxu3  ;;  %v1378_v59 = vpop.f32.mrf.mxu2 }
0x1791   :  { %v1401_v45 = vadd.f32 %v3096_v31, %v1354_v62 }
0x1793   :  { %2474 = vtanh.f32 %v1401_v45 }
0x1799   :  { %v2475_v7 = vpop.eup %2474 }
0x179a   :  { %2335 = vmatmul.msk.f32.vlgmr.msrb.gmra.mxu0 %vm124_vm1, %v2475_v7  ;;  %v1623_v7 = vld [vmem:[%s3621_s1 + $0x100] sm:$0xff] }
0x1817   :  { %v1427_v46 = vpop.f32.mrf.mxu0 }
0x1818   :  { %v3101_v19 = vadd.f32 %v2790_v36, %v1427_v46  ;;  %v3113_v36 = vpop.f32.mrf.mxu1  ;;  %v1622_v46 = vld [vmem:[%s3621_s1 + $0xa0] sm:$0xff] }
0x181a   :  { %v1430_v21 = vmul.f32 1.442695, %v3101_v19 }
0x181c   :  { %2476 = vpow2.f32 %v1430_v21  ;;  %v1621_v21 = vld [vmem:[%s3621_s1 + $0x40] sm:$0xff] }
0x1822   :  { %v2477_v35 = vpop.eup %2476 }
0x1823   :  { %v1432_v47 = vmul.f32 %v2477_v35, %v1355_v23  ;;  %v2536_v23 = vld [vmem:[%s3621_s1 + $0x128] sm:$0xff] }
0x1824   :  { %v2537_v35 = vld [vmem:[%s3621_s1 + $0xc8] sm:$0xff] }
0x1825   :  { %1434 = vrot.lane.b32.xlu1 %v1432_v47, %s2543_s26  ;;  %v2538_v47 = vld [vmem:[%s3621_s1 + $0x68] sm:$0xff] }
0x1897   :  { %v1435_v53 = vpop.permute.xlu1 %1434 }
0x1898   :  { %v3109_v56 = vadd.f32 %v1435_v53, %v3101_v19  ;;  %v2539_v53 = vld [vmem:[%s3621_s1 + $0x8] sm:$0xff] }
0x189a   :  { %2336 = vmatmul.msk.f32.vlgmr.msra.gmra.mxu1 %vm347_vm2, %v3109_v56 }
0x1917   :  { %v1459_v5 = vpop.f32.mrf.mxu1 }
0x1918   :  { %v1460_v57 = vadd.f32 %v2858_v63, %v1459_v5  ;;  %v1572_v5 = vld [vmem:[#allocation2 + $0x68] sm:$0xff] }
0x191a   :  { %2478 = vtanh.f32 %v1460_v57 }
0x1920   :  { %v2479_v58 = vpop.eup %2478 }
0x1921   :  { %2337 = vmatmul.msk.f32.vlgmr.msra.gmra.mxu2 %vm124_vm1, %v2479_v58  ;;  %2338 = vmatmul.msk.f32.vlgmr.msra.gmra.mxu3 %vm124_vm1, %v2479_v58 }
0x19a4   :  { %v1491_v61 = vpop.f32.mrf.mxu2 }
0x19a5   :  { %v1531_v48 = vadd.f32 %v1491_v61, %v1353_v60  ;;  %v1656_v60 = vld [vmem:[%s3621_s1 + $0x38] sm:$0xff] }
0x19a6   :  { %1675 = vmatpush.msrb.mxu3 %v1656_v60 }
0x19a7   :  { %v1532_v37 = vadd.f32 %v1531_v48, %v1378_v59  ;;  %v3163_v48 = vld [vmem:[%s3623_s2 + $0x5] ss:$0 sm:$0xff] }
0x19a9   :  { %v2339_v16 = vmul.f32 -1.442695, %v1532_v37 }
0x19ab   :  { %2480 = vpow2.f32 %v2339_v16 }
0x19b1   :  { %v2481_v49 = vpop.eup %2480 }
0x19b2   :  { %v1536_v38 = vadd.f32 1.0, %v2481_v49  ;;  %v1573_v49 = vld [vmem:[%s3622_s0 + $0x30] sm:$0xff] }
0x19b4   :  { %2482 = vrcp.f32 %v1536_v38  ;;  %v1548_v63 = vand.u32 2147483648, %v1536_v38  ;;  %v1546_v51 = vand.u32 2147483647, %v1536_v38  ;;  %vm1542_vm11 = vweird.f32 %v1536_v38 }
0x19b6   :  { %v1549_v12 = vor.u32 1.1754944e-38, %v1548_v63  ;;  %vm1547_vm13 = vcmp.eq.f32.partialorder %v1546_v51, 8.507059e+37  ;;  %v1687_v63 = vld [vmem:[%s3621_s1 + $0x140] sm:$0xff] }
0x19b7   :  { %1704 = vmatpush.msrb.mxu0 %v1687_v63  ;;  %v1685_v51 = vld [vmem:[%s3621_s1 + $0xe0] sm:$0xff] }
0x19b9   :  { %1705 = vmatpush.msrb.mxu0 %v1685_v51 }
0x19ba   :  { %v2483_v8 = vpop.eup %2482 }
0x19bb   :  { %v1538_v50 = vmul.f32 %v2483_v8, %v1536_v38  ;;  %vm1543_vm10 = vweird.f32 %v2483_v8 }
0x19bc   :  { %vm1544_vm12 = vmor %vm1542_vm11, %vm1543_vm10 }
0x19bd   :  { %v1539_v11 = vsub.f32 1.0, %v1538_v50 }
0x19bf   :  { %v1540_v40 = vmul.f32 %v2483_v8, %v1539_v11 }
0x19c1   :  { %v1541_v42 = vadd.f32 %v2483_v8, %v1540_v40  ;;  %v1688_v40 = vld [vmem:[%s3621_s1 + $0x148] sm:$0xff] }
0x19c2   :  { %1724 = vmatpush.msra.mxu1 %v1688_v40 }
0x19c3   :  { %v1545_v10 = vsel %vm1544_vm12, %v2483_v8, %v1541_v42  ;;  %v1686_v42 = vld [vmem:[%s3621_s1 + $0xe8] sm:$0xff] }
0x19c4   :  { %v1550_v15 = vsel %vm1547_vm13, %v1549_v12, %v1545_v10  ;;  %v1683_v12 = vld [vmem:[%s3621_s1 + $0x80] sm:$0xff]  ;;  %v1684_v10 = vld [vmem:[%s3621_s1 + $0x88] sm:$0xff]  ;;  %1725 = vmatpush.msra.mxu1 %v1686_v42 }
0x19c5   :  { %v1552_v4 = vmul.f32 2.0, %v1550_v15  ;;  %v1554_v9 = vmul.f32 %v1550_v15, %v3088_v26  ;;  %v1624_v26 = vld [vmem:[%s3621_s1 + $0x160] sm:$0xff]  ;;  %1706 = vmatpush.msrb.mxu0 %v1683_v12 }
0x19c6   :  { %1640 = vmatpush.msrb.mxu2 %v1624_v26  ;;  %1837 = vmatpush.msra.mxu3 %v1624_v26 }
0x19c7   :  { %v2340_v17 = vadd.f32 -1.0, %v1552_v4  ;;  %v1682_v4 = vld [vmem:[%s3621_s1 + $0x28] sm:$0xff]  ;;  %1726 = vmatpush.msra.mxu1 %v1684_v10 }
0x19c8   :  { %1641 = vmatpush.msrb.mxu2 %v1623_v7  ;;  %1838 = vmatpush.msra.mxu3 %v1623_v7 }
0x19c9   :  { %1556 = vrot.lane.b32.xlu2 %v2340_v17, %s2544_s18  ;;  %1727 = vmatpush.msra.mxu1 %v1682_v4  ;;  %v3202_v17 = vpop.f32.mrf.mxu3 }
0x19ca   :  { %1642 = vmatpush.msrb.mxu2 %v1622_v46  ;;  %1839 = vmatpush.msra.mxu3 %v1622_v46 }
0x19cc   :  { %1643 = vmatpush.msrb.mxu2 %v1621_v21  ;;  %1840 = vmatpush.msra.mxu3 %v1621_v21 }
0x19ce   :  { %1808 = vmatpush.msra.mxu2 %v2536_v23 }
0x19d0   :  { %1809 = vmatpush.msra.mxu2 %v2537_v35 }
0x19d2   :  { %1810 = vmatpush.msra.mxu2 %v2538_v47 }
0x19d4   :  { %1811 = vmatpush.msra.mxu2 %v2539_v53 }
0x1a23   :  { %v1557_v22 = vpop.permute.xlu2 %1556 }
0x1a24   :  { %v1559_v3 = vmul.f32 %v1557_v22, %v1550_v15 }
0x1a26   :  { %1561 = vrot.lane.b32.xlu0 %v1559_v3, %s2544_s18  ;;  %v3207_v3 = vld [vmem:[%s3623_s2 + $0x1] ss:$0 sm:$0xff] }
0x1a98   :  { %v1562_v27 = vpop.permute.xlu0 %1561 }
0x1a99   :  { %v3121_v55 = vadd.f32 %v1562_v27, %v1554_v9 }
0x1a9b   :  { %2484 = vtanh.f32 %v3121_v55 }
0x1aa1   :  { %v2485_v29 = vpop.eup %2484 }
0x1aa2   :  { %1567 = vrot.lane.b32.xlu1 %v2485_v29, %s2544_s18 }
0x1b14   :  { %v1568_v30 = vpop.permute.xlu1 %1567 }
0x1b15   :  { %v1570_v62 = vmul.f32 %v1568_v30, %v1550_v15  ;;  %v1681_v15 = vld [vmem:[%s3621_s1 + $0x20] sm:$0xff] }
0x1b16   :  { %1707 = vmatpush.msrb.mxu0 %v1681_v15  ;;  %v1571_v30 = vld [vmem:[#allocation2 + $0x60] sm:$0xff] }
0x1b17   :  { %1575 = vrot.lane.b32.xlu2 %v1570_v62, %s2545_s19 }
0x1b71   :  { %v1576_v45 = vpop.permute.xlu2 %1575 }
0x1b72   :  { %1742 = vst.msk [vmem:[#allocation3 + $0x30] sm:$0xff] %vm124_vm1, %v1576_v45  ;;  %2341 = vmatmul.msk.f32.vlgmr.msra.gmra.mxu0 %vm124_vm1, %v1576_v45  ;;  %2342 = vmatmul.msk.f32.vlgmr.msrb.gmra.mxu1 %vm124_vm1, %v1576_v45 }
0x1b73   :  { %1872 = vmatpush.msra.mxu0 %v1656_v60  ;;  %1897 = vmatpush.msrb.mxu1 %v1688_v40 }
0x1b75   :  { %1898 = vmatpush.msrb.mxu1 %v1686_v42 }
0x1b77   :  { %1899 = vmatpush.msrb.mxu1 %v1684_v10 }
0x1b79   :  { %1900 = vmatpush.msrb.mxu1 %v1682_v4  ;;  %v1952_v4 = vld [vmem:[%s3621_s1 + $0x108] sm:$0xff] }
0x1bef   :  { %v3153_v57 = vpop.f32.mrf.mxu1  ;;  %v1596_v29 = vpop.f32.mrf.mxu0 }
0x1bf0   :  { %v1619_v58 = vadd.f32 %v3153_v57, %v1572_v5 }
0x1bf2   :  { %2486 = vtanh.f32 %v1619_v58 }
0x1bf8   :  { %v2487_v59 = vpop.eup %2486 }
0x1bf9   :  { %2343 = vmatmul.msk.f32.vlgmr.msrb.gmra.mxu2 %vm124_vm1, %v2487_v59 }
0x1c7c   :  { %v1645_v61 = vpop.f32.mrf.mxu2 }
0x1c7d   :  { %v3166_v37 = vadd.f32 %v3163_v48, %v1645_v61 }
0x1c7f   :  { %v1648_v16 = vmul.f32 1.442695, %v3166_v37 }
0x1c81   :  { %2488 = vpow2.f32 %v1648_v16 }
0x1c87   :  { %v2489_v38 = vpop.eup %2488 }
0x1c88   :  { %v1650_v8 = vmul.f32 %v2489_v38, %v1573_v49 }
0x1c8a   :  { %1652 = vrot.lane.b32.xlu0 %v1650_v8, %s2543_s26 }
0x1cfc   :  { %v1653_v50 = vpop.permute.xlu0 %1652 }
0x1cfd   :  { %v3174_v11 = vadd.f32 %v1653_v50, %v3166_v37 }
0x1cff   :  { %2344 = vmatmul.msk.f32.vlgmr.msrb.gmra.mxu3 %vm347_vm2, %v3174_v11 }
0x1d82   :  { %v1677_v22 = vpop.f32.mrf.mxu3 }
0x1d83   :  { %v1678_v9 = vadd.f32 %v3207_v3, %v1677_v22  ;;  %v1951_v22 = vld [vmem:[%s3621_s1 + $0xa8] sm:$0xff] }
0x1d85   :  { %2490 = vtanh.f32 %v1678_v9  ;;  %v1950_v9 = vld [vmem:[%s3621_s1 + $0x48] sm:$0xff] }
0x1d8b   :  { %v2491_v27 = vpop.eup %2490 }
0x1d8c   :  { %2345 = vmatmul.msk.f32.vlgmr.msrb.gmra.mxu0 %vm124_vm1, %v2491_v27  ;;  %2346 = vmatmul.msk.f32.vlgmr.msra.gmra.mxu1 %vm124_vm1, %v2491_v27  ;;  %v3313_v27 = vld [vmem:[%s3623_s2 + $0x4] ss:$0 sm:$0xff] }
0x1e09   :  { %v1709_v62 = vpop.f32.mrf.mxu0 }
0x1e0a   :  { %v1749_v45 = vadd.f32 %v1709_v62, %v1571_v30 }
0x1e0c   :  { %v1750_v26 = vadd.f32 %v1749_v45, %v1596_v29 }
0x1e0e   :  { %v2347_v7 = vmul.f32 -1.442695, %v1750_v26 }
0x1e10   :  { %2492 = vpow2.f32 %v2347_v7 }
0x1e16   :  { %v2493_v46 = vpop.eup %2492 }
0x1e17   :  { %v1754_v21 = vadd.f32 1.0, %v2493_v46 }
0x1e19   :  { %2494 = vrcp.f32 %v1754_v21  ;;  %v1766_v53 = vand.u32 2147483648, %v1754_v21  ;;  %v1764_v58 = vand.u32 2147483647, %v1754_v21  ;;  %vm1760_vm15 = vweird.f32 %v1754_v21 }
0x1e1b   :  { %v1767_v60 = vor.u32 1.1754944e-38, %v1766_v53  ;;  %vm1765_vm4 = vcmp.eq.f32.partialorder %v1764_v58, 8.507059e+37  ;;  %v2082_v53 = vld [vmem:[%s3621_s1 + $0x110] sm:$0xff]  ;;  %v1789_v58 = vld [vmem:[#allocation2 + $0x78] sm:$0xff] }
0x1e1f   :  { %v2495_v23 = vpop.eup %2494 }
0x1e20   :  { %v1756_v35 = vmul.f32 %v2495_v23, %v1754_v21  ;;  %vm1761_vm14 = vweird.f32 %v2495_v23 }
0x1e21   :  { %vm1762_vm3 = vmor %vm1760_vm15, %vm1761_vm14 }
0x1e22   :  { %v1757_v47 = vsub.f32 1.0, %v1756_v35 }
0x1e24   :  { %v1758_v5 = vmul.f32 %v2495_v23, %v1757_v47 }
0x1e26   :  { %v1759_v59 = vadd.f32 %v2495_v23, %v1758_v5  ;;  %v2080_v5 = vld [vmem:[%s3621_s1 + $0x50] sm:$0xff] }
0x1e28   :  { %v1763_v61 = vsel %vm1762_vm3, %v2495_v23, %v1759_v59 }
0x1e29   :  { %v1768_v16 = vsel %vm1765_vm4, %v1767_v60, %v1763_v61 }
0x1e2a   :  { %v1770_v49 = vmul.f32 2.0, %v1768_v16  ;;  %v1772_v63 = vmul.f32 %v1768_v16, %v3121_v55 }
0x1e2c   :  { %v2348_v38 = vadd.f32 -1.0, %v1770_v49  ;;  %v2033_v49 = vld [vmem:[#allocation3 + $0x10] sm:$0xff] }
0x1e2e   :  { %1774 = vrot.lane.b32.xlu1 %v2348_v38, %s2544_s18 }
0x1ea0   :  { %v1775_v8 = vpop.permute.xlu1 %1774 }
0x1ea1   :  { %v1777_v50 = vmul.f32 %v1775_v8, %v1768_v16 }
0x1ea3   :  { %1779 = vrot.lane.b32.xlu2 %v1777_v50, %s2544_s18 }
0x1efd   :  { %v1780_v40 = vpop.permute.xlu2 %1779 }
0x1efe   :  { %v1782_v51 = vadd.f32 %v1780_v40, %v1772_v63 }
0x1f00   :  { %2496 = vtanh.f32 %v1782_v51 }
0x1f06   :  { %v2497_v42 = vpop.eup %2496 }
0x1f07   :  { %1785 = vrot.lane.b32.xlu0 %v2497_v42, %s2544_s18 }
0x1f0f   :  { %436 = vrot.lane.b32.xlu0 %v2776_v32, %s2546_s14  ;;  %v3264_v32 = vld [vmem:[#allocation3] sm:$0xff] }
0x1f17   :  { %1090 = vrot.lane.b32.xlu0 %v2993_v1, %s2546_s14 }
0x1f1f   :  { %1744 = vrot.lane.b32.xlu0 %v3153_v57, %s2546_s14 }
0x1f27   :  { %429 = vrot.lane.b32.xlu0 %v2799_v52, %s2544_s18  ;;  %v3272_v52 = vld [vmem:[#allocation3 + $0x30] sm:$0xff] }
0x1f2f   :  { %861 = vrot.lane.b32.xlu0 %v2949_v28, %s2547_s7 }
0x1f37   :  { %1083 = vrot.lane.b32.xlu0 %v3008_v24, %s2544_s18 }
0x1f3f   :  { %1515 = vrot.lane.b32.xlu0 %v3101_v19, %s2547_s7 }
0x1f47   :  { %1737 = vrot.lane.b32.xlu0 %v3174_v11, %s2544_s18  ;;  %v1729_v11 = vpop.f32.mrf.mxu1 }
0x1f4f   :  { %2047 = vrot.lane.b32.xlu0 %v3264_v32, %s2548_s8 }
0x1f57   :  { %2053 = vrot.lane.b32.xlu0 %v3268_v39, %s2548_s8 }
0x1f5f   :  { %2059 = vrot.lane.b32.xlu0 %v3272_v52, %s2548_s8 }
0x1f79   :  { %v1786_v28 = vpop.permute.xlu0 %1785 }
0x1f7a   :  { %v1788_v1 = vmul.f32 %v1786_v28, %v1768_v16  ;;  %v2032_v16 = vld [vmem:[#allocation3 + $0x8] sm:$0xff] }
0x1f7c   :  { %1792 = vrot.lane.b32.xlu1 %v1788_v1, %s2545_s19 }
0x1f81   :  { %v437_v24 = vpop.permute.xlu0 %436 }
0x1f82   :  { %v439_v19 = vadd.f32 %v437_v24, %v2887_v0 }
0x1f84   :  { %440 = vst.msk [vmem:[#allocation4] sm:$0xff] %vm124_vm1, %v439_v19  ;;  %654 = vrot.lane.b32.xlu1 %v2889_v6, %s2546_s14 }
0x1f89   :  { %v1091_v55 = vpop.permute.xlu0 %1090 }
0x1f8a   :  { %v1093_v57 = vadd.f32 %v1091_v55, %v3071_v54 }
0x1f8b   :  { %v1922_v29 = vld [vmem:[#allocation4] sm:$0xff] }
0x1f8c   :  { %1094 = vst.msk [vmem:[#allocation4 + $0x18] sm:$0xff] %vm124_vm1, %v1093_v57  ;;  %1308 = vrot.lane.b32.xlu1 %v3046_v33, %s2546_s14  ;;  %v1953_v33 = vld [vmem:[%s3621_s1 + $0x168] sm:$0xff]  ;;  %v1934_v30 = vadd.f32 %v3313_v27, %v1922_v29  ;;  %v3439_v29 = vld [vmem:[%s3623_s2 + $0x6] ss:$0 sm:$0xff] }
0x1f8d   :  { %1994 = vmatpush.msrb.mxu2 %v1953_v33 }
0x1f8e   :  { %2498 = vtanh.f32 %v1934_v30 }
0x1f8f   :  { %1995 = vmatpush.msrb.mxu2 %v1952_v4 }
0x1f91   :  { %v1745_v12 = vpop.permute.xlu0 %1744  ;;  %1996 = vmatpush.msrb.mxu2 %v1951_v22 }
0x1f92   :  { %v1747_v10 = vadd.f32 %v1745_v12, %v1729_v11 }
0x1f93   :  { %1997 = vmatpush.msrb.mxu2 %v1950_v9 }
0x1f94   :  { %1748 = vst.msk [vmem:[#allocation4 + $0x30] sm:$0xff] %vm124_vm1, %v1747_v10  ;;  %v2499_v45 = vpop.eup %2498 }
0x1f99   :  { %v3286_v15 = vpop.permute.xlu0 %429 }
0x1fa1   :  { %v862_v0 = vpop.permute.xlu0 %861 }
0x1fa2   :  { %864 = vst.msk [vmem:[%s3624_s3 + $0x10] sm:$0xff] %vm427_vm5, %v862_v0 }
0x1fa9   :  { %v3292_v6 = vpop.permute.xlu0 %1083 }
0x1fb1   :  { %v1516_v54 = vpop.permute.xlu0 %1515 }
0x1fb2   :  { %1518 = vst.msk [vmem:[%s3624_s3 + $0x28] sm:$0xff] %vm427_vm5, %v1516_v54 }
0x1fb9   :  { %v3430_v33 = vpop.permute.xlu0 %1737 }
0x1fee   :  { %v1793_v62 = vpop.permute.xlu1 %1792 }
0x1fef   :  { %1915 = vst.msk [vmem:[#allocation3 + $0x38] sm:$0xff] %vm124_vm1, %v1793_v62  ;;  %2349 = vmatmul.msk.f32.vlgmr.msra.gmra.mxu2 %vm124_vm1, %v1793_v62  ;;  %v1925_v62 = vld [vmem:[#allocation4 + $0x18] sm:$0xff] }
0x1ff6   :  { %v655_v26 = vpop.permute.xlu1 %654 }
0x1ff7   :  { %v657_v7 = vadd.f32 %v655_v26, %v2963_v44  ;;  %2353 = vmatmul.msk.f32.vlgmr.msrb.gmra.mxu2 %vm124_vm1, %v2499_v45  ;;  %v2083_v44 = vld [vmem:[%s3621_s1 + $0x170] sm:$0xff] }
0x1ff8   :  { %2116 = vmatpush.msrb.mxu3 %v2083_v44 }
0x1ff9   :  { %658 = vst.msk [vmem:[#allocation4 + $0x8] sm:$0xff] %vm124_vm1, %v657_v7 }
0x1ffa   :  { %2117 = vmatpush.msrb.mxu3 %v2082_v53 }
0x1ffe   :  { %v1309_v46 = vpop.permute.xlu1 %1308 }
0x1fff   :  { %v1311_v21 = vadd.f32 %v1309_v46, %v3113_v36  ;;  %v2081_v36 = vld [vmem:[%s3621_s1 + $0xb0] sm:$0xff]  ;;  %v1937_v46 = vadd.f32 %v3313_v27, %v1925_v62 }
0x2000   :  { %v1923_v23 = vld [vmem:[#allocation4 + $0x8] sm:$0xff]  ;;  %2118 = vmatpush.msrb.mxu3 %v2081_v36 }
0x2001   :  { %1312 = vst.msk [vmem:[#allocation4 + $0x20] sm:$0xff] %vm124_vm1, %v1311_v21  ;;  %v1935_v35 = vadd.f32 %v3313_v27, %v1923_v23 }
0x2002   :  { %2119 = vmatpush.msrb.mxu3 %v2080_v5 }
0x2003   :  { %2500 = vtanh.f32 %v1935_v35  ;;  %v2048_v35 = vpop.permute.xlu0 %2047 }
0x2009   :  { %v2501_v47 = vpop.eup %2500 }
0x200a   :  { %2354 = vmatmul.msk.f32.gmra.mxu2 %vm124_vm1, %v2501_v47 }
0x2072   :  { %v1813_v59 = vpop.f32.mrf.mxu2 }
0x2073   :  { %v1816_v60 = vadd.f32 %v1813_v59, %v1789_v58  ;;  %1917 = vrot.lane.b32.xlu1 %v1813_v59, %s2546_s14 }
0x2075   :  { %2502 = vtanh.f32 %v1816_v60 }
0x207a   :  { %v1999_v30 = vpop.f32.mrf.mxu2 }
0x207b   :  { %v2503_v61 = vpop.eup %2502  ;;  %643 = vrot.lane.b32.xlu1 %v2898_v13, %s2547_s7  ;;  %v2035_v13 = vld [vmem:[#allocation3 + $0x20] sm:$0xff]  ;;  %v2000_v7 = vadd.f32 %v3439_v29, %v1999_v30 }
0x207c   :  { %2350 = vmatmul.msk.f32.vlgmr.msra.gmra.mxu3 %vm124_vm1, %v2503_v61 }
0x2083   :  { %865 = vrot.lane.b32.xlu1 %v2955_v34, %s2544_s18  ;;  %v2036_v34 = vld [vmem:[#allocation3 + $0x28] sm:$0xff] }
0x2084   :  { %2361 = vmatmul.msk.f32.vlgmr.msrb.gmra.mxu3 %vm124_vm1, %v3264_v32  ;;  %v1790_v32 = vld [vmem:[%s3622_s0 + $0x38] sm:$0xff] }
0x208b   :  { %1297 = vrot.lane.b32.xlu1 %v3055_v20, %s2547_s7  ;;  %v2038_v20 = vld [vmem:[#allocation3 + $0x38] sm:$0xff] }
0x208c   :  { %2362 = vmatmul.msk.f32.gmra.mxu3 %vm124_vm1, %v2032_v16 }
0x208d   :  { %v2002_v47 = vpop.f32.mrf.mxu2 }
0x208e   :  { %v2003_v44 = vadd.f32 %v3439_v29, %v2002_v47 }
0x2093   :  { %1519 = vrot.lane.b32.xlu1 %v3109_v56, %s2544_s18 }
0x2094   :  { %2363 = vmatmul.msk.f32.gmra.mxu3 %vm124_vm1, %v2033_v49 }
0x209c   :  { %2364 = vmatmul.msk.f32.gmra.mxu3 %vm124_vm1, %v3268_v39 }
0x20a4   :  { %2365 = vmatmul.msk.f32.gmra.mxu3 %vm124_vm1, %v2035_v13 }
0x20ac   :  { %2366 = vmatmul.msk.f32.gmra.mxu3 %vm124_vm1, %v2036_v34 }
0x20b4   :  { %2367 = vmatmul.msk.f32.gmra.mxu3 %vm124_vm1, %v3272_v52 }
0x20bc   :  { %2368 = vmatmul.msk.f32.gmra.mxu3 %vm124_vm1, %v2038_v20 }
0x20e5   :  { %v3358_v38 = vpop.permute.xlu1 %1917 }
0x20ed   :  { %v644_v56 = vpop.permute.xlu1 %643 }
0x20ee   :  { %646 = vst.msk [vmem:[%s3624_s3 + $0x8] sm:$0xff] %vm427_vm5, %v644_v56 }
0x20f5   :  { %v866_v8 = vpop.permute.xlu1 %865 }
0x20f6   :  { %868 = vst.msk [vmem:[%s3624_s3 + $0x10] sm:$0xff] %vm432_vm6, %v866_v8 }
0x20fd   :  { %v1298_v50 = vpop.permute.xlu1 %1297 }
0x20fe   :  { %1300 = vst.msk [vmem:[%s3624_s3 + $0x20] sm:$0xff] %vm427_vm5, %v1298_v50  ;;  %v1928_v50 = vld [vmem:[#allocation4 + $0x30] sm:$0xff] }
0x20ff   :  { %v1842_v63 = vpop.f32.mrf.mxu3 }
0x2100   :  { %v1843_v40 = vadd.f32 %v3163_v48, %v1842_v63  ;;  %v3416_v48 = vld [vmem:[%s3623_s2 + $0x7] ss:$0 sm:$0xff] }
0x2102   :  { %v1845_v51 = vmul.f32 1.442695, %v1843_v40  ;;  %1906 = vrot.lane.b32.xlu1 %v1843_v40, %s2547_s7 }
0x2104   :  { %2504 = vpow2.f32 %v1845_v51  ;;  %v1940_v51 = vadd.f32 %v3313_v27, %v1928_v50 }
0x2105   :  { %v1520_v42 = vpop.permute.xlu1 %1519 }
0x2106   :  { %1522 = vst.msk [vmem:[%s3624_s3 + $0x28] sm:$0xff] %vm432_vm6, %v1520_v42 }
0x210a   :  { %v2505_v39 = vpop.eup %2504  ;;  %2049 = vrot.lane.b32.xlu1 %v2032_v16, %s2548_s8 }
0x210b   :  { %v1847_v52 = vmul.f32 %v2505_v39, %v1790_v32 }
0x210d   :  { %1849 = vrot.lane.b32.xlu2 %v1847_v52, %s2543_s26 }
0x2112   :  { %2055 = vrot.lane.b32.xlu1 %v2035_v13, %s2548_s8 }
0x2115   :  { %872 = vrot.lane.b32.xlu2 %v2940_v25, %s2546_s14  ;;  %v2156_v25 = vld [vmem:[%s3621_s1 + $0x178] sm:$0xff] }
0x2116   :  { %2197 = vmatpush.msrb.mxu0 %v2156_v25 }
0x211a   :  { %2061 = vrot.lane.b32.xlu1 %v2038_v20, %s2548_s8 }
0x211d   :  { %1526 = vrot.lane.b32.xlu2 %v3096_v31, %s2546_s14 }
0x2125   :  { %424 = vrot.lane.b32.xlu2 %v2793_v43, %s2547_s7  ;;  %v2155_v43 = vld [vmem:[%s3621_s1 + $0x118] sm:$0xff] }
0x2126   :  { %2198 = vmatpush.msrb.mxu0 %v2155_v43 }
0x212d   :  { %647 = vrot.lane.b32.xlu2 %v2904_v18, %s2544_s18  ;;  %v2154_v18 = vld [vmem:[%s3621_s1 + $0xb8] sm:$0xff] }
0x212e   :  { %2199 = vmatpush.msrb.mxu0 %v2154_v18 }
0x2135   :  { %1079 = vrot.lane.b32.xlu2 %v3002_v14, %s2547_s7  ;;  %v2153_v14 = vld [vmem:[%s3621_s1 + $0x58] sm:$0xff] }
0x2136   :  { %2200 = vmatpush.msrb.mxu0 %v2153_v14 }
0x213d   :  { %1301 = vrot.lane.b32.xlu2 %v3063_v2, %s2544_s18  ;;  %v2121_v2 = vpop.f32.mrf.mxu3 }
0x2145   :  { %1733 = vrot.lane.b32.xlu2 %v3166_v37, %s2547_s7  ;;  %v2124_v31 = vpop.f32.mrf.mxu3  ;;  %v2122_v37 = vadd.f32 %v3416_v48, %v2121_v2 }
0x2146   :  { %v2125_v55 = vadd.f32 %v3416_v48, %v2124_v31 }
0x2147   :  { %2506 = vtanh.f32 %v2122_v37 }
0x2148   :  { %2508 = vtanh.f32 %v2125_v55 }
0x214d   :  { %2051 = vrot.lane.b32.xlu2 %v2033_v49, %s2548_s8  ;;  %v2127_v24 = vpop.f32.mrf.mxu3  ;;  %v2507_v19 = vpop.eup %2506 }
0x214e   :  { %v2128_v0 = vadd.f32 %v3416_v48, %v2127_v24 }
0x2150   :  { %2510 = vtanh.f32 %v2128_v0 }
0x2155   :  { %2057 = vrot.lane.b32.xlu2 %v2036_v34, %s2548_s8  ;;  %v2130_v12 = vpop.f32.mrf.mxu3 }
0x215d   :  { %v2133_v45 = vpop.f32.mrf.mxu3 }
0x215e   :  { %v2134_v53 = vadd.f32 %v3416_v48, %v2133_v45 }
0x2165   :  { %v2136_v5 = vpop.f32.mrf.mxu3 }
0x2166   :  { %v2137_v49 = vadd.f32 %v3416_v48, %v2136_v5 }
0x2167   :  { %v1850_v28 = vpop.permute.xlu2 %1849 }
0x2168   :  { %v1852_v1 = vadd.f32 %v1850_v28, %v1843_v40  ;;  %v2397_v28 = vld [vmem:[%s3623_s2 + $0x8] ss:$0 sm:$0xff] }
0x216a   :  { %2351 = vmatmul.msk.f32.vlgmr.msra.gmra.mxu0 %vm347_vm2, %v1852_v1  ;;  %1910 = vrot.lane.b32.xlu2 %v1852_v1, %s2544_s18  ;;  %vm2071_vm2 = vcmask 589120  }
0x216d   :  { %v2139_v8 = vpop.f32.mrf.mxu3 }
0x216e   :  { %v2140_v63 = vadd.f32 %v3416_v48, %v2139_v8 }
0x216f   :  { %v873_v57 = vpop.permute.xlu2 %872 }
0x2170   :  { %v875_v11 = vadd.f32 %v873_v57, %v3016_v41  ;;  %v2509_v41 = vpop.eup %2508 }
0x2171   :  { %v2511_v21 = vpop.eup %2510 }
0x2172   :  { %876 = vst.msk [vmem:[#allocation4 + $0x10] sm:$0xff] %vm124_vm1, %v875_v11  ;;  %2369 = vmatmul.msk.f32.vlgmr.msrb.gmra.mxu0 %vm124_vm1, %v2507_v19 }
0x2174   :  { %v1907_v10 = vpop.permute.xlu1 %1906 }
0x2175   :  { %1909 = vst.msk [vmem:[%s3624_s3 + $0x38] sm:$0xff] %vm427_vm5, %v1907_v10  ;;  %v2142_v32 = vpop.f32.mrf.mxu3 }
0x2176   :  { %v2143_v39 = vadd.f32 %v3416_v48, %v2142_v32 }
0x2177   :  { %v1527_v54 = vpop.permute.xlu2 %1526 }
0x2178   :  { %v1529_v4 = vadd.f32 %v1527_v54, %v3202_v17  ;;  %v2131_v17 = vadd.f32 %v3416_v48, %v2130_v12 }
0x2179   :  { %v1924_v22 = vld [vmem:[#allocation4 + $0x10] sm:$0xff] }
0x217a   :  { %1530 = vst.msk [vmem:[#allocation4 + $0x28] sm:$0xff] %vm124_vm1, %v1529_v4  ;;  %2370 = vmatmul.msk.f32.gmra.mxu0 %vm124_vm1, %v2509_v41  ;;  %v1936_v9 = vadd.f32 %v3313_v27, %v1924_v22 }
0x217c   :  { %2512 = vtanh.f32 %v1936_v9  ;;  %v2050_v60 = vpop.permute.xlu1 %2049  ;;  %v2054_v9 = vpop.permute.xlu0 %2053 }
0x217d   :  { %2514 = vtanh.f32 %v2131_v17 }
0x217e   :  { %2516 = vtanh.f32 %v1937_v46 }
0x217f   :  { %v425_v26 = vpop.permute.xlu2 %424  ;;  %2518 = vtanh.f32 %v2134_v53 }
0x2180   :  { %428 = vst.msk [vmem:[%s3624_s3] sm:$0xff] %vm427_vm5, %v425_v26 }
0x2181   :  { %433 = vst.msk [vmem:[%s3624_s3] sm:$0xff] %vm432_vm6, %v3286_v15  ;;  %v1926_v15 = vld [vmem:[#allocation4 + $0x20] sm:$0xff]  ;;  %v1927_v16 = vld [vmem:[#allocation4 + $0x28] sm:$0xff] }
0x2182   :  { %v2513_v23 = vpop.eup %2512  ;;  %2023 = vst.msk [vmem:[%s3624_s3] sm:$0xff] %vm36_vm0, %v2000_v7  ;;  %2371 = vmatmul.msk.f32.gmra.mxu0 %vm124_vm1, %v2511_v21  ;;  %v1938_v58 = vadd.f32 %v3313_v27, %v1926_v15  ;;  %v1939_v34 = vadd.f32 %v3313_v27, %v1927_v16 }
0x2183   :  { %2355 = vmatmul.msk.f32.gmra.mxu2 %vm124_vm1, %v2513_v23  ;;  %2072 = vst.msk [vmem:[%s3624_s3] sm:$0xff] %vm2071_vm2, %v2048_v35  ;;  %v2515_v59 = vpop.eup %2514 }
0x2184   :  { %v2517_v61 = vpop.eup %2516  ;;  %2520 = vtanh.f32 %v1938_v58  ;;  %v2056_v26 = vpop.permute.xlu1 %2055 }
0x2185   :  { %v2519_v20 = vpop.eup %2518  ;;  %2522 = vtanh.f32 %v2137_v49  ;;  %v2060_v53 = vpop.permute.xlu0 %2059 }
0x2186   :  { %2524 = vtanh.f32 %v1939_v34 }
0x2187   :  { %v648_v36 = vpop.permute.xlu2 %647  ;;  %2526 = vtanh.f32 %v2140_v63 }
0x2188   :  { %650 = vst.msk [vmem:[%s3624_s3 + $0x8] sm:$0xff] %vm432_vm6, %v648_v36  ;;  %2528 = vtanh.f32 %v1940_v51 }
0x2189   :  { %2024 = vst.msk [vmem:[%s3624_s3 + $0x8] sm:$0xff] %vm36_vm0, %v2003_v44  ;;  %2530 = vtanh.f32 %v2143_v39 }
0x218a   :  { %2372 = vmatmul.msk.f32.gmra.mxu0 %vm124_vm1, %v2515_v59  ;;  %2073 = vst.msk [vmem:[%s3624_s3 + $0x8] sm:$0xff] %vm2071_vm2, %v2050_v60  ;;  %v2521_v56 = vpop.eup %2520 }
0x218b   :  { %2356 = vmatmul.msk.f32.gmra.mxu2 %vm124_vm1, %v2517_v61 }
0x218c   :  { %v2062_v58 = vpop.permute.xlu1 %2061 }
0x218f   :  { %v1080_v13 = vpop.permute.xlu2 %1079 }
0x2190   :  { %1082 = vst.msk [vmem:[%s3624_s3 + $0x18] sm:$0xff] %vm427_vm5, %v1080_v13 }
0x2191   :  { %1086 = vst.msk [vmem:[%s3624_s3 + $0x18] sm:$0xff] %vm432_vm6, %v3292_v6  ;;  %v2523_v6 = vpop.eup %2522 }
0x2192   :  { %2373 = vmatmul.msk.f32.gmra.mxu0 %vm124_vm1, %v2519_v20  ;;  %v2525_v42 = vpop.eup %2524 }
0x2193   :  { %2357 = vmatmul.msk.f32.gmra.mxu2 %vm124_vm1, %v2521_v56  ;;  %v2527_v25 = vpop.eup %2526 }
0x2194   :  { %v2529_v43 = vpop.eup %2528 }
0x2195   :  { %v2531_v18 = vpop.eup %2530 }
0x2197   :  { %v1302_v40 = vpop.permute.xlu2 %1301 }
0x2198   :  { %1304 = vst.msk [vmem:[%s3624_s3 + $0x20] sm:$0xff] %vm432_vm6, %v1302_v40 }
0x219a   :  { %2374 = vmatmul.msk.f32.gmra.mxu0 %vm124_vm1, %v2523_v6 }
0x219b   :  { %2358 = vmatmul.msk.f32.gmra.mxu2 %vm124_vm1, %v2525_v42 }
0x219f   :  { %v1734_v52 = vpop.permute.xlu2 %1733 }
0x21a0   :  { %1736 = vst.msk [vmem:[%s3624_s3 + $0x30] sm:$0xff] %vm427_vm5, %v1734_v52 }
0x21a1   :  { %1740 = vst.msk [vmem:[%s3624_s3 + $0x30] sm:$0xff] %vm432_vm6, %v3430_v33 }
0x21a2   :  { %2375 = vmatmul.msk.f32.gmra.mxu0 %vm124_vm1, %v2527_v25 }
0x21a3   :  { %2359 = vmatmul.msk.f32.gmra.mxu2 %vm124_vm1, %v2529_v43 }
0x21a7   :  { %v2052_v14 = vpop.permute.xlu2 %2051 }
0x21aa   :  { %2376 = vmatmul.msk.f32.gmra.mxu0 %vm124_vm1, %v2531_v18 }
0x21af   :  { %v2058_v2 = vpop.permute.xlu2 %2057 }
0x21c4   :  { %v1911_v31 = vpop.permute.xlu2 %1910 }
0x21c5   :  { %1913 = vst.msk [vmem:[%s3624_s3 + $0x38] sm:$0xff] %vm432_vm6, %v1911_v31 }
0x21e7   :  { %v1874_v48 = vpop.f32.mrf.mxu0 }
0x21e8   :  { %v1875_v37 = vadd.f32 %v3207_v3, %v1874_v48 }
0x21ea   :  { %2532 = vtanh.f32 %v1875_v37 }
0x21ef   :  { %v2202_v1 = vpop.f32.mrf.mxu0 }
0x21f0   :  { %v2533_v24 = vpop.eup %2532  ;;  %v2203_v19 = vadd.f32 %v2397_v28, %v2202_v1 }
0x21f1   :  { %2352 = vmatmul.msk.f32.vlgmr.msrb.gmra.mxu1 %vm124_vm1, %v2533_v24 }
0x21f2   :  { %2234 = vrot.lane.b32.xlu2 %v2203_v19, %s2549_s28 }
0x21f7   :  { %v2205_v55 = vpop.f32.mrf.mxu0 }
0x21f8   :  { %v2206_v57 = vadd.f32 %v2397_v28, %v2205_v55 }
0x21fa   :  { %2236 = vrot.lane.b32.xlu0 %v2206_v57, %s2549_s28 }
0x21ff   :  { %v2208_v11 = vpop.f32.mrf.mxu0 }
0x2200   :  { %v2209_v12 = vadd.f32 %v2397_v28, %v2208_v11 }
0x2202   :  { %2238 = vrot.lane.b32.xlu1 %v2209_v12, %s2549_s28 }
0x2206   :  { %v2005_v3 = vpop.f32.mrf.mxu2 }
0x2207   :  { %v2006_v10 = vadd.f32 %v3439_v29, %v2005_v3  ;;  %v2211_v0 = vpop.f32.mrf.mxu0 }
0x2208   :  { %v2212_v54 = vadd.f32 %v2397_v28, %v2211_v0 }
0x2209   :  { %2025 = vst.msk [vmem:[%s3624_s3 + $0x10] sm:$0xff] %vm36_vm0, %v2006_v10 }
0x220a   :  { %2240 = vrot.lane.b32.xlu2 %v2212_v54, %s2549_s28  ;;  %2074 = vst.msk [vmem:[%s3624_s3 + $0x10] sm:$0xff] %vm2071_vm2, %v2052_v14 }
0x220e   :  { %v2008_v33 = vpop.f32.mrf.mxu2 }
0x220f   :  { %v2009_v4 = vadd.f32 %v3439_v29, %v2008_v33  ;;  %v2214_v41 = vpop.f32.mrf.mxu0 }
0x2210   :  { %v2215_v22 = vadd.f32 %v2397_v28, %v2214_v41 }
0x2211   :  { %2026 = vst.msk [vmem:[%s3624_s3 + $0x18] sm:$0xff] %vm36_vm0, %v2009_v4 }
0x2212   :  { %2242 = vrot.lane.b32.xlu0 %v2215_v22, %s2549_s28  ;;  %2075 = vst.msk [vmem:[%s3624_s3 + $0x18] sm:$0xff] %vm2071_vm2, %v2054_v9 }
0x2216   :  { %v2011_v30 = vpop.f32.mrf.mxu2 }
0x2217   :  { %v2012_v62 = vadd.f32 %v3439_v29, %v2011_v30  ;;  %v2217_v45 = vpop.f32.mrf.mxu0 }
0x2218   :  { %v2218_v17 = vadd.f32 %v2397_v28, %v2217_v45 }
0x2219   :  { %2027 = vst.msk [vmem:[%s3624_s3 + $0x20] sm:$0xff] %vm36_vm0, %v2012_v62 }
0x221a   :  { %2244 = vrot.lane.b32.xlu1 %v2218_v17, %s2549_s28  ;;  %2076 = vst.msk [vmem:[%s3624_s3 + $0x20] sm:$0xff] %vm2071_vm2, %v2056_v26 }
0x221e   :  { %v2014_v7 = vpop.f32.mrf.mxu2 }
0x221f   :  { %v2015_v46 = vadd.f32 %v3439_v29, %v2014_v7  ;;  %v2220_v21 = vpop.f32.mrf.mxu0 }
0x2220   :  { %v2221_v23 = vadd.f32 %v2397_v28, %v2220_v21 }
0x2221   :  { %2028 = vst.msk [vmem:[%s3624_s3 + $0x28] sm:$0xff] %vm36_vm0, %v2015_v46 }
0x2222   :  { %2246 = vrot.lane.b32.xlu2 %v2221_v23, %s2549_s28  ;;  %2077 = vst.msk [vmem:[%s3624_s3 + $0x28] sm:$0xff] %vm2071_vm2, %v2058_v2 }
0x2226   :  { %v2017_v35 = vpop.f32.mrf.mxu2 }
0x2227   :  { %v2018_v47 = vadd.f32 %v3439_v29, %v2017_v35  ;;  %v2223_v15 = vpop.f32.mrf.mxu0 }
0x2228   :  { %v2224_v44 = vadd.f32 %v2397_v28, %v2223_v15 }
0x2229   :  { %2029 = vst.msk [vmem:[%s3624_s3 + $0x30] sm:$0xff] %vm36_vm0, %v2018_v47 }
0x222a   :  { %2248 = vrot.lane.b32.xlu0 %v2224_v44, %s2549_s28  ;;  %2078 = vst.msk [vmem:[%s3624_s3 + $0x30] sm:$0xff] %vm2071_vm2, %v2060_v53 }
0x224c   :  { %v2235_v36 = vpop.permute.xlu2 %2234 }
0x224d   :  { %2259 = vst.msk [vmem:[%s3624_s3] sm:$0xff] %vm2258_vm7, %v2235_v36 }
0x2264   :  { %v2241_v5 = vpop.permute.xlu2 %2240 }
0x2265   :  { %2262 = vst.msk [vmem:[%s3624_s3 + $0x18] sm:$0xff] %vm2258_vm7, %v2241_v5 }
0x226c   :  { %v2237_v59 = vpop.permute.xlu0 %2236 }
0x226d   :  { %2260 = vst.msk [vmem:[%s3624_s3 + $0x8] sm:$0xff] %vm2258_vm7, %v2237_v59 }
0x226e   :  { %v1902_v60 = vpop.f32.mrf.mxu1 }
0x226f   :  { %v1920_v61 = vadd.f32 %v3358_v38, %v1902_v60 }
0x2271   :  { %1921 = vst.msk [vmem:[#allocation4 + $0x38] sm:$0xff] %vm124_vm1, %v1920_v61 }
0x2274   :  { %v2239_v16 = vpop.permute.xlu1 %2238 }
0x2275   :  { %2261 = vst.msk [vmem:[%s3624_s3 + $0x10] sm:$0xff] %vm2258_vm7, %v2239_v16 }
0x2278   :  { %v1929_v49 = vld [vmem:[#allocation4 + $0x38] sm:$0xff] }
0x2279   :  { %v1941_v13 = vadd.f32 %v3313_v27, %v1929_v49 }
0x227b   :  { %2534 = vtanh.f32 %v1941_v13 }
0x227c   :  { %v2247_v34 = vpop.permute.xlu2 %2246 }
0x227d   :  { %2265 = vst.msk [vmem:[%s3624_s3 + $0x30] sm:$0xff] %vm2258_vm7, %v2247_v34 }
0x2281   :  { %v2535_v20 = vpop.eup %2534 }
0x2282   :  { %2360 = vmatmul.msk.f32.gmra.mxu2 %vm124_vm1, %v2535_v20 }
0x2284   :  { %v2243_v38 = vpop.permute.xlu0 %2242 }
0x2285   :  { %2263 = vst.msk [vmem:[%s3624_s3 + $0x20] sm:$0xff] %vm2258_vm7, %v2243_v38 }
0x228c   :  { %v2245_v56 = vpop.permute.xlu1 %2244 }
0x228d   :  { %2264 = vst.msk [vmem:[%s3624_s3 + $0x28] sm:$0xff] %vm2258_vm7, %v2245_v56 }
0x229c   :  { %v2249_v50 = vpop.permute.xlu0 %2248 }
0x2305   :  { %v2020_v27 = vpop.f32.mrf.mxu2 }
0x2306   :  { %v2021_v8 = vadd.f32 %v3439_v29, %v2020_v27 }
0x2308   :  { %2030 = vst.msk [vmem:[%s3624_s3 + $0x38] sm:$0xff] %vm36_vm0, %v2021_v8 }
0x2309   :  { %2079 = vst.msk [vmem:[%s3624_s3 + $0x38] sm:$0xff] %vm2071_vm2, %v2062_v58 }
0x230a   :  { %2266 = vst.msk [vmem:[%s3624_s3 + $0x38] sm:$0xff] %vm2258_vm7, %v2249_v50 }

</bundles_post_ra>
